<compile_context>
chip_gen: v5e
topology: v5e:2x2
jax: 0.10.0
libtpu: 0.0.40
codegen_flags: <defaults>
</compile_context>

<pallas_src>
import functools

import jax
import jax.numpy as jnp
from jax.experimental import pallas as pl
from jax.experimental.pallas import tpu as pltpu  # noqa: F401  (TPU backend assumed)

# ---- model config (args.gt.*) -------------------------------------------------
D_MODEL = 32          # args.gt.d_model
NHEAD = 4             # args.gt.nhead
DIM_FF = 64           # args.gt.dim_feedforward
NUM_LAYERS = 2        # args.gt.num_encoder_layers
SEQ = 8               # n_b (nodes per graph, before cls)
BATCH = 2             # B
LN_EPS = 1e-5         # nn.LayerNorm default eps
NEG_INF = -1e30       # additive key-padding mask value


def _layernorm(x, w, b):
    mu = jnp.mean(x, axis=-1, keepdims=True)
    var = jnp.mean((x - mu) ** 2, axis=-1, keepdims=True)
    return (x - mu) * jax.lax.rsqrt(var + LN_EPS) * w + b


# ---- kernel -------------------------------------------------------------------
def fused_encoder_kernel(nhead,
                         h_ref, cls_ref, mask_ref,
                         niw_ref, nib_ref,
                         wqkv_ref, bqkv_ref, wo_ref, bo_ref,
                         n1w_ref, n1b_ref, n2w_ref, n2b_ref,
                         w1_ref, b1_ref, w2_ref, b2_ref,
                         fw_ref, fb_ref,
                         o_ref):
    """Entire TransformerNodeEncoder forward for the whole (tiny) batch."""
    S, B, D = h_ref.shape                 # seq-first input, as the module receives it
    S1 = S + 1                            # + cls token
    Sp = ((S1 + 7) // 8) * 8              # pad sequence to an 8-sublane multiple
    M = B * Sp
    L = wqkv_ref.shape[0]
    H = nhead
    dh = D // H
    f32, bf16 = jnp.float32, jnp.bfloat16

    # ---- build the (M, D) batch-major activation in-kernel (cls concat + pad) ----
    # rows per batch b: [node_0..node_{S-1}, cls, 0, ..., 0]  (Sp rows)
    cls_row = cls_ref[...].reshape(1, D)
    pad_rows = Sp - S
    row_id = jax.lax.broadcasted_iota(jnp.int32, (pad_rows, D), 0)
    clspad = jnp.where(row_id == 0, jnp.broadcast_to(cls_row, (pad_rows, D)), 0.0)
    pieces = []
    for b in range(B):                    # static unroll (B = 2)
        pieces.append(h_ref[:, b, :])     # (S, D)  seq-first -> batch-major rows
        pieces.append(clspad)             # (Sp - S, D): cls row + zero padding
    x = jnp.concatenate(pieces, axis=0)   # (M, D) f32

    # ---- additive key-padding mask, extended for cls + padding, hoisted ONCE ----
    # columns: 0..S-1 from the caller's mask, S (cls) always valid, S+1.. padded.
    tail_id = jax.lax.broadcasted_iota(jnp.int32, (B, Sp - S), 1)
    tail = jnp.where(tail_id == 0, 0.0, NEG_INF)                       # (B, Sp-S)
    mask_row = jnp.concatenate([mask_ref[...], tail], axis=1)          # (B, Sp)
    mask_bsp = jnp.broadcast_to(mask_row[:, None, :], (B, Sp, Sp))     # (B, Sp, Sp)
    mask_full = jnp.concatenate([mask_bsp] * H, axis=0)                # (H*B, Sp, Sp)

    # ---- input LayerNorm (transformer_norm_input = True) ----
    x = _layernorm(x, niw_ref[...], nib_ref[...])

    for l in range(L):                    # static unroll (L = 2)
        # ---- QKV projection (bf16 operands, f32 accumulate; Q scale pre-folded) ----
        qkv = jnp.dot(x.astype(bf16), wqkv_ref[l],
                      preferred_element_type=f32) + bqkv_ref[l]        # (M, 3D) f32
        qkv = qkv.astype(bf16)
        q = qkv[:, 0 * D:1 * D]
        k = qkv[:, 1 * D:2 * D]
        v = qkv[:, 2 * D:3 * D]

        # ---- batch all heads into one (H*B, Sp, dh) tensor, single einsum pair ----
        qh = jnp.concatenate(
            [q[:, h * dh:(h + 1) * dh].reshape(B, Sp, dh) for h in range(H)], axis=0)
        kh = jnp.concatenate(
            [k[:, h * dh:(h + 1) * dh].reshape(B, Sp, dh) for h in range(H)], axis=0)
        vh = jnp.concatenate(
            [v[:, h * dh:(h + 1) * dh].reshape(B, Sp, dh) for h in range(H)], axis=0)

        s = jnp.einsum('bqd,bkd->bqk', qh, kh,
                       preferred_element_type=f32)                     # (H*B, Sp, Sp)
        s = s + mask_full
        s = s - jnp.max(s, axis=-1, keepdims=True)
        e = jnp.exp(s)
        p = e * pl.reciprocal(jnp.sum(e, axis=-1, keepdims=True), approx=True)
        ctx = jnp.einsum('bqk,bkd->bqd', p.astype(bf16), vh,
                         preferred_element_type=f32)                   # (H*B, Sp, dh)

        # ---- re-assemble heads along lanes, single K=32 out-projection dot ----
        ctxb = ctx.astype(bf16)
        attn_in = jnp.concatenate(
            [ctxb[h * B:(h + 1) * B].reshape(M, dh) for h in range(H)], axis=1)  # (M, D)
        attn = jnp.dot(attn_in, wo_ref[l], preferred_element_type=f32) + bo_ref[l]

        # residual + norm1 (post-norm)
        x = _layernorm(x + attn, n1w_ref[l], n1b_ref[l])

        # ---- feed-forward (ReLU), bf16 operands, f32 accumulate ----
        ff = jnp.dot(x.astype(bf16), w1_ref[l], preferred_element_type=f32) + b1_ref[l]
        ff = jnp.maximum(ff, 0.0)
        ff = jnp.dot(ff.astype(bf16), w2_ref[l], preferred_element_type=f32) + b2_ref[l]

        # residual + norm2
        x = _layernorm(x + ff, n2w_ref[l], n2b_ref[l])

    # ---- final encoder LayerNorm + emit seq-first (S1, B, D) directly ----
    x = _layernorm(x, fw_ref[...], fb_ref[...])
    outs = [x[b * Sp:b * Sp + S1, :].reshape(S1, 1, D) for b in range(B)]
    o_ref[...] = jnp.concatenate(outs, axis=1).astype(o_ref.dtype)     # (S1, B, D)


# ---- module forward (single pallas_call, minimal wrapper) ----------------------
def transformer_node_encoder_forward(padded_h_node, src_padding_mask, params):
    """
    padded_h_node: (n_b, B, d_model) float32   (seq-first, like PyTorch)
    src_padding_mask: (B, n_b) bool, True = padded
    returns (transformer_out (n_b+1, B, d_model), src_padding_mask (B, n_b+1))
    """
    S, B, D = padded_h_node.shape

    # mask extension is part of the module's *return value*, so it stays outside.
    zeros = jnp.zeros((B, 1), dtype=src_padding_mask.dtype)
    mask_out = jnp.concatenate([src_padding_mask, zeros], axis=1)      # (B, S+1)

    # bool -> additive mask (single tiny elementwise op); everything else in-kernel.
    mask_add = jnp.where(src_padding_mask, NEG_INF, 0.0).astype(jnp.float32)

    kernel = functools.partial(fused_encoder_kernel, NHEAD)
    out = pl.pallas_call(
        kernel,
        out_shape=jax.ShapeDtypeStruct((S + 1, B, D), jnp.float32),
    )(padded_h_node, params["cls_embedding"], mask_add,
      params["norm_in_w"], params["norm_in_b"],
      params["wqkv"], params["bqkv"], params["wo"], params["bo"],
      params["n1w"], params["n1b"], params["n2w"], params["n2b"],
      params["w1"], params["b1"], params["w2"], params["b2"],
      params["final_w"], params["final_b"])

    return out, mask_out


# ---- deterministic parameter init (weights stacked over layers, bf16 matmul wts) ----
def init_params(key):
    keys = jax.random.split(key, 1 + NUM_LAYERS)

    def w(k, shape, scale=0.05):
        return (scale * jax.random.normal(k, shape)).astype(jnp.float32)

    D, F, H, L = D_MODEL, DIM_FF, NHEAD, NUM_LAYERS
    dh = D // H
    qk_scale = 1.0 / float(dh) ** 0.5

    wqkv, wo, w1, w2 = [], [], [], []
    for i in range(L):
        lk = jax.random.split(keys[1 + i], 4)
        # weights stored pre-transposed so the kernel does x @ W
        # (PyTorch Linear is x @ W.T — transpose when importing real weights).
        wq = w(lk[0], (D, 3 * D))
        # fold 1/sqrt(dh) into the Q columns once at parameter-prep time
        # (also fold into the Q bias block when importing non-zero real biases).
        wq = wq.at[:, :D].multiply(qk_scale)
        wqkv.append(wq)
        wo.append(w(lk[1], (D, D)))       # un-split out_proj (single K=32 dot in kernel)
        w1.append(w(lk[2], (D, F)))
        w2.append(w(lk[3], (F, D)))

    bf16 = jnp.bfloat16
    return {
        "cls_embedding": w(keys[0], (1, 1, D), scale=1.0),   # torch.randn([1,1,d])
        "norm_in_w": jnp.ones((1, D), jnp.float32),
        "norm_in_b": jnp.zeros((1, D), jnp.float32),
        "final_w": jnp.ones((1, D), jnp.float32),
        "final_b": jnp.zeros((1, D), jnp.float32),
        "wqkv": jnp.stack(wqkv).astype(bf16),                # (L, D, 3D), Q pre-scaled
        "bqkv": jnp.zeros((L, 1, 3 * D), jnp.float32),
        "wo": jnp.stack(wo).astype(bf16),                    # (L, D, D)
        "bo": jnp.zeros((L, 1, D), jnp.float32),
        "n1w": jnp.ones((L, 1, D), jnp.float32),
        "n1b": jnp.zeros((L, 1, D), jnp.float32),
        "n2w": jnp.ones((L, 1, D), jnp.float32),
        "n2b": jnp.zeros((L, 1, D), jnp.float32),
        "w1": jnp.stack(w1).astype(bf16),                    # (L, D, F)
        "b1": jnp.zeros((L, 1, F), jnp.float32),
        "w2": jnp.stack(w2).astype(bf16),                    # (L, F, D)
        "b2": jnp.zeros((L, 1, D), jnp.float32),
    }


if __name__ == "__main__":
    key = jax.random.PRNGKey(0)
    k_x, k_p = jax.random.split(key, 2)

    padded_h_node = jax.random.normal(k_x, (SEQ, BATCH, D_MODEL), jnp.float32)
    valid_lens = jnp.array([6, 4], dtype=jnp.int32)                      # per-graph node counts
    src_padding_mask = jnp.arange(SEQ)[None, :] >= valid_lens[:, None]   # (B, SEQ) bool

    params = init_params(k_p)

    fwd = jax.jit(transformer_node_encoder_forward)
    out, mask_out = fwd(padded_h_node, src_padding_mask, params)
    out = jax.block_until_ready(out)
    mask_out = jax.block_until_ready(mask_out)

    assert out.shape == (SEQ + 1, BATCH, D_MODEL), out.shape
    assert mask_out.shape == (BATCH, SEQ + 1), mask_out.shape
    assert bool(jnp.all(jnp.isfinite(out)))
    print("KERNEL_OK")
</pallas_src>

<mosaic_0001>
module attributes {stable_mosaic.version = 11 : i64} {
  func.func @fused_encoder_kernel(%arg0: memref<8x2x32xf32, #tpu.memory_space<vmem>>, %arg1: memref<1x1x32xf32, #tpu.memory_space<vmem>>, %arg2: memref<2x8xf32, #tpu.memory_space<vmem>>, %arg3: memref<1x32xf32, #tpu.memory_space<vmem>>, %arg4: memref<1x32xf32, #tpu.memory_space<vmem>>, %arg5: memref<2x32x96xbf16, #tpu.memory_space<vmem>>, %arg6: memref<2x1x96xf32, #tpu.memory_space<vmem>>, %arg7: memref<2x32x32xbf16, #tpu.memory_space<vmem>>, %arg8: memref<2x1x32xf32, #tpu.memory_space<vmem>>, %arg9: memref<2x1x32xf32, #tpu.memory_space<vmem>>, %arg10: memref<2x1x32xf32, #tpu.memory_space<vmem>>, %arg11: memref<2x1x32xf32, #tpu.memory_space<vmem>>, %arg12: memref<2x1x32xf32, #tpu.memory_space<vmem>>, %arg13: memref<2x32x64xbf16, #tpu.memory_space<vmem>>, %arg14: memref<2x1x64xf32, #tpu.memory_space<vmem>>, %arg15: memref<2x64x32xbf16, #tpu.memory_space<vmem>>, %arg16: memref<2x1x32xf32, #tpu.memory_space<vmem>>, %arg17: memref<1x32xf32, #tpu.memory_space<vmem>>, %arg18: memref<1x32xf32, #tpu.memory_space<vmem>>, %arg19: memref<9x2x32xf32, #tpu.memory_space<vmem>>) attributes {dimension_semantics = [], scalar_prefetch = 0 : i64, scratch_operands = 0 : i64, tpu.core_type = #tpu.core_type<tc>} {
    %c0 = arith.constant 0 : index
    %c0_0 = arith.constant 0 : index
    %c0_1 = arith.constant 0 : index
    %0 = vector.load %arg1[%c0, %c0_0, %c0_1] : memref<1x1x32xf32, #tpu.memory_space<vmem>>, vector<1x1x32xf32>
    %1 = vector.shape_cast %0 : vector<1x1x32xf32> to vector<1x32xf32>
    %2 = tpu.iota {dimensions = array<i32: 0>} : vector<8x32xi32>
    %c0_i32 = arith.constant 0 : i32
    %3 = vector.broadcast %c0_i32 : i32 to vector<8x32xi32>
    %4 = arith.cmpi eq, %2, %3 : vector<8x32xi32>
    %5 = vector.shape_cast %1 : vector<1x32xf32> to vector<1x32xf32>
    %6 = vector.broadcast %5 : vector<1x32xf32> to vector<8x32xf32>
    %cst = arith.constant 0.000000e+00 : f32
    %7 = vector.broadcast %cst : f32 to vector<8x32xf32>
    %8 = arith.select %4, %6, %7 : vector<8x32xi1>, vector<8x32xf32>
    %c0_2 = arith.constant 0 : index
    %c0_3 = arith.constant 0 : index
    %c0_4 = arith.constant 0 : index
    %9 = vector.load %arg0[%c0_2, %c0_3, %c0_4] : memref<8x2x32xf32, #tpu.memory_space<vmem>>, vector<8x1x32xf32>
    %10 = vector.shape_cast %9 : vector<8x1x32xf32> to vector<8x32xf32>
    %c0_5 = arith.constant 0 : index
    %c1 = arith.constant 1 : index
    %c0_6 = arith.constant 0 : index
    %11 = vector.load %arg0[%c0_5, %c1, %c0_6] : memref<8x2x32xf32, #tpu.memory_space<vmem>>, vector<8x1x32xf32>
    %12 = vector.shape_cast %11 : vector<8x1x32xf32> to vector<8x32xf32>
    %13 = tpu.concatenate %10, %8, %12, %8 in 0 : vector<8x32xf32>, vector<8x32xf32>, vector<8x32xf32>, vector<8x32xf32> -> vector<32x32xf32>
    %14 = tpu.iota {dimensions = array<i32: 1>} : vector<2x8xi32>
    %c0_i32_7 = arith.constant 0 : i32
    %15 = vector.broadcast %c0_i32_7 : i32 to vector<2x8xi32>
    %16 = arith.cmpi eq, %14, %15 : vector<2x8xi32>
    %cst_8 = arith.constant 0.000000e+00 : f32
    %cst_9 = arith.constant -1.000000e+30 : f32
    %17 = vector.broadcast %cst_8 : f32 to vector<2x8xf32>
    %18 = vector.broadcast %cst_9 : f32 to vector<2x8xf32>
    %19 = arith.select %16, %17, %18 : vector<2x8xi1>, vector<2x8xf32>
    %c0_10 = arith.constant 0 : index
    %c0_11 = arith.constant 0 : index
    %20 = vector.load %arg2[%c0_10, %c0_11] : memref<2x8xf32, #tpu.memory_space<vmem>>, vector<2x8xf32>
    %21 = tpu.concatenate %20, %19 in 1 : vector<2x8xf32>, vector<2x8xf32> -> vector<2x16xf32>
    %22 = vector.shape_cast %21 : vector<2x16xf32> to vector<2x1x16xf32>
    %23 = vector.shape_cast %22 : vector<2x1x16xf32> to vector<2x1x16xf32>
    %24 = vector.broadcast %23 : vector<2x1x16xf32> to vector<2x16x16xf32>
    %25 = tpu.concatenate %24, %24, %24, %24 in 0 : vector<2x16x16xf32>, vector<2x16x16xf32>, vector<2x16x16xf32>, vector<2x16x16xf32> -> vector<8x16x16xf32>
    %c0_12 = arith.constant 0 : index
    %c0_13 = arith.constant 0 : index
    %26 = vector.load %arg3[%c0_12, %c0_13] : memref<1x32xf32, #tpu.memory_space<vmem>>, vector<1x32xf32>
    %c0_14 = arith.constant 0 : index
    %c0_15 = arith.constant 0 : index
    %27 = vector.load %arg4[%c0_14, %c0_15] : memref<1x32xf32, #tpu.memory_space<vmem>>, vector<1x32xf32>
    %cst_16 = arith.constant dense<0.000000e+00> : vector<32xf32>
    %28 = vector.multi_reduction <add>, %13, %cst_16 [1] : vector<32x32xf32> to vector<32xf32>
    %29 = vector.shape_cast %28 : vector<32xf32> to vector<32x1xf32>
    %cst_17 = arith.constant 3.200000e+01 : f32
    %30 = vector.broadcast %cst_17 : f32 to vector<32x1xf32>
    %31 = arith.divf %29, %30 : vector<32x1xf32>
    %32 = vector.broadcast %31 : vector<32x1xf32> to vector<32x32xf32>
    %33 = arith.subf %13, %32 : vector<32x32xf32>
    %34 = arith.mulf %33, %33 : vector<32x32xf32>
    %cst_18 = arith.constant dense<0.000000e+00> : vector<32xf32>
    %35 = vector.multi_reduction <add>, %34, %cst_18 [1] : vector<32x32xf32> to vector<32xf32>
    %36 = vector.shape_cast %35 : vector<32xf32> to vector<32x1xf32>
    %cst_19 = arith.constant 3.200000e+01 : f32
    %37 = vector.broadcast %cst_19 : f32 to vector<32x1xf32>
    %38 = arith.divf %36, %37 : vector<32x1xf32>
    %39 = vector.broadcast %31 : vector<32x1xf32> to vector<32x32xf32>
    %40 = arith.subf %13, %39 : vector<32x32xf32>
    %cst_20 = arith.constant 9.99999974E-6 : f32
    %41 = vector.broadcast %cst_20 : f32 to vector<32x1xf32>
    %42 = arith.addf %38, %41 : vector<32x1xf32>
    %43 = math.rsqrt %42 : vector<32x1xf32>
    %44 = vector.broadcast %43 : vector<32x1xf32> to vector<32x32xf32>
    %45 = arith.mulf %40, %44 : vector<32x32xf32>
    %46 = vector.broadcast %26 : vector<1x32xf32> to vector<32x32xf32>
    %47 = arith.mulf %45, %46 : vector<32x32xf32>
    %48 = vector.broadcast %27 : vector<1x32xf32> to vector<32x32xf32>
    %49 = arith.addf %47, %48 : vector<32x32xf32>
    %50 = arith.truncf %49 : vector<32x32xf32> to vector<32x32xbf16>
    %c0_21 = arith.constant 0 : index
    %c0_22 = arith.constant 0 : index
    %c0_23 = arith.constant 0 : index
    %51 = vector.load %arg5[%c0_21, %c0_22, %c0_23] : memref<2x32x96xbf16, #tpu.memory_space<vmem>>, vector<1x32x96xbf16>
    %52 = vector.shape_cast %51 : vector<1x32x96xbf16> to vector<32x96xbf16>
    %cst_24 = arith.constant dense<0.000000e+00> : vector<32x96xf32>
    %53 = tpu.matmul %50, %52, %cst_24 {dimension_numbers = #tpu.dot_dimension_numbers<[1], [0], [0], [1], [0, 0, 1, 1], [], []>} : vector<32x32xbf16>, vector<32x96xbf16>, vector<32x96xf32> -> vector<32x96xf32>
    %c0_25 = arith.constant 0 : index
    %c0_26 = arith.constant 0 : index
    %c0_27 = arith.constant 0 : index
    %54 = vector.load %arg6[%c0_25, %c0_26, %c0_27] : memref<2x1x96xf32, #tpu.memory_space<vmem>>, vector<1x1x96xf32>
    %55 = vector.shape_cast %54 : vector<1x1x96xf32> to vector<1x96xf32>
    %56 = vector.broadcast %55 : vector<1x96xf32> to vector<32x96xf32>
    %57 = arith.addf %53, %56 : vector<32x96xf32>
    %58 = arith.truncf %57 : vector<32x96xf32> to vector<32x96xbf16>
    %59 = vector.extract_strided_slice %58 {offsets = [0, 0], sizes = [32, 32], strides = [1, 1]} : vector<32x96xbf16> to vector<32x32xbf16>
    %60 = vector.extract_strided_slice %58 {offsets = [0, 32], sizes = [32, 32], strides = [1, 1]} : vector<32x96xbf16> to vector<32x32xbf16>
    %61 = vector.extract_strided_slice %58 {offsets = [0, 64], sizes = [32, 32], strides = [1, 1]} : vector<32x96xbf16> to vector<32x32xbf16>
    %62 = vector.extract_strided_slice %59 {offsets = [0, 0], sizes = [32, 8], strides = [1, 1]} : vector<32x32xbf16> to vector<32x8xbf16>
    %63 = vector.shape_cast %62 : vector<32x8xbf16> to vector<2x16x8xbf16>
    %64 = vector.extract_strided_slice %59 {offsets = [0, 8], sizes = [32, 8], strides = [1, 1]} : vector<32x32xbf16> to vector<32x8xbf16>
    %65 = vector.shape_cast %64 : vector<32x8xbf16> to vector<2x16x8xbf16>
    %66 = vector.extract_strided_slice %59 {offsets = [0, 16], sizes = [32, 8], strides = [1, 1]} : vector<32x32xbf16> to vector<32x8xbf16>
    %67 = vector.shape_cast %66 : vector<32x8xbf16> to vector<2x16x8xbf16>
    %68 = vector.extract_strided_slice %59 {offsets = [0, 24], sizes = [32, 8], strides = [1, 1]} : vector<32x32xbf16> to vector<32x8xbf16>
    %69 = vector.shape_cast %68 : vector<32x8xbf16> to vector<2x16x8xbf16>
    %70 = tpu.concatenate %63, %65, %67, %69 in 0 : vector<2x16x8xbf16>, vector<2x16x8xbf16>, vector<2x16x8xbf16>, vector<2x16x8xbf16> -> vector<8x16x8xbf16>
    %71 = vector.extract_strided_slice %60 {offsets = [0, 0], sizes = [32, 8], strides = [1, 1]} : vector<32x32xbf16> to vector<32x8xbf16>
    %72 = vector.shape_cast %71 : vector<32x8xbf16> to vector<2x16x8xbf16>
    %73 = vector.extract_strided_slice %60 {offsets = [0, 8], sizes = [32, 8], strides = [1, 1]} : vector<32x32xbf16> to vector<32x8xbf16>
    %74 = vector.shape_cast %73 : vector<32x8xbf16> to vector<2x16x8xbf16>
    %75 = vector.extract_strided_slice %60 {offsets = [0, 16], sizes = [32, 8], strides = [1, 1]} : vector<32x32xbf16> to vector<32x8xbf16>
    %76 = vector.shape_cast %75 : vector<32x8xbf16> to vector<2x16x8xbf16>
    %77 = vector.extract_strided_slice %60 {offsets = [0, 24], sizes = [32, 8], strides = [1, 1]} : vector<32x32xbf16> to vector<32x8xbf16>
    %78 = vector.shape_cast %77 : vector<32x8xbf16> to vector<2x16x8xbf16>
    %79 = tpu.concatenate %72, %74, %76, %78 in 0 : vector<2x16x8xbf16>, vector<2x16x8xbf16>, vector<2x16x8xbf16>, vector<2x16x8xbf16> -> vector<8x16x8xbf16>
    %80 = vector.extract_strided_slice %61 {offsets = [0, 0], sizes = [32, 8], strides = [1, 1]} : vector<32x32xbf16> to vector<32x8xbf16>
    %81 = vector.shape_cast %80 : vector<32x8xbf16> to vector<2x16x8xbf16>
    %82 = vector.extract_strided_slice %61 {offsets = [0, 8], sizes = [32, 8], strides = [1, 1]} : vector<32x32xbf16> to vector<32x8xbf16>
    %83 = vector.shape_cast %82 : vector<32x8xbf16> to vector<2x16x8xbf16>
    %84 = vector.extract_strided_slice %61 {offsets = [0, 16], sizes = [32, 8], strides = [1, 1]} : vector<32x32xbf16> to vector<32x8xbf16>
    %85 = vector.shape_cast %84 : vector<32x8xbf16> to vector<2x16x8xbf16>
    %86 = vector.extract_strided_slice %61 {offsets = [0, 24], sizes = [32, 8], strides = [1, 1]} : vector<32x32xbf16> to vector<32x8xbf16>
    %87 = vector.shape_cast %86 : vector<32x8xbf16> to vector<2x16x8xbf16>
    %88 = tpu.concatenate %81, %83, %85, %87 in 0 : vector<2x16x8xbf16>, vector<2x16x8xbf16>, vector<2x16x8xbf16>, vector<2x16x8xbf16> -> vector<8x16x8xbf16>
    "tpu.trace_start"() <{level = 10 : i32, message = "bqd,bkd->bqk"}> : () -> ()
    %cst_28 = arith.constant dense<0.000000e+00> : vector<8x16x16xf32>
    %89 = tpu.matmul %70, %79, %cst_28 {dimension_numbers = #tpu.dot_dimension_numbers<[2], [2], [1], [1], [0, 0, 0, 1, 1, 1], [0], [0]>} : vector<8x16x8xbf16>, vector<8x16x8xbf16>, vector<8x16x16xf32> -> vector<8x16x16xf32>
    "tpu.trace_stop"() : () -> ()
    %90 = arith.addf %89, %25 : vector<8x16x16xf32>
    %cst_29 = arith.constant dense<0xFF800000> : vector<8x16xf32>
    %91 = vector.multi_reduction <maximumf>, %90, %cst_29 [2] : vector<8x16x16xf32> to vector<8x16xf32>
    %92 = vector.shape_cast %91 : vector<8x16xf32> to vector<8x16x1xf32>
    %93 = vector.broadcast %92 : vector<8x16x1xf32> to vector<8x16x16xf32>
    %94 = arith.subf %90, %93 : vector<8x16x16xf32>
    %95 = math.exp %94 : vector<8x16x16xf32>
    %cst_30 = arith.constant dense<0.000000e+00> : vector<8x16xf32>
    %96 = vector.multi_reduction <add>, %95, %cst_30 [2] : vector<8x16x16xf32> to vector<8x16xf32>
    %97 = vector.shape_cast %96 : vector<8x16xf32> to vector<8x16x1xf32>
    %98 = tpu.reciprocal %97 {approx = true} : vector<8x16x1xf32> -> vector<8x16x1xf32>
    %99 = vector.broadcast %98 : vector<8x16x1xf32> to vector<8x16x16xf32>
    %100 = arith.mulf %95, %99 : vector<8x16x16xf32>
    %101 = arith.truncf %100 : vector<8x16x16xf32> to vector<8x16x16xbf16>
    "tpu.trace_start"() <{level = 10 : i32, message = "bqk,bkd->bqd"}> : () -> ()
    %cst_31 = arith.constant dense<0.000000e+00> : vector<8x16x8xf32>
    %102 = tpu.matmul %101, %88, %cst_31 {dimension_numbers = #tpu.dot_dimension_numbers<[2], [1], [1], [2], [0, 0, 0, 1, 1, 2], [0], [0]>} : vector<8x16x16xbf16>, vector<8x16x8xbf16>, vector<8x16x8xf32> -> vector<8x16x8xf32>
    "tpu.trace_stop"() : () -> ()
    %103 = arith.truncf %102 : vector<8x16x8xf32> to vector<8x16x8xbf16>
    %104 = vector.extract_strided_slice %103 {offsets = [0, 0, 0], sizes = [2, 16, 8], strides = [1, 1, 1]} : vector<8x16x8xbf16> to vector<2x16x8xbf16>
    %105 = vector.shape_cast %104 : vector<2x16x8xbf16> to vector<32x8xbf16>
    %106 = vector.extract_strided_slice %103 {offsets = [2, 0, 0], sizes = [2, 16, 8], strides = [1, 1, 1]} : vector<8x16x8xbf16> to vector<2x16x8xbf16>
    %107 = vector.shape_cast %106 : vector<2x16x8xbf16> to vector<32x8xbf16>
    %108 = vector.extract_strided_slice %103 {offsets = [4, 0, 0], sizes = [2, 16, 8], strides = [1, 1, 1]} : vector<8x16x8xbf16> to vector<2x16x8xbf16>
    %109 = vector.shape_cast %108 : vector<2x16x8xbf16> to vector<32x8xbf16>
    %110 = vector.extract_strided_slice %103 {offsets = [6, 0, 0], sizes = [2, 16, 8], strides = [1, 1, 1]} : vector<8x16x8xbf16> to vector<2x16x8xbf16>
    %111 = vector.shape_cast %110 : vector<2x16x8xbf16> to vector<32x8xbf16>
    %112 = tpu.concatenate %105, %107, %109, %111 in 1 : vector<32x8xbf16>, vector<32x8xbf16>, vector<32x8xbf16>, vector<32x8xbf16> -> vector<32x32xbf16>
    %c0_32 = arith.constant 0 : index
    %c0_33 = arith.constant 0 : index
    %c0_34 = arith.constant 0 : index
    %113 = vector.load %arg7[%c0_32, %c0_33, %c0_34] : memref<2x32x32xbf16, #tpu.memory_space<vmem>>, vector<1x32x32xbf16>
    %114 = vector.shape_cast %113 : vector<1x32x32xbf16> to vector<32x32xbf16>
    %cst_35 = arith.constant dense<0.000000e+00> : vector<32x32xf32>
    %115 = tpu.matmul %112, %114, %cst_35 {dimension_numbers = #tpu.dot_dimension_numbers<[1], [0], [0], [1], [0, 0, 1, 1], [], []>} : vector<32x32xbf16>, vector<32x32xbf16>, vector<32x32xf32> -> vector<32x32xf32>
    %c0_36 = arith.constant 0 : index
    %c0_37 = arith.constant 0 : index
    %c0_38 = arith.constant 0 : index
    %116 = vector.load %arg8[%c0_36, %c0_37, %c0_38] : memref<2x1x32xf32, #tpu.memory_space<vmem>>, vector<1x1x32xf32>
    %117 = vector.shape_cast %116 : vector<1x1x32xf32> to vector<1x32xf32>
    %118 = vector.broadcast %117 : vector<1x32xf32> to vector<32x32xf32>
    %119 = arith.addf %115, %118 : vector<32x32xf32>
    %120 = arith.addf %49, %119 : vector<32x32xf32>
    %c0_39 = arith.constant 0 : index
    %c0_40 = arith.constant 0 : index
    %c0_41 = arith.constant 0 : index
    %121 = vector.load %arg9[%c0_39, %c0_40, %c0_41] : memref<2x1x32xf32, #tpu.memory_space<vmem>>, vector<1x1x32xf32>
    %122 = vector.shape_cast %121 : vector<1x1x32xf32> to vector<1x32xf32>
    %c0_42 = arith.constant 0 : index
    %c0_43 = arith.constant 0 : index
    %c0_44 = arith.constant 0 : index
    %123 = vector.load %arg10[%c0_42, %c0_43, %c0_44] : memref<2x1x32xf32, #tpu.memory_space<vmem>>, vector<1x1x32xf32>
    %124 = vector.shape_cast %123 : vector<1x1x32xf32> to vector<1x32xf32>
    %cst_45 = arith.constant dense<0.000000e+00> : vector<32xf32>
    %125 = vector.multi_reduction <add>, %120, %cst_45 [1] : vector<32x32xf32> to vector<32xf32>
    %126 = vector.shape_cast %125 : vector<32xf32> to vector<32x1xf32>
    %cst_46 = arith.constant 3.200000e+01 : f32
    %127 = vector.broadcast %cst_46 : f32 to vector<32x1xf32>
    %128 = arith.divf %126, %127 : vector<32x1xf32>
    %129 = vector.broadcast %128 : vector<32x1xf32> to vector<32x32xf32>
    %130 = arith.subf %120, %129 : vector<32x32xf32>
    %131 = arith.mulf %130, %130 : vector<32x32xf32>
    %cst_47 = arith.constant dense<0.000000e+00> : vector<32xf32>
    %132 = vector.multi_reduction <add>, %131, %cst_47 [1] : vector<32x32xf32> to vector<32xf32>
    %133 = vector.shape_cast %132 : vector<32xf32> to vector<32x1xf32>
    %cst_48 = arith.constant 3.200000e+01 : f32
    %134 = vector.broadcast %cst_48 : f32 to vector<32x1xf32>
    %135 = arith.divf %133, %134 : vector<32x1xf32>
    %136 = vector.broadcast %128 : vector<32x1xf32> to vector<32x32xf32>
    %137 = arith.subf %120, %136 : vector<32x32xf32>
    %cst_49 = arith.constant 9.99999974E-6 : f32
    %138 = vector.broadcast %cst_49 : f32 to vector<32x1xf32>
    %139 = arith.addf %135, %138 : vector<32x1xf32>
    %140 = math.rsqrt %139 : vector<32x1xf32>
    %141 = vector.broadcast %140 : vector<32x1xf32> to vector<32x32xf32>
    %142 = arith.mulf %137, %141 : vector<32x32xf32>
    %143 = vector.broadcast %122 : vector<1x32xf32> to vector<32x32xf32>
    %144 = arith.mulf %142, %143 : vector<32x32xf32>
    %145 = vector.broadcast %124 : vector<1x32xf32> to vector<32x32xf32>
    %146 = arith.addf %144, %145 : vector<32x32xf32>
    %147 = arith.truncf %146 : vector<32x32xf32> to vector<32x32xbf16>
    %c0_50 = arith.constant 0 : index
    %c0_51 = arith.constant 0 : index
    %c0_52 = arith.constant 0 : index
    %148 = vector.load %arg13[%c0_50, %c0_51, %c0_52] : memref<2x32x64xbf16, #tpu.memory_space<vmem>>, vector<1x32x64xbf16>
    %149 = vector.shape_cast %148 : vector<1x32x64xbf16> to vector<32x64xbf16>
    %cst_53 = arith.constant dense<0.000000e+00> : vector<32x64xf32>
    %150 = tpu.matmul %147, %149, %cst_53 {dimension_numbers = #tpu.dot_dimension_numbers<[1], [0], [0], [1], [0, 0, 1, 1], [], []>} : vector<32x32xbf16>, vector<32x64xbf16>, vector<32x64xf32> -> vector<32x64xf32>
    %c0_54 = arith.constant 0 : index
    %c0_55 = arith.constant 0 : index
    %c0_56 = arith.constant 0 : index
    %151 = vector.load %arg14[%c0_54, %c0_55, %c0_56] : memref<2x1x64xf32, #tpu.memory_space<vmem>>, vector<1x1x64xf32>
    %152 = vector.shape_cast %151 : vector<1x1x64xf32> to vector<1x64xf32>
    %153 = vector.broadcast %152 : vector<1x64xf32> to vector<32x64xf32>
    %154 = arith.addf %150, %153 : vector<32x64xf32>
    %cst_57 = arith.constant 0.000000e+00 : f32
    %155 = vector.broadcast %cst_57 : f32 to vector<32x64xf32>
    %156 = arith.maximumf %154, %155 : vector<32x64xf32>
    %157 = arith.truncf %156 : vector<32x64xf32> to vector<32x64xbf16>
    %c0_58 = arith.constant 0 : index
    %c0_59 = arith.constant 0 : index
    %c0_60 = arith.constant 0 : index
    %158 = vector.load %arg15[%c0_58, %c0_59, %c0_60] : memref<2x64x32xbf16, #tpu.memory_space<vmem>>, vector<1x64x32xbf16>
    %159 = vector.shape_cast %158 : vector<1x64x32xbf16> to vector<64x32xbf16>
    %cst_61 = arith.constant dense<0.000000e+00> : vector<32x32xf32>
    %160 = tpu.matmul %157, %159, %cst_61 {dimension_numbers = #tpu.dot_dimension_numbers<[1], [0], [0], [1], [0, 0, 1, 1], [], []>} : vector<32x64xbf16>, vector<64x32xbf16>, vector<32x32xf32> -> vector<32x32xf32>
    %c0_62 = arith.constant 0 : index
    %c0_63 = arith.constant 0 : index
    %c0_64 = arith.constant 0 : index
    %161 = vector.load %arg16[%c0_62, %c0_63, %c0_64] : memref<2x1x32xf32, #tpu.memory_space<vmem>>, vector<1x1x32xf32>
    %162 = vector.shape_cast %161 : vector<1x1x32xf32> to vector<1x32xf32>
    %163 = vector.broadcast %162 : vector<1x32xf32> to vector<32x32xf32>
    %164 = arith.addf %160, %163 : vector<32x32xf32>
    %165 = arith.addf %146, %164 : vector<32x32xf32>
    %c0_65 = arith.constant 0 : index
    %c0_66 = arith.constant 0 : index
    %c0_67 = arith.constant 0 : index
    %166 = vector.load %arg11[%c0_65, %c0_66, %c0_67] : memref<2x1x32xf32, #tpu.memory_space<vmem>>, vector<1x1x32xf32>
    %167 = vector.shape_cast %166 : vector<1x1x32xf32> to vector<1x32xf32>
    %c0_68 = arith.constant 0 : index
    %c0_69 = arith.constant 0 : index
    %c0_70 = arith.constant 0 : index
    %168 = vector.load %arg12[%c0_68, %c0_69, %c0_70] : memref<2x1x32xf32, #tpu.memory_space<vmem>>, vector<1x1x32xf32>
    %169 = vector.shape_cast %168 : vector<1x1x32xf32> to vector<1x32xf32>
    %cst_71 = arith.constant dense<0.000000e+00> : vector<32xf32>
    %170 = vector.multi_reduction <add>, %165, %cst_71 [1] : vector<32x32xf32> to vector<32xf32>
    %171 = vector.shape_cast %170 : vector<32xf32> to vector<32x1xf32>
    %cst_72 = arith.constant 3.200000e+01 : f32
    %172 = vector.broadcast %cst_72 : f32 to vector<32x1xf32>
    %173 = arith.divf %171, %172 : vector<32x1xf32>
    %174 = vector.broadcast %173 : vector<32x1xf32> to vector<32x32xf32>
    %175 = arith.subf %165, %174 : vector<32x32xf32>
    %176 = arith.mulf %175, %175 : vector<32x32xf32>
    %cst_73 = arith.constant dense<0.000000e+00> : vector<32xf32>
    %177 = vector.multi_reduction <add>, %176, %cst_73 [1] : vector<32x32xf32> to vector<32xf32>
    %178 = vector.shape_cast %177 : vector<32xf32> to vector<32x1xf32>
    %cst_74 = arith.constant 3.200000e+01 : f32
    %179 = vector.broadcast %cst_74 : f32 to vector<32x1xf32>
    %180 = arith.divf %178, %179 : vector<32x1xf32>
    %181 = vector.broadcast %173 : vector<32x1xf32> to vector<32x32xf32>
    %182 = arith.subf %165, %181 : vector<32x32xf32>
    %cst_75 = arith.constant 9.99999974E-6 : f32
    %183 = vector.broadcast %cst_75 : f32 to vector<32x1xf32>
    %184 = arith.addf %180, %183 : vector<32x1xf32>
    %185 = math.rsqrt %184 : vector<32x1xf32>
    %186 = vector.broadcast %185 : vector<32x1xf32> to vector<32x32xf32>
    %187 = arith.mulf %182, %186 : vector<32x32xf32>
    %188 = vector.broadcast %167 : vector<1x32xf32> to vector<32x32xf32>
    %189 = arith.mulf %187, %188 : vector<32x32xf32>
    %190 = vector.broadcast %169 : vector<1x32xf32> to vector<32x32xf32>
    %191 = arith.addf %189, %190 : vector<32x32xf32>
    %192 = arith.truncf %191 : vector<32x32xf32> to vector<32x32xbf16>
    %c1_76 = arith.constant 1 : index
    %c0_77 = arith.constant 0 : index
    %c0_78 = arith.constant 0 : index
    %193 = vector.load %arg5[%c1_76, %c0_77, %c0_78] : memref<2x32x96xbf16, #tpu.memory_space<vmem>>, vector<1x32x96xbf16>
    %194 = vector.shape_cast %193 : vector<1x32x96xbf16> to vector<32x96xbf16>
    %cst_79 = arith.constant dense<0.000000e+00> : vector<32x96xf32>
    %195 = tpu.matmul %192, %194, %cst_79 {dimension_numbers = #tpu.dot_dimension_numbers<[1], [0], [0], [1], [0, 0, 1, 1], [], []>} : vector<32x32xbf16>, vector<32x96xbf16>, vector<32x96xf32> -> vector<32x96xf32>
    %c1_80 = arith.constant 1 : index
    %c0_81 = arith.constant 0 : index
    %c0_82 = arith.constant 0 : index
    %196 = vector.load %arg6[%c1_80, %c0_81, %c0_82] : memref<2x1x96xf32, #tpu.memory_space<vmem>>, vector<1x1x96xf32>
    %197 = vector.shape_cast %196 : vector<1x1x96xf32> to vector<1x96xf32>
    %198 = vector.broadcast %197 : vector<1x96xf32> to vector<32x96xf32>
    %199 = arith.addf %195, %198 : vector<32x96xf32>
    %200 = arith.truncf %199 : vector<32x96xf32> to vector<32x96xbf16>
    %201 = vector.extract_strided_slice %200 {offsets = [0, 0], sizes = [32, 32], strides = [1, 1]} : vector<32x96xbf16> to vector<32x32xbf16>
    %202 = vector.extract_strided_slice %200 {offsets = [0, 32], sizes = [32, 32], strides = [1, 1]} : vector<32x96xbf16> to vector<32x32xbf16>
    %203 = vector.extract_strided_slice %200 {offsets = [0, 64], sizes = [32, 32], strides = [1, 1]} : vector<32x96xbf16> to vector<32x32xbf16>
    %204 = vector.extract_strided_slice %201 {offsets = [0, 0], sizes = [32, 8], strides = [1, 1]} : vector<32x32xbf16> to vector<32x8xbf16>
    %205 = vector.shape_cast %204 : vector<32x8xbf16> to vector<2x16x8xbf16>
    %206 = vector.extract_strided_slice %201 {offsets = [0, 8], sizes = [32, 8], strides = [1, 1]} : vector<32x32xbf16> to vector<32x8xbf16>
    %207 = vector.shape_cast %206 : vector<32x8xbf16> to vector<2x16x8xbf16>
    %208 = vector.extract_strided_slice %201 {offsets = [0, 16], sizes = [32, 8], strides = [1, 1]} : vector<32x32xbf16> to vector<32x8xbf16>
    %209 = vector.shape_cast %208 : vector<32x8xbf16> to vector<2x16x8xbf16>
    %210 = vector.extract_strided_slice %201 {offsets = [0, 24], sizes = [32, 8], strides = [1, 1]} : vector<32x32xbf16> to vector<32x8xbf16>
    %211 = vector.shape_cast %210 : vector<32x8xbf16> to vector<2x16x8xbf16>
    %212 = tpu.concatenate %205, %207, %209, %211 in 0 : vector<2x16x8xbf16>, vector<2x16x8xbf16>, vector<2x16x8xbf16>, vector<2x16x8xbf16> -> vector<8x16x8xbf16>
    %213 = vector.extract_strided_slice %202 {offsets = [0, 0], sizes = [32, 8], strides = [1, 1]} : vector<32x32xbf16> to vector<32x8xbf16>
    %214 = vector.shape_cast %213 : vector<32x8xbf16> to vector<2x16x8xbf16>
    %215 = vector.extract_strided_slice %202 {offsets = [0, 8], sizes = [32, 8], strides = [1, 1]} : vector<32x32xbf16> to vector<32x8xbf16>
    %216 = vector.shape_cast %215 : vector<32x8xbf16> to vector<2x16x8xbf16>
    %217 = vector.extract_strided_slice %202 {offsets = [0, 16], sizes = [32, 8], strides = [1, 1]} : vector<32x32xbf16> to vector<32x8xbf16>
    %218 = vector.shape_cast %217 : vector<32x8xbf16> to vector<2x16x8xbf16>
    %219 = vector.extract_strided_slice %202 {offsets = [0, 24], sizes = [32, 8], strides = [1, 1]} : vector<32x32xbf16> to vector<32x8xbf16>
    %220 = vector.shape_cast %219 : vector<32x8xbf16> to vector<2x16x8xbf16>
    %221 = tpu.concatenate %214, %216, %218, %220 in 0 : vector<2x16x8xbf16>, vector<2x16x8xbf16>, vector<2x16x8xbf16>, vector<2x16x8xbf16> -> vector<8x16x8xbf16>
    %222 = vector.extract_strided_slice %203 {offsets = [0, 0], sizes = [32, 8], strides = [1, 1]} : vector<32x32xbf16> to vector<32x8xbf16>
    %223 = vector.shape_cast %222 : vector<32x8xbf16> to vector<2x16x8xbf16>
    %224 = vector.extract_strided_slice %203 {offsets = [0, 8], sizes = [32, 8], strides = [1, 1]} : vector<32x32xbf16> to vector<32x8xbf16>
    %225 = vector.shape_cast %224 : vector<32x8xbf16> to vector<2x16x8xbf16>
    %226 = vector.extract_strided_slice %203 {offsets = [0, 16], sizes = [32, 8], strides = [1, 1]} : vector<32x32xbf16> to vector<32x8xbf16>
    %227 = vector.shape_cast %226 : vector<32x8xbf16> to vector<2x16x8xbf16>
    %228 = vector.extract_strided_slice %203 {offsets = [0, 24], sizes = [32, 8], strides = [1, 1]} : vector<32x32xbf16> to vector<32x8xbf16>
    %229 = vector.shape_cast %228 : vector<32x8xbf16> to vector<2x16x8xbf16>
    %230 = tpu.concatenate %223, %225, %227, %229 in 0 : vector<2x16x8xbf16>, vector<2x16x8xbf16>, vector<2x16x8xbf16>, vector<2x16x8xbf16> -> vector<8x16x8xbf16>
    "tpu.trace_start"() <{level = 10 : i32, message = "bqd,bkd->bqk"}> : () -> ()
    %cst_83 = arith.constant dense<0.000000e+00> : vector<8x16x16xf32>
    %231 = tpu.matmul %212, %221, %cst_83 {dimension_numbers = #tpu.dot_dimension_numbers<[2], [2], [1], [1], [0, 0, 0, 1, 1, 1], [0], [0]>} : vector<8x16x8xbf16>, vector<8x16x8xbf16>, vector<8x16x16xf32> -> vector<8x16x16xf32>
    "tpu.trace_stop"() : () -> ()
    %232 = arith.addf %231, %25 : vector<8x16x16xf32>
    %cst_84 = arith.constant dense<0xFF800000> : vector<8x16xf32>
    %233 = vector.multi_reduction <maximumf>, %232, %cst_84 [2] : vector<8x16x16xf32> to vector<8x16xf32>
    %234 = vector.shape_cast %233 : vector<8x16xf32> to vector<8x16x1xf32>
    %235 = vector.broadcast %234 : vector<8x16x1xf32> to vector<8x16x16xf32>
    %236 = arith.subf %232, %235 : vector<8x16x16xf32>
    %237 = math.exp %236 : vector<8x16x16xf32>
    %cst_85 = arith.constant dense<0.000000e+00> : vector<8x16xf32>
    %238 = vector.multi_reduction <add>, %237, %cst_85 [2] : vector<8x16x16xf32> to vector<8x16xf32>
    %239 = vector.shape_cast %238 : vector<8x16xf32> to vector<8x16x1xf32>
    %240 = tpu.reciprocal %239 {approx = true} : vector<8x16x1xf32> -> vector<8x16x1xf32>
    %241 = vector.broadcast %240 : vector<8x16x1xf32> to vector<8x16x16xf32>
    %242 = arith.mulf %237, %241 : vector<8x16x16xf32>
    %243 = arith.truncf %242 : vector<8x16x16xf32> to vector<8x16x16xbf16>
    "tpu.trace_start"() <{level = 10 : i32, message = "bqk,bkd->bqd"}> : () -> ()
    %cst_86 = arith.constant dense<0.000000e+00> : vector<8x16x8xf32>
    %244 = tpu.matmul %243, %230, %cst_86 {dimension_numbers = #tpu.dot_dimension_numbers<[2], [1], [1], [2], [0, 0, 0, 1, 1, 2], [0], [0]>} : vector<8x16x16xbf16>, vector<8x16x8xbf16>, vector<8x16x8xf32> -> vector<8x16x8xf32>
    "tpu.trace_stop"() : () -> ()
    %245 = arith.truncf %244 : vector<8x16x8xf32> to vector<8x16x8xbf16>
    %246 = vector.extract_strided_slice %245 {offsets = [0, 0, 0], sizes = [2, 16, 8], strides = [1, 1, 1]} : vector<8x16x8xbf16> to vector<2x16x8xbf16>
    %247 = vector.shape_cast %246 : vector<2x16x8xbf16> to vector<32x8xbf16>
    %248 = vector.extract_strided_slice %245 {offsets = [2, 0, 0], sizes = [2, 16, 8], strides = [1, 1, 1]} : vector<8x16x8xbf16> to vector<2x16x8xbf16>
    %249 = vector.shape_cast %248 : vector<2x16x8xbf16> to vector<32x8xbf16>
    %250 = vector.extract_strided_slice %245 {offsets = [4, 0, 0], sizes = [2, 16, 8], strides = [1, 1, 1]} : vector<8x16x8xbf16> to vector<2x16x8xbf16>
    %251 = vector.shape_cast %250 : vector<2x16x8xbf16> to vector<32x8xbf16>
    %252 = vector.extract_strided_slice %245 {offsets = [6, 0, 0], sizes = [2, 16, 8], strides = [1, 1, 1]} : vector<8x16x8xbf16> to vector<2x16x8xbf16>
    %253 = vector.shape_cast %252 : vector<2x16x8xbf16> to vector<32x8xbf16>
    %254 = tpu.concatenate %247, %249, %251, %253 in 1 : vector<32x8xbf16>, vector<32x8xbf16>, vector<32x8xbf16>, vector<32x8xbf16> -> vector<32x32xbf16>
    %c1_87 = arith.constant 1 : index
    %c0_88 = arith.constant 0 : index
    %c0_89 = arith.constant 0 : index
    %255 = vector.load %arg7[%c1_87, %c0_88, %c0_89] : memref<2x32x32xbf16, #tpu.memory_space<vmem>>, vector<1x32x32xbf16>
    %256 = vector.shape_cast %255 : vector<1x32x32xbf16> to vector<32x32xbf16>
    %cst_90 = arith.constant dense<0.000000e+00> : vector<32x32xf32>
    %257 = tpu.matmul %254, %256, %cst_90 {dimension_numbers = #tpu.dot_dimension_numbers<[1], [0], [0], [1], [0, 0, 1, 1], [], []>} : vector<32x32xbf16>, vector<32x32xbf16>, vector<32x32xf32> -> vector<32x32xf32>
    %c1_91 = arith.constant 1 : index
    %c0_92 = arith.constant 0 : index
    %c0_93 = arith.constant 0 : index
    %258 = vector.load %arg8[%c1_91, %c0_92, %c0_93] : memref<2x1x32xf32, #tpu.memory_space<vmem>>, vector<1x1x32xf32>
    %259 = vector.shape_cast %258 : vector<1x1x32xf32> to vector<1x32xf32>
    %260 = vector.broadcast %259 : vector<1x32xf32> to vector<32x32xf32>
    %261 = arith.addf %257, %260 : vector<32x32xf32>
    %262 = arith.addf %191, %261 : vector<32x32xf32>
    %c1_94 = arith.constant 1 : index
    %c0_95 = arith.constant 0 : index
    %c0_96 = arith.constant 0 : index
    %263 = vector.load %arg9[%c1_94, %c0_95, %c0_96] : memref<2x1x32xf32, #tpu.memory_space<vmem>>, vector<1x1x32xf32>
    %264 = vector.shape_cast %263 : vector<1x1x32xf32> to vector<1x32xf32>
    %c1_97 = arith.constant 1 : index
    %c0_98 = arith.constant 0 : index
    %c0_99 = arith.constant 0 : index
    %265 = vector.load %arg10[%c1_97, %c0_98, %c0_99] : memref<2x1x32xf32, #tpu.memory_space<vmem>>, vector<1x1x32xf32>
    %266 = vector.shape_cast %265 : vector<1x1x32xf32> to vector<1x32xf32>
    %cst_100 = arith.constant dense<0.000000e+00> : vector<32xf32>
    %267 = vector.multi_reduction <add>, %262, %cst_100 [1] : vector<32x32xf32> to vector<32xf32>
    %268 = vector.shape_cast %267 : vector<32xf32> to vector<32x1xf32>
    %cst_101 = arith.constant 3.200000e+01 : f32
    %269 = vector.broadcast %cst_101 : f32 to vector<32x1xf32>
    %270 = arith.divf %268, %269 : vector<32x1xf32>
    %271 = vector.broadcast %270 : vector<32x1xf32> to vector<32x32xf32>
    %272 = arith.subf %262, %271 : vector<32x32xf32>
    %273 = arith.mulf %272, %272 : vector<32x32xf32>
    %cst_102 = arith.constant dense<0.000000e+00> : vector<32xf32>
    %274 = vector.multi_reduction <add>, %273, %cst_102 [1] : vector<32x32xf32> to vector<32xf32>
    %275 = vector.shape_cast %274 : vector<32xf32> to vector<32x1xf32>
    %cst_103 = arith.constant 3.200000e+01 : f32
    %276 = vector.broadcast %cst_103 : f32 to vector<32x1xf32>
    %277 = arith.divf %275, %276 : vector<32x1xf32>
    %278 = vector.broadcast %270 : vector<32x1xf32> to vector<32x32xf32>
    %279 = arith.subf %262, %278 : vector<32x32xf32>
    %cst_104 = arith.constant 9.99999974E-6 : f32
    %280 = vector.broadcast %cst_104 : f32 to vector<32x1xf32>
    %281 = arith.addf %277, %280 : vector<32x1xf32>
    %282 = math.rsqrt %281 : vector<32x1xf32>
    %283 = vector.broadcast %282 : vector<32x1xf32> to vector<32x32xf32>
    %284 = arith.mulf %279, %283 : vector<32x32xf32>
    %285 = vector.broadcast %264 : vector<1x32xf32> to vector<32x32xf32>
    %286 = arith.mulf %284, %285 : vector<32x32xf32>
    %287 = vector.broadcast %266 : vector<1x32xf32> to vector<32x32xf32>
    %288 = arith.addf %286, %287 : vector<32x32xf32>
    %289 = arith.truncf %288 : vector<32x32xf32> to vector<32x32xbf16>
    %c1_105 = arith.constant 1 : index
    %c0_106 = arith.constant 0 : index
    %c0_107 = arith.constant 0 : index
    %290 = vector.load %arg13[%c1_105, %c0_106, %c0_107] : memref<2x32x64xbf16, #tpu.memory_space<vmem>>, vector<1x32x64xbf16>
    %291 = vector.shape_cast %290 : vector<1x32x64xbf16> to vector<32x64xbf16>
    %cst_108 = arith.constant dense<0.000000e+00> : vector<32x64xf32>
    %292 = tpu.matmul %289, %291, %cst_108 {dimension_numbers = #tpu.dot_dimension_numbers<[1], [0], [0], [1], [0, 0, 1, 1], [], []>} : vector<32x32xbf16>, vector<32x64xbf16>, vector<32x64xf32> -> vector<32x64xf32>
    %c1_109 = arith.constant 1 : index
    %c0_110 = arith.constant 0 : index
    %c0_111 = arith.constant 0 : index
    %293 = vector.load %arg14[%c1_109, %c0_110, %c0_111] : memref<2x1x64xf32, #tpu.memory_space<vmem>>, vector<1x1x64xf32>
    %294 = vector.shape_cast %293 : vector<1x1x64xf32> to vector<1x64xf32>
    %295 = vector.broadcast %294 : vector<1x64xf32> to vector<32x64xf32>
    %296 = arith.addf %292, %295 : vector<32x64xf32>
    %cst_112 = arith.constant 0.000000e+00 : f32
    %297 = vector.broadcast %cst_112 : f32 to vector<32x64xf32>
    %298 = arith.maximumf %296, %297 : vector<32x64xf32>
    %299 = arith.truncf %298 : vector<32x64xf32> to vector<32x64xbf16>
    %c1_113 = arith.constant 1 : index
    %c0_114 = arith.constant 0 : index
    %c0_115 = arith.constant 0 : index
    %300 = vector.load %arg15[%c1_113, %c0_114, %c0_115] : memref<2x64x32xbf16, #tpu.memory_space<vmem>>, vector<1x64x32xbf16>
    %301 = vector.shape_cast %300 : vector<1x64x32xbf16> to vector<64x32xbf16>
    %cst_116 = arith.constant dense<0.000000e+00> : vector<32x32xf32>
    %302 = tpu.matmul %299, %301, %cst_116 {dimension_numbers = #tpu.dot_dimension_numbers<[1], [0], [0], [1], [0, 0, 1, 1], [], []>} : vector<32x64xbf16>, vector<64x32xbf16>, vector<32x32xf32> -> vector<32x32xf32>
    %c1_117 = arith.constant 1 : index
    %c0_118 = arith.constant 0 : index
    %c0_119 = arith.constant 0 : index
    %303 = vector.load %arg16[%c1_117, %c0_118, %c0_119] : memref<2x1x32xf32, #tpu.memory_space<vmem>>, vector<1x1x32xf32>
    %304 = vector.shape_cast %303 : vector<1x1x32xf32> to vector<1x32xf32>
    %305 = vector.broadcast %304 : vector<1x32xf32> to vector<32x32xf32>
    %306 = arith.addf %302, %305 : vector<32x32xf32>
    %307 = arith.addf %288, %306 : vector<32x32xf32>
    %c1_120 = arith.constant 1 : index
    %c0_121 = arith.constant 0 : index
    %c0_122 = arith.constant 0 : index
    %308 = vector.load %arg11[%c1_120, %c0_121, %c0_122] : memref<2x1x32xf32, #tpu.memory_space<vmem>>, vector<1x1x32xf32>
    %309 = vector.shape_cast %308 : vector<1x1x32xf32> to vector<1x32xf32>
    %c1_123 = arith.constant 1 : index
    %c0_124 = arith.constant 0 : index
    %c0_125 = arith.constant 0 : index
    %310 = vector.load %arg12[%c1_123, %c0_124, %c0_125] : memref<2x1x32xf32, #tpu.memory_space<vmem>>, vector<1x1x32xf32>
    %311 = vector.shape_cast %310 : vector<1x1x32xf32> to vector<1x32xf32>
    %cst_126 = arith.constant dense<0.000000e+00> : vector<32xf32>
    %312 = vector.multi_reduction <add>, %307, %cst_126 [1] : vector<32x32xf32> to vector<32xf32>
    %313 = vector.shape_cast %312 : vector<32xf32> to vector<32x1xf32>
    %cst_127 = arith.constant 3.200000e+01 : f32
    %314 = vector.broadcast %cst_127 : f32 to vector<32x1xf32>
    %315 = arith.divf %313, %314 : vector<32x1xf32>
    %316 = vector.broadcast %315 : vector<32x1xf32> to vector<32x32xf32>
    %317 = arith.subf %307, %316 : vector<32x32xf32>
    %318 = arith.mulf %317, %317 : vector<32x32xf32>
    %cst_128 = arith.constant dense<0.000000e+00> : vector<32xf32>
    %319 = vector.multi_reduction <add>, %318, %cst_128 [1] : vector<32x32xf32> to vector<32xf32>
    %320 = vector.shape_cast %319 : vector<32xf32> to vector<32x1xf32>
    %cst_129 = arith.constant 3.200000e+01 : f32
    %321 = vector.broadcast %cst_129 : f32 to vector<32x1xf32>
    %322 = arith.divf %320, %321 : vector<32x1xf32>
    %323 = vector.broadcast %315 : vector<32x1xf32> to vector<32x32xf32>
    %324 = arith.subf %307, %323 : vector<32x32xf32>
    %cst_130 = arith.constant 9.99999974E-6 : f32
    %325 = vector.broadcast %cst_130 : f32 to vector<32x1xf32>
    %326 = arith.addf %322, %325 : vector<32x1xf32>
    %327 = math.rsqrt %326 : vector<32x1xf32>
    %328 = vector.broadcast %327 : vector<32x1xf32> to vector<32x32xf32>
    %329 = arith.mulf %324, %328 : vector<32x32xf32>
    %330 = vector.broadcast %309 : vector<1x32xf32> to vector<32x32xf32>
    %331 = arith.mulf %329, %330 : vector<32x32xf32>
    %332 = vector.broadcast %311 : vector<1x32xf32> to vector<32x32xf32>
    %333 = arith.addf %331, %332 : vector<32x32xf32>
    %c0_131 = arith.constant 0 : index
    %c0_132 = arith.constant 0 : index
    %334 = vector.load %arg17[%c0_131, %c0_132] : memref<1x32xf32, #tpu.memory_space<vmem>>, vector<1x32xf32>
    %c0_133 = arith.constant 0 : index
    %c0_134 = arith.constant 0 : index
    %335 = vector.load %arg18[%c0_133, %c0_134] : memref<1x32xf32, #tpu.memory_space<vmem>>, vector<1x32xf32>
    %cst_135 = arith.constant dense<0.000000e+00> : vector<32xf32>
    %336 = vector.multi_reduction <add>, %333, %cst_135 [1] : vector<32x32xf32> to vector<32xf32>
    %337 = vector.shape_cast %336 : vector<32xf32> to vector<32x1xf32>
    %cst_136 = arith.constant 3.200000e+01 : f32
    %338 = vector.broadcast %cst_136 : f32 to vector<32x1xf32>
    %339 = arith.divf %337, %338 : vector<32x1xf32>
    %340 = vector.broadcast %339 : vector<32x1xf32> to vector<32x32xf32>
    %341 = arith.subf %333, %340 : vector<32x32xf32>
    %342 = arith.mulf %341, %341 : vector<32x32xf32>
    %cst_137 = arith.constant dense<0.000000e+00> : vector<32xf32>
    %343 = vector.multi_reduction <add>, %342, %cst_137 [1] : vector<32x32xf32> to vector<32xf32>
    %344 = vector.shape_cast %343 : vector<32xf32> to vector<32x1xf32>
    %cst_138 = arith.constant 3.200000e+01 : f32
    %345 = vector.broadcast %cst_138 : f32 to vector<32x1xf32>
    %346 = arith.divf %344, %345 : vector<32x1xf32>
    %347 = vector.broadcast %339 : vector<32x1xf32> to vector<32x32xf32>
    %348 = arith.subf %333, %347 : vector<32x32xf32>
    %cst_139 = arith.constant 9.99999974E-6 : f32
    %349 = vector.broadcast %cst_139 : f32 to vector<32x1xf32>
    %350 = arith.addf %346, %349 : vector<32x1xf32>
    %351 = math.rsqrt %350 : vector<32x1xf32>
    %352 = vector.broadcast %351 : vector<32x1xf32> to vector<32x32xf32>
    %353 = arith.mulf %348, %352 : vector<32x32xf32>
    %354 = vector.broadcast %334 : vector<1x32xf32> to vector<32x32xf32>
    %355 = arith.mulf %353, %354 : vector<32x32xf32>
    %356 = vector.broadcast %335 : vector<1x32xf32> to vector<32x32xf32>
    %357 = arith.addf %355, %356 : vector<32x32xf32>
    %358 = vector.extract_strided_slice %357 {offsets = [0, 0], sizes = [9, 32], strides = [1, 1]} : vector<32x32xf32> to vector<9x32xf32>
    %359 = vector.shape_cast %358 : vector<9x32xf32> to vector<9x1x32xf32>
    %360 = vector.extract_strided_slice %357 {offsets = [16, 0], sizes = [9, 32], strides = [1, 1]} : vector<32x32xf32> to vector<9x32xf32>
    %361 = vector.shape_cast %360 : vector<9x32xf32> to vector<9x1x32xf32>
    %362 = tpu.concatenate %359, %361 in 1 : vector<9x1x32xf32>, vector<9x1x32xf32> -> vector<9x2x32xf32>
    %c0_140 = arith.constant 0 : index
    %c0_141 = arith.constant 0 : index
    %c0_142 = arith.constant 0 : index
    %363 = vector.load %arg19[%c0_140, %c0_141, %c0_142] : memref<9x2x32xf32, #tpu.memory_space<vmem>>, vector<9x2x32xf32>
    tpu.vector_store %arg19[%c0_140, %c0_141, %c0_142], %362 {strides = array<i32>} : memref<9x2x32xf32, #tpu.memory_space<vmem>>, vector<9x2x32xf32>,
    return
  }
}

</mosaic_0001>

<bundles_post_ra>
// kernel: transformer_node_encoder_forward.1
= control target key start
LH: loop header
LB: loop body
LE: loop exit
PB: predicated region body
PF: predicated region fallthrough
CT: control target
= control target key end

     0   :  { %s4692_s0 = inlined_call_operand.vmem [shape: f32[8,2,32], index: 0, kind: input, shape index: {}]   ;;  %s4693_s1 = inlined_call_operand.vmem [shape: f32[1,1,32], index: 1, kind: input, shape index: {}]   ;;  %s4694_s2 = inlined_call_operand.vmem [shape: f32[2,8], index: 2, kind: input, shape index: {}]   ;;  %s4695_s3 = inlined_call_operand.hbm [shape: f32[1,32], index: 3, kind: input, shape index: {}]   ;;  %s4696_s4 = inlined_call_operand.hbm [shape: f32[1,32], index: 4, kind: input, shape index: {}]   ;;  %s4697_s5 = inlined_call_operand.vmem [shape: bf16[2,32,96], index: 5, kind: input, shape index: {}]   ;;  %s4698_s6 = inlined_call_operand.hbm [shape: f32[2,1,96], index: 6, kind: input, shape index: {}]   ;;  %s4699_s7 = inlined_call_operand.vmem [shape: bf16[2,32,32], index: 7, kind: input, shape index: {}]   ;;  %s4700_s8 = inlined_call_operand.hbm [shape: f32[2,1,32], index: 8, kind: input, shape index: {}]   ;;  %s4701_s9 = inlined_call_operand.hbm [shape: f32[2,1,32], index: 9, kind: input, shape index: {}]   ;;  %s4702_s10 = inlined_call_operand.hbm [shape: f32[2,1,32], index: 10, kind: input, shape index: {}]   ;;  %s4703_s11 = inlined_call_operand.hbm [shape: f32[2,1,32], index: 11, kind: input, shape index: {}]   ;;  %s4704_s12 = inlined_call_operand.hbm [shape: f32[2,1,32], index: 12, kind: input, shape index: {}]   ;;  %s4705_s13 = inlined_call_operand.vmem [shape: bf16[2,32,64], index: 13, kind: input, shape index: {}]   ;;  %s4706_s14 = inlined_call_operand.hbm [shape: f32[2,1,64], index: 14, kind: input, shape index: {}]   ;;  %s4707_s15 = inlined_call_operand.vmem [shape: bf16[2,64,32], index: 15, kind: input, shape index: {}]   ;;  %s4708_s16 = inlined_call_operand.hbm [shape: f32[2,1,32], index: 16, kind: input, shape index: {}]   ;;  %s4709_s17 = inlined_call_operand.hbm [shape: f32[1,32], index: 17, kind: input, shape index: {}]   ;;  %s4710_s18 = inlined_call_operand.hbm [shape: f32[1,32], index: 18, kind: input, shape index: {}]   ;;  %s4711_s19 = inlined_call_operand.hbm [shape: f32[9,2,32], index: 19, kind: output, shape index: {}]  }
   0x1   :  { %4713 = sst [smem:[#allocation31_spill]] %s4692_s0 }
   0x2   :  { %4714 = sst [smem:[#allocation32_spill]] %s4693_s1 }
   0x3   :  { %4715 = sst [smem:[#allocation33_spill]] %s4694_s2 }
   0x4   :  { %4716 = sst [smem:[#allocation34_spill]] %s4695_s3 }
   0x5   :  { %24 = vsyncpa [#allocation3], 0 }
   0x6   :  { %25 = vsyncpa [#allocation6], 0 }
   0x7   :  { %26 = vsyncpa [#allocation9], 0 }
   0x8   :  { %27 = vsyncpa [#allocation12], 0 }
   0x9   :  { %28 = vsyncpa [#allocation15], 0 }
   0xa   :  { %29 = vsyncpa [#allocation18], 0 }
   0xb   :  { %30 = vsyncpa [#allocation21], 0  ;;  %s54_s20 = sshll.u32 %s4696_s4, 4  ;;  %s55_s20 = int_to_ptr.hbm [resolvable:$true] %s54_s20 }
   0xc   :  { %31 = vsyncpa [#allocation4], 0  ;;  %s3604_s21 = smov [#allocation5]   ;;  %s81_s23 = sshll.u32 %s4700_s8, 4  ;;  %s82_s23 = int_to_ptr.hbm [resolvable:$true] %s81_s23 }
   0xd   :  { %s56_s1 = sshll.u32 %s3604_s21, 4  ;;  %s3605_s24 = smov [#allocation8]   ;;  %s57_s1 = int_to_ptr.vmem [resolvable:$true] %s56_s1 }
   0xe   :  { %59 = dma.hbm_to_vmem [thread:$0]  %s55_s20, 16, %s57_s1, [#allocation6]  }
   0xf   :  { %s83_s25 = sshll.u32 %s3605_s24, 4  ;;  %s107_s27 = sshll.u32 %s4702_s10, 4  ;;  %s84_s25 = int_to_ptr.vmem [resolvable:$true] %s83_s25  ;;  %s108_s27 = int_to_ptr.hbm [resolvable:$true] %s107_s27 }
  0x10   :  { %s3606_s4 = smov 16   ;;  %s3607_s28 = smov 1  }
  0x11   :  { %89 = dma.hbm_to_vmem [thread:$0]  %s82_s23, 32, %s84_s25, [#allocation9], %s3606_s4, %s3606_s4, %s3607_s28  }
  0x12   :  { %s133_s30 = sshll.u32 %s4704_s12, 4  ;;  %s3608_s8 = smov [#allocation11]   ;;  %s134_s30 = int_to_ptr.hbm [resolvable:$true] %s133_s30 }
  0x13   :  { %s109_s20 = sshll.u32 %s3608_s8, 4  ;;  %s3609_s10 = smov [#allocation14]   ;;  %s110_s20 = int_to_ptr.vmem [resolvable:$true] %s109_s20 }
  0x14   :  { %115 = dma.hbm_to_vmem [thread:$0]  %s108_s27, 32, %s110_s20, [#allocation12], %s3606_s4, %s3606_s4, %s3607_s28  }
  0x15   :  { %s135_s21 = sshll.u32 %s3609_s10, 4  ;;  %s163_s2 = sshll.u32 %s4708_s16, 4  ;;  %s136_s21 = int_to_ptr.vmem [resolvable:$true] %s135_s21  ;;  %s164_s2 = int_to_ptr.hbm [resolvable:$true] %s163_s2 }
  0x16   :  { %141 = dma.hbm_to_vmem [thread:$0]  %s134_s30, 32, %s136_s21, [#allocation15], %s3606_s4, %s3606_s4, %s3607_s28  }
  0x17   :  { %s4717_s24 = sld [smem:[#allocation34_spill]]  ;;  %s3610_s3 = smov [#allocation17]  }
  0x18   :  { %s165_s26 = sshll.u32 %s3610_s3, 4  ;;  %s3611_s27 = smov [#allocation2]   ;;  %s166_s26 = int_to_ptr.vmem [resolvable:$true] %s165_s26 }
  0x19   :  { %171 = dma.hbm_to_vmem [thread:$0]  %s164_s2, 32, %s166_s26, [#allocation18], %s3606_s4, %s3606_s4, %s3607_s28  }
  0x1a   :  { %s45_s16 = sshll.u32 %s3611_s27, 4  ;;  %s66_s8 = sshll.u32 %s4698_s6, 4  ;;  %s46_s16 = int_to_ptr.vmem [resolvable:$true] %s45_s16  ;;  %s67_s8 = int_to_ptr.hbm [resolvable:$true] %s66_s8 }
  0x1b   :  { %s94_s10 = sshll.u32 %s4701_s9, 4  ;;  %s3612_s21 = smov [#allocation7]   ;;  %s95_s10 = int_to_ptr.hbm [resolvable:$true] %s94_s10 }
  0x1c   :  { %s68_s1 = sshll.u32 %s3612_s21, 4  ;;  %s3613_s22 = smov [#allocation10]   ;;  %s69_s1 = int_to_ptr.vmem [resolvable:$true] %s68_s1 }
  0x1d   :  { %s43_s25 = sshll.u32 %s4717_s24, 4  ;;  %s96_s2 = sshll.u32 %s3613_s22, 4  ;;  %s44_s25 = int_to_ptr.hbm [resolvable:$true] %s43_s25  ;;  %s97_s2 = int_to_ptr.vmem [resolvable:$true] %s96_s2 }
  0x1e   :  { %48 = dma.hbm_to_vmem [thread:$0]  %s44_s25, 16, %s46_s16, [#allocation3]  }
  0x1f   :  { %74 = dma.hbm_to_vmem [thread:$0]  %s67_s8, 32, %s69_s1, [#allocation6], %s3606_s4, %s3606_s4, %s3607_s28  }
  0x20   :  { %s120_s6 = sshll.u32 %s4703_s11, 4  ;;  %s148_s25 = sshll.u32 %s4706_s14, 4  ;;  %s121_s6 = int_to_ptr.hbm [resolvable:$true] %s120_s6  ;;  %s149_s25 = int_to_ptr.hbm [resolvable:$true] %s148_s25 }
  0x21   :  { %102 = dma.hbm_to_vmem [thread:$0]  %s95_s10, 32, %s97_s2, [#allocation9], %s3606_s4, %s3606_s4, %s3607_s28  }
  0x22   :  { %s3614_s3 = smov [#allocation13]   ;;  %s3615_s27 = smov [#allocation16]  }
  0x23   :  { %s122_s26 = sshll.u32 %s3614_s3, 4  ;;  %s150_s11 = sshll.u32 %s3615_s27, 4  ;;  %s123_s26 = int_to_ptr.vmem [resolvable:$true] %s122_s26  ;;  %s151_s11 = int_to_ptr.vmem [resolvable:$true] %s150_s11 }
  0x24   :  { %128 = dma.hbm_to_vmem [thread:$0]  %s121_s6, 32, %s123_s26, [#allocation12], %s3606_s4, %s3606_s4, %s3607_s28  }
  0x25   :  { %s177_s0 = sshll.u32 %s4709_s17, 4  ;;  %s188_s30 = sshll.u32 %s4710_s18, 4  ;;  %s178_s0 = int_to_ptr.hbm [resolvable:$true] %s177_s0  ;;  %s189_s30 = int_to_ptr.hbm [resolvable:$true] %s188_s30 }
  0x26   :  { %156 = dma.hbm_to_vmem [thread:$0]  %s149_s25, 32, %s151_s11, [#allocation15], %s3606_s4, %s3606_s4, %s3607_s28  }
  0x27   :  { %s3616_s20 = smov [#allocation19]   ;;  %s3617_s21 = smov [#allocation20]  }
  0x28   :  { %s179_s10 = sshll.u32 %s3616_s20, 4  ;;  %s190_s1 = sshll.u32 %s3617_s21, 4  ;;  %s180_s10 = int_to_ptr.vmem [resolvable:$true] %s179_s10  ;;  %s191_s1 = int_to_ptr.vmem [resolvable:$true] %s190_s1 }
  0x29   :  { %182 = dma.hbm_to_vmem [thread:$0]  %s178_s0, 16, %s180_s10, [#allocation18]  }
  0x2a   :  { %193 = dma.hbm_to_vmem [thread:$0]  %s189_s30, 16, %s191_s1, [#allocation21]  }
  0x2b   :  { %3588 = dma.done.wait [#allocation3], 16  }
  0x2c   :  { %3589 = vsyncadd [#allocation3], 4294967280 }
  0x2d   :  { %3590 = dma.done.wait [#allocation6], 48  }
  0x2e   :  { %3591 = vsyncadd [#allocation6], 4294967248 }
  0x2f   :  { %3592 = dma.done.wait [#allocation9], 64  }
  0x30   :  { %3593 = vsyncadd [#allocation9], 4294967232 }
  0x31   :  { %3594 = dma.done.wait [#allocation12], 64  }
  0x32   :  { %3595 = vsyncadd [#allocation12], 4294967232 }
  0x33   :  { %3596 = dma.done.wait [#allocation15], 64  }
  0x34   :  { %3597 = vsyncadd [#allocation15], 4294967232 }
  0x35   :  { %3598 = dma.done.wait [#allocation18], 48  }
  0x36   :  { %3599 = vsyncadd [#allocation18], 4294967248 }
  0x37   :  { %3600 = dma.done.wait [#allocation21], 16  }
  0x38   :  { %3601 = vsyncadd [#allocation21], 4294967280  ;;  %vm276_vm0 = vcmask 1041409   ;;  %vm279_vm1 = vcmask 1042434   ;;  %v244_v0 = vlaneseq  ;;  %vm282_vm2 = vcmask 1043459   ;;  %s4718_s28 = sld [smem:[#allocation31_spill]] }
  0x39   :  { %vm285_vm3 = vcmask 1044484   ;;  %vm288_vm4 = vcmask 1045509   ;;  %vm291_vm5 = vcmask 1046534   ;;  %vm294_vm6 = vcmask 1047559   ;;  %s4719_s20 = sld [smem:[#allocation32_spill]]  ;;  %s3619_s16 = smov 112  }
  0x3a   :  { %v245_v10 = vshrl.u32 %v244_v0, 7  ;;  %vm339_vm7 = vcmask 261120   ;;  %v3618_v51 = vmov 32.0   ;;  %s3620_s29 = smov 120   ;;  %s3621_s0 = smov 104  }
  0x3b   :  { %3100 = vrcp.f32 %v3618_v51  ;;  %s3622_s14 = smov 96   ;;  %s3624_s8 = smov 8  }
  0x3c   :  { %vm246_vm8 = vcmp.eq.s32.totalorder %v245_v10, 0  ;;  %v3032_v10 = vld [vmem:[%s4697_s5 + $0x8] sm:$0xff]  ;;  %s3625_s30 = smov 64   ;;  %s4720_s21 = sld [smem:[#allocation33_spill]] }
  0x3d   :  { %459 = vmatpush.bf16.msra.mxu0 %v3032_v10  ;;  %3051 = vmatpush.bf16.msra.mxu1 %v3032_v10  ;;  %s3626_s1 = smov 24   ;;  %s2864_s3 = sshll.u32 %s4711_s19, 4  ;;  %s2865_s3 = int_to_ptr.hbm [resolvable:$true] %s2864_s3 }
  0x3e   :  { %v251_v1 = vld [vmem:[%s4718_s28] sm:$0x1]  ;;  %v252_v2 = vld [vmem:[%s4718_s28 + $0x2] sm:$0x1]  ;;  %v253_v3 = vld [vmem:[%s4718_s28 + $0x4] sm:$0x1] }
  0x3f   :  { %v254_v4 = vld [vmem:[%s4718_s28 + $0x6] sm:$0x1]  ;;  %v255_v5 = vld [vmem:[%s4718_s28 + $0x8] sm:$0x1]  ;;  %v256_v6 = vld [vmem:[%s4718_s28 + $0xa] sm:$0x1] }
  0x40   :  { %v257_v7 = vld [vmem:[%s4718_s28 + $0xc] sm:$0x1]  ;;  %v275_v8 = vrot.slane %v252_v2, 7  ;;  %v278_v9 = vrot.slane %v253_v3, 6  ;;  %v258_v11 = vld [vmem:[%s4718_s28 + $0xe] sm:$0x1] }
  0x41   :  { %v281_v12 = vrot.slane %v254_v4, 5  ;;  %v284_v13 = vrot.slane %v255_v5, 4  ;;  %v287_v15 = vrot.slane %v256_v6, 3  ;;  %v290_v16 = vrot.slane %v257_v7, 2  ;;  %v259_v17 = vld [vmem:[%s4718_s28 + $0x1] sm:$0x1]  ;;  %v3101_v52 = vpop.eup %3100 }
  0x42   :  { %v277_v14 = vsel %vm276_vm0, %v275_v8, %v251_v1  ;;  %v3079_v19 = vld [vmem:[%s4719_s20] ss:$0 sm:$0xff]  ;;  %v260_v20 = vld [vmem:[%s4718_s28 + $0x3] sm:$0x1]  ;;  %v261_v21 = vld [vmem:[%s4718_s28 + $0x5] sm:$0x1]  ;;  %vm354_vm9 = vweird.f32 %v3101_v52 }
  0x43   :  { %v280_v18 = vsel %vm279_vm1, %v278_v9, %v277_v14  ;;  %v262_v22 = vld [vmem:[%s4718_s28 + $0x7] sm:$0x1]  ;;  %v293_v24 = vrot.slane %v258_v11, 1  ;;  %v263_v25 = vld [vmem:[%s4718_s28 + $0x9] sm:$0x1]  ;;  %v305_v27 = vrot.slane %v260_v20, 7 }
  0x44   :  { %v283_v23 = vsel %vm282_vm2, %v281_v12, %v280_v18  ;;  %v264_v26 = vld [vmem:[%s4718_s28 + $0xb] sm:$0x1]  ;;  %v265_v29 = vld [vmem:[%s4718_s28 + $0xd] sm:$0x1]  ;;  %v266_v30 = vld [vmem:[%s4718_s28 + $0xf] sm:$0x1] }
  0x45   :  { %v286_v28 = vsel %vm285_vm3, %v284_v13, %v283_v23  ;;  %v307_v31 = vrot.slane %v261_v21, 6  ;;  %v306_v33 = vsel %vm276_vm0, %v305_v27, %v259_v17  ;;  %v309_v34 = vrot.slane %v262_v22, 5  ;;  %v3031_v13 = vld [vmem:[%s4697_s5] sm:$0xff]  ;;  %s3628_s28 = smov 32   ;;  %s3629_s26 = smov 2  }
  0x46   :  { %v289_v32 = vsel %vm288_vm4, %v287_v15, %v286_v28  ;;  %v311_v35 = vrot.slane %v263_v25, 4  ;;  %v313_v38 = vrot.slane %v264_v26, 3  ;;  %v315_v39 = vrot.slane %v265_v29, 2  ;;  %460 = vmatpush.bf16.msra.mxu0 %v3031_v13  ;;  %3052 = vmatpush.bf16.msra.mxu1 %v3031_v13 }
  0x47   :  { %v292_v36 = vsel %vm291_vm5, %v290_v16, %v289_v32  ;;  %v308_v37 = vsel %vm279_vm1, %v307_v31, %v306_v33  ;;  %v317_v42 = vrot.slane %v266_v30, 1  ;;  %v250_v44 = vsel %vm246_vm8, %v3079_v19, 0.0 }
  0x48   :  { %v295_v40 = vsel %vm294_vm6, %v293_v24, %v292_v36  ;;  %v310_v41 = vsel %vm282_vm2, %v309_v34, %v308_v37  ;;  %v343_v50 = vsel %vm339_vm7, %v250_v44, 0.0  ;;  %v350_v53 = vmul.f32 32.0, %v3101_v52 }
  0x49   :  { %v340_v43 = vsel %vm339_vm7, %v295_v40, 0.0  ;;  %v312_v45 = vsel %vm285_vm3, %v311_v35, %v310_v41  ;;  %v3080_v35 = vld [vmem:[#allocation2] ss:$0 sm:$0xff]  ;;  %vm329_vm3 = vcmask 64512  }
  0x4a   :  { %341 = vadd.xlane.f32.xlu0 %v340_v43  ;;  %v314_v46 = vsel %vm288_vm4, %v313_v38, %v312_v45  ;;  %v351_v54 = vsub.f32 1.0, %v350_v53 }
  0x4b   :  { %v316_v47 = vsel %vm291_vm5, %v315_v39, %v314_v46  ;;  %vm704_vm5 = vcmask 130048  }
  0x4c   :  { %v318_v48 = vsel %vm294_vm6, %v317_v42, %v316_v47  ;;  %v352_v55 = vmul.f32 %v3101_v52, %v351_v54  ;;  %v3081_v42 = vld [vmem:[#allocation5] ss:$0 sm:$0xff]  ;;  %vm1175_vm6 = vcmask 195584  }
  0x4d   :  { %v346_v49 = vsel %vm339_vm7, %v318_v48, 0.0 }
  0x4e   :  { %347 = vadd.xlane.f32.xlu1 %v346_v49  ;;  %v353_v56 = vadd.f32 %v3101_v52, %v352_v55  ;;  %v3082_v55 = vld [vmem:[#allocation7] ss:$0 sm:$0xff] }
  0x50   :  { %v3860_v57 = vsel %vm354_vm9, %v3101_v52, %v353_v56 }
  0x52   :  { %344 = vadd.xlane.f32.xlu0 %v343_v50 }
  0xbd   :  { %v342_v58 = vpop.xlane.xlu0 %341 }
  0xbe   :  { %v356_v59 = vmul.f32 %v3860_v57, %v342_v58 }
  0xc0   :  { %v359_v60 = vsub.f32 %v295_v40, %v356_v59 }
  0xc1   :  { %v348_v62 = vpop.xlane.xlu1 %347 }
  0xc2   :  { %v362_v61 = vmul.f32 %v359_v60, %v359_v60  ;;  %v358_v3 = vmul.f32 %v3860_v57, %v348_v62 }
  0xc4   :  { %v365_v63 = vsel %vm339_vm7, %v362_v61, 0.0  ;;  %v3866_v5 = vsub.f32 %v318_v48, %v358_v3 }
  0xc5   :  { %366 = vadd.xlane.f32.xlu1 %v365_v63  ;;  %v345_v1 = vpop.xlane.xlu0 %344 }
  0xc6   :  { %v357_v2 = vmul.f32 %v3860_v57, %v345_v1  ;;  %v364_v8 = vmul.f32 %v3866_v5, %v3866_v5 }
  0xc8   :  { %v360_v4 = vsub.f32 %v250_v44, %v357_v2  ;;  %v371_v9 = vsel %vm339_vm7, %v364_v8, 0.0 }
  0xca   :  { %v363_v6 = vmul.f32 %v360_v4, %v360_v4 }
  0xcc   :  { %v368_v7 = vsel %vm339_vm7, %v363_v6, 0.0 }
  0xcd   :  { %369 = vadd.xlane.f32.xlu2 %v368_v7 }
  0xd5   :  { %372 = vadd.xlane.f32.xlu2 %v371_v9 }
 0x138   :  { %v367_v11 = vpop.xlane.xlu1 %366 }
 0x139   :  { %v374_v12 = vmul.f32 %v367_v11, %v3860_v57 }
 0x13b   :  { %v377_v14 = vadd.f32 1e-05, %v374_v12 }
 0x13d   :  { %3102 = vrsqrt.f32 %v377_v14  ;;  %vm386_vm11 = vweird.f32 %v377_v14 }
 0x140   :  { %v370_v15 = vpop.xlane.xlu2 %369 }
 0x141   :  { %v375_v16 = vmul.f32 %v370_v15, %v3860_v57 }
 0x143   :  { %v3103_v17 = vpop.eup %3102  ;;  %v378_v18 = vadd.f32 1e-05, %v375_v16 }
 0x144   :  { %v381_v19 = vmul.f32 %v3103_v17, %v377_v14  ;;  %vm387_vm10 = vweird.f32 %v3103_v17 }
 0x145   :  { %3104 = vrsqrt.f32 %v378_v18  ;;  %vm388_vm12 = vmor %vm386_vm11, %vm387_vm10  ;;  %vm396_vm14 = vweird.f32 %v378_v18 }
 0x146   :  { %v382_v20 = vmul.f32 %v3103_v17, %v381_v19 }
 0x148   :  { %v383_v21 = vmul.f32 0.5, %v382_v20  ;;  %v373_v22 = vpop.xlane.xlu2 %372 }
 0x149   :  { %v376_v23 = vmul.f32 %v373_v22, %v3860_v57 }
 0x14a   :  { %v384_v24 = vsub.f32 1.5, %v383_v21 }
 0x14b   :  { %v3105_v25 = vpop.eup %3104  ;;  %v379_v26 = vadd.f32 1e-05, %v376_v23 }
 0x14c   :  { %v385_v27 = vmul.f32 %v3103_v17, %v384_v24  ;;  %v391_v28 = vmul.f32 %v3105_v25, %v378_v18  ;;  %vm397_vm13 = vweird.f32 %v3105_v25 }
 0x14d   :  { %3106 = vrsqrt.f32 %v379_v26  ;;  %vm398_vm15 = vmor %vm396_vm14, %vm397_vm13  ;;  %vm406_vm0 = vweird.f32 %v379_v26 }
 0x14e   :  { %v392_v29 = vmul.f32 %v3105_v25, %v391_v28  ;;  %v389_v30 = vsel %vm388_vm12, %v3103_v17, %v385_v27 }
 0x14f   :  { %v410_v34 = vmul.f32 %v389_v30, %v359_v60 }
 0x150   :  { %v393_v31 = vmul.f32 0.5, %v392_v29 }
 0x151   :  { %v416_v41 = vmul.f32 %v3080_v35, %v410_v34 }
 0x152   :  { %v394_v32 = vsub.f32 1.5, %v393_v31 }
 0x153   :  { %v3107_v33 = vpop.eup %3106  ;;  %v3881_v46 = vadd.f32 %v3081_v42, %v416_v41  ;;  %v3623_v41 = vmov -1e+30  }
 0x154   :  { %v395_v36 = vmul.f32 %v3105_v25, %v394_v32  ;;  %v401_v37 = vmul.f32 %v3107_v33, %v379_v26  ;;  %vm407_vm1 = vweird.f32 %v3107_v33 }
 0x155   :  { %vm408_vm2 = vmor %vm406_vm0, %vm407_vm1 }
 0x156   :  { %v399_v38 = vsel %vm398_vm15, %v3105_v25, %v395_v36  ;;  %v402_v39 = vmul.f32 %v3107_v33, %v401_v37  ;;  %v321_v36 = vand.u32 127, %v244_v0 }
 0x157   :  { %v411_v40 = vmul.f32 %v399_v38, %v360_v4 }
 0x158   :  { %v403_v43 = vmul.f32 0.5, %v402_v39  ;;  %vm322_vm4 = vcmp.eq.s32.totalorder %v321_v36, 0 }
 0x159   :  { %v417_v44 = vmul.f32 %v3080_v35, %v411_v40 }
 0x15a   :  { %v404_v45 = vsub.f32 1.5, %v403_v43 }
 0x15b   :  { %v3883_v47 = vadd.f32 %v3081_v42, %v417_v44 }
 0x15c   :  { %v405_v48 = vmul.f32 %v3107_v33, %v404_v45 }
 0x15d   :  { %v425_v49 = vpack.c.bf16 %v3883_v47, %v3881_v46 }
 0x15e   :  { %v409_v50 = vsel %vm408_vm2, %v3107_v33, %v405_v48 }
 0x15f   :  { %2891 = vmatmul.msk.bf16.vlgmr.msra.gmra.mxu0 %vm339_vm7, %v425_v49  ;;  %v412_v51 = vmul.f32 %v409_v50, %v3866_v5 }
 0x161   :  { %v418_v52 = vmul.f32 %v3080_v35, %v412_v51 }
 0x163   :  { %v3889_v53 = vadd.f32 %v3081_v42, %v418_v52  ;;  %v323_v42 = vsel %vm322_vm4, 0.0, %v3623_v41 }
 0x165   :  { %v426_v54 = vpack.c.bf16 %v3883_v47, %v3889_v53 }
 0x167   :  { %2892 = vmatmul.msk.bf16.vlgmr.msra.gmra.mxu1 %vm339_vm7, %v426_v54 }
 0x1dc   :  { %v462_v56 = vpop.f32.mrf.mxu0 }
 0x1dd   :  { %v463_v58 = vadd.f32 %v3082_v55, %v462_v56 }
 0x1df   :  { %v472_v59 = vpack.c.bf16 %v463_v58, %v463_v58 }
 0x1e1   :  { %488 = vrot.lane.b32.xlu2 %v472_v59, %s3619_s16  ;;  %480 = vrot.lane.b32.xlu0 %v472_v59, %s3620_s29  ;;  %v504_v10 = vunpack.c.l.b16 %v472_v59 }
 0x1e4   :  { %v464_v60 = vpop.f32.mrf.mxu0  ;;  %v467_v61 = vpop.f32.mrf.mxu1 }
 0x1e5   :  { %v465_v62 = vadd.f32 %v3082_v55, %v464_v60  ;;  %v468_v63 = vadd.f32 %v3082_v55, %v467_v61 }
 0x1e7   :  { %v473_v1 = vpack.c.bf16 %v465_v62, %v465_v62  ;;  %v474_v2 = vpack.c.bf16 %v468_v63, %v468_v63  ;;  %v324_v63 = vld [vmem:[%s4720_s21] sm:$0x3] }
 0x1e9   :  { %482 = vrot.lane.b32.xlu1 %v473_v1, %s3620_s29  ;;  %490 = vrot.lane.b32.xlu0 %v473_v1, %s3619_s16  ;;  %v529_v7 = vunpack.c.l.b16 %v474_v2  ;;  %v505_v9 = vunpack.c.l.b16 %v473_v1 }
 0x1ea   :  { %484 = vrot.lane.b32.xlu2 %v474_v2, %s3620_s29 }
 0x1eb   :  { %v506_v11 = vpack.c.b16 %v505_v9, %v504_v10 }
 0x1ec   :  { %v469_v3 = vpop.f32.mrf.mxu1 }
 0x1ed   :  { %v470_v4 = vadd.f32 %v3082_v55, %v469_v3 }
 0x1ef   :  { %v475_v5 = vpack.c.bf16 %v470_v4, %v470_v4 }
 0x1f1   :  { %496 = vrot.lane.b32.xlu0 %v472_v59, %s3621_s0  ;;  %486 = vrot.lane.b32.xlu1 %v475_v5, %s3620_s29  ;;  %v530_v6 = vunpack.c.l.b16 %v475_v5 }
 0x1f2   :  { %498 = vrot.lane.b32.xlu2 %v473_v1, %s3621_s0 }
 0x1f3   :  { %v531_v8 = vpack.c.b16 %v530_v6, %v529_v7 }
 0x1f9   :  { %494 = vrot.lane.b32.xlu0 %v475_v5, %s3619_s16  ;;  %492 = vrot.lane.b32.xlu1 %v474_v2, %s3619_s16 }
 0x1fa   :  { %532 = vrot.lane.b32.xlu2 %v531_v8, %s3622_s14 }
 0x201   :  { %502 = vrot.lane.b32.xlu0 %v475_v5, %s3621_s0  ;;  %500 = vrot.lane.b32.xlu1 %v474_v2, %s3621_s0 }
 0x202   :  { %507 = vrot.lane.b32.xlu2 %v506_v11, %s3622_s14 }
 0x23b   :  { %v489_v12 = vpop.permute.xlu2 %488 }
 0x23c   :  { %v604_v20 = vunpack.c.l.b16 %v489_v12 }
 0x244   :  { %v485_v13 = vpop.permute.xlu2 %484 }
 0x245   :  { %v579_v30 = vunpack.c.l.b16 %v485_v13 }
 0x24c   :  { %v499_v14 = vpop.permute.xlu2 %498 }
 0x24d   :  { %v655_v31 = vunpack.c.l.b16 %v499_v14 }
 0x253   :  { %v481_v15 = vpop.permute.xlu0 %480 }
 0x254   :  { %v533_v16 = vpop.permute.xlu2 %532  ;;  %v554_v21 = vunpack.c.l.b16 %v481_v15 }
 0x255   :  { %v538_v17 = vsel %vm329_vm3, %v533_v16, 0 }
 0x256   :  { %547 = vmatpush.bf16.xpose.msra.mxu2 %v538_v17 }
 0x25b   :  { %v483_v18 = vpop.permute.xlu1 %482  ;;  %v491_v19 = vpop.permute.xlu0 %490 }
 0x25c   :  { %v555_v22 = vunpack.c.l.b16 %v483_v18  ;;  %v605_v23 = vunpack.c.l.b16 %v491_v19  ;;  %v508_v24 = vpop.permute.xlu2 %507 }
 0x25d   :  { %2894 = vmatmul.msk.bf16.vlgmr.msra.gmra.mxu2 %vm329_vm3, %v531_v8  ;;  %v513_v25 = vsel %vm329_vm3, %v508_v24, 0 }
 0x25e   :  { %v556_v26 = vpack.c.b16 %v555_v22, %v554_v21  ;;  %v606_v27 = vpack.c.b16 %v605_v23, %v604_v20  ;;  %522 = vmatpush.bf16.xpose.msrb.mxu1 %v513_v25 }
 0x260   :  { %557 = vrot.lane.b32.xlu1 %v556_v26, %s3622_s14  ;;  %607 = vrot.lane.b32.xlu0 %v606_v27, %s3622_s14 }
 0x263   :  { %v497_v28 = vpop.permute.xlu0 %496  ;;  %v487_v29 = vpop.permute.xlu1 %486 }
 0x264   :  { %v654_v32 = vunpack.c.l.b16 %v497_v28  ;;  %v580_v33 = vunpack.c.l.b16 %v487_v29 }
 0x265   :  { %2893 = vmatmul.msk.bf16.vlgmr.msrb.gmra.mxu1 %vm329_vm3, %v506_v11 }
 0x266   :  { %v3914_v34 = vpack.c.b16 %v655_v31, %v654_v32  ;;  %v3916_v35 = vpack.c.b16 %v580_v33, %v579_v30 }
 0x268   :  { %582 = vrot.lane.b32.xlu2 %v3916_v35, %s3622_s14  ;;  %657 = vrot.lane.b32.xlu1 %v3914_v34, %s3622_s14 }
 0x26b   :  { %v495_v37 = vpop.permute.xlu0 %494  ;;  %v493_v38 = vpop.permute.xlu1 %492 }
 0x26c   :  { %v630_v39 = vunpack.c.l.b16 %v495_v37  ;;  %v629_v40 = vunpack.c.l.b16 %v493_v38 }
 0x26e   :  { %v3923_v43 = vpack.c.b16 %v630_v39, %v629_v40 }
 0x270   :  { %632 = vrot.lane.b32.xlu0 %v3923_v43, %s3622_s14  ;;  %326 = vrot.lane.b32.xlu1 %v323_v42, %s3624_s8 }
 0x273   :  { %v503_v0 = vpop.permute.xlu0 %502  ;;  %v501_v44 = vpop.permute.xlu1 %500 }
 0x274   :  { %v680_v45 = vunpack.c.l.b16 %v503_v0  ;;  %v679_v48 = vunpack.c.l.b16 %v501_v44 }
 0x276   :  { %v3928_v49 = vpack.c.b16 %v680_v45, %v679_v48 }
 0x278   :  { %927 = vrot.lane.b32.xlu0 %v531_v8, %s3625_s30  ;;  %682 = vrot.lane.b32.xlu2 %v3928_v49, %s3622_s14 }
 0x279   :  { %902 = vrot.lane.b32.xlu1 %v506_v11, %s3625_s30 }
 0x280   :  { %952 = vrot.lane.b32.xlu0 %v556_v26, %s3625_s30  ;;  %1002 = vrot.lane.b32.xlu2 %v606_v27, %s3625_s30 }
 0x2c2   :  { %v583_v50 = vpop.permute.xlu2 %582 }
 0x2c3   :  { %v588_v51 = vsel %vm329_vm3, %v583_v50, 0 }
 0x2c4   :  { %597 = vmatpush.bf16.xpose.msra.mxu1 %v588_v51 }
 0x2cb   :  { %2896 = vmatmul.msk.bf16.vlgmr.msra.gmra.mxu1 %vm329_vm3, %v3916_v35 }
 0x2d2   :  { %v558_v52 = vpop.permute.xlu1 %557  ;;  %v608_v54 = vpop.permute.xlu0 %607 }
 0x2d3   :  { %v683_v55 = vpop.permute.xlu2 %682  ;;  %v563_v56 = vsel %vm329_vm3, %v558_v52, 0  ;;  %v613_v58 = vsel %vm329_vm3, %v608_v54, 0 }
 0x2d4   :  { %v688_v59 = vsel %vm329_vm3, %v683_v55, 0  ;;  %572 = vmatpush.bf16.xpose.msra.mxu3 %v563_v56  ;;  %622 = vmatpush.bf16.xpose.msrb.mxu2 %v613_v58 }
 0x2d5   :  { %697 = vmatpush.bf16.xpose.msrb.mxu1 %v688_v59 }
 0x2da   :  { %v658_v60 = vpop.permute.xlu1 %657 }
 0x2db   :  { %2895 = vmatmul.msk.bf16.vlgmr.msra.gmra.mxu3 %vm329_vm3, %v556_v26  ;;  %2897 = vmatmul.msk.bf16.vlgmr.msrb.gmra.mxu2 %vm329_vm3, %v606_v27  ;;  %v663_v61 = vsel %vm329_vm3, %v658_v60, 0  ;;  %v1003_v18 = vpop.permute.xlu2 %1002 }
 0x2dc   :  { %2900 = vmatmul.msk.bf16.vlgmr.msrb.gmra.mxu1 %vm329_vm3, %v3928_v49  ;;  %672 = vmatpush.bf16.xpose.msrb.mxu0 %v663_v61 }
 0x2e0   :  { %v549_v62 = vpop.f32.mrf.mxu2 }
 0x2e2   :  { %v633_v1 = vpop.permute.xlu0 %632  ;;  %v524_v2 = vpop.f32.mrf.mxu1 }
 0x2e3   :  { %v327_v3 = vpop.permute.xlu1 %326  ;;  %2899 = vmatmul.msk.bf16.vlgmr.msrb.gmra.mxu0 %vm329_vm3, %v3914_v34  ;;  %v638_v4 = vsel %vm329_vm3, %v633_v1, 0 }
 0x2e4   :  { %v330_v5 = vsel %vm329_vm3, %v324_v63, %v327_v3  ;;  %647 = vmatpush.bf16.xpose.msrb.mxu3 %v638_v4 }
 0x2e5   :  { %v332_v6 = vrot.slane %v330_v5, 1  ;;  %v3954_v7 = vperm.slane %v330_v5, 0 }
 0x2e7   :  { %v3956_v8 = vperm.slane %v332_v6, 0  ;;  %v525_v9 = vadd.f32 %v524_v2, %v3954_v7 }
 0x2e8   :  { %v551_v10 = vpop.f32.mrf.mxu2 }
 0x2e9   :  { %v3960_v11 = vadd.f32 %v551_v10, %v3956_v8  ;;  %v705_v12 = vsel %vm704_vm5, %v525_v9, -inf  ;;  %v550_v13 = vadd.f32 %v549_v62, %v3956_v8 }
 0x2ea   :  { %706 = vmax.xlane.f32.xlu0 %v705_v12  ;;  %v928_v14 = vpop.permute.xlu0 %927  ;;  %v526_v19 = vpop.f32.mrf.mxu1 }
 0x2eb   :  { %v903_v15 = vpop.permute.xlu1 %902  ;;  %2898 = vmatmul.msk.bf16.vlgmr.msrb.gmra.mxu3 %vm329_vm3, %v3923_v43  ;;  %v714_v16 = vsel %vm704_vm5, %v3960_v11, -inf  ;;  %v711_v17 = vsel %vm704_vm5, %v550_v13, -inf  ;;  %v527_v20 = vadd.f32 %v526_v19, %v3954_v7 }
 0x2ec   :  { %915 = vmatpush.bf16.msra.mxu2 %v903_v15  ;;  %940 = vmatpush.bf16.msra.mxu3 %v928_v14 }
 0x2ed   :  { %715 = vmax.xlane.f32.xlu1 %v714_v16  ;;  %712 = vmax.xlane.f32.xlu2 %v711_v17  ;;  %v708_v22 = vsel %vm704_vm5, %v527_v20, -inf }
 0x2f0   :  { %1015 = vmatpush.bf16.msrb.mxu2 %v1003_v18 }
 0x2f2   :  { %v953_v21 = vpop.permute.xlu0 %952 }
 0x2f3   :  { %965 = vmatpush.bf16.msra.mxu0 %v953_v21 }
 0x2f5   :  { %709 = vmax.xlane.f32.xlu2 %v708_v22 }
 0x348   :  { %v599_v23 = vpop.f32.mrf.mxu1 }
 0x349   :  { %v3972_v24 = vadd.f32 %v599_v23, %v3956_v8 }
 0x34b   :  { %v723_v25 = vsel %vm704_vm5, %v3972_v24, -inf }
 0x34c   :  { %724 = vmax.xlane.f32.xlu1 %v723_v25 }
 0x350   :  { %v601_v39 = vpop.f32.mrf.mxu1 }
 0x351   :  { %v3992_v42 = vadd.f32 %v601_v39, %v3956_v8 }
 0x353   :  { %v726_v52 = vsel %vm704_vm5, %v3992_v42, -inf }
 0x359   :  { %v699_v61 = vpop.f32.mrf.mxu1 }
 0x35a   :  { %v4010_v3 = vadd.f32 %v699_v61, %v3956_v8 }
 0x35c   :  { %v747_v10 = vsel %vm704_vm5, %v4010_v3, -inf }
 0x35d   :  { %v707_v26 = vpop.xlane.xlu0 %706 }
 0x35e   :  { %v753_v27 = vsub.f32 %v525_v9, %v707_v26  ;;  %v574_v28 = vpop.f32.mrf.mxu3  ;;  %v624_v29 = vpop.f32.mrf.mxu2 }
 0x35f   :  { %v3977_v30 = vadd.f32 %v574_v28, %v3954_v7  ;;  %v3980_v31 = vadd.f32 %v624_v29, %v3954_v7 }
 0x360   :  { %v769_v32 = vmul.f32 1.442695, %v753_v27  ;;  %v713_v33 = vpop.xlane.xlu2 %712  ;;  %v674_v36 = vpop.f32.mrf.mxu0 }
 0x361   :  { %v729_v37 = vsel %vm704_vm5, %v3980_v31, -inf  ;;  %v717_v38 = vsel %vm704_vm5, %v3977_v30, -inf  ;;  %v3987_v40 = vadd.f32 %v674_v36, %v3954_v7  ;;  %v716_v0 = vpop.xlane.xlu1 %715  ;;  %v755_v44 = vsub.f32 %v550_v13, %v713_v33  ;;  %v701_v21 = vpop.f32.mrf.mxu1 }
 0x362   :  { %730 = vmax.xlane.f32.xlu0 %v729_v37  ;;  %718 = vmax.xlane.f32.xlu1 %v717_v38  ;;  %3108 = vpow2.f32 %v769_v32  ;;  %v756_v54 = vsub.f32 %v3960_v11, %v716_v0  ;;  %v4044_v23 = vadd.f32 %v701_v21, %v3956_v8 }
 0x363   :  { %v741_v41 = vsel %vm704_vm5, %v3987_v40, -inf  ;;  %v773_v58 = vmul.f32 1.442695, %v755_v44 }
 0x364   :  { %742 = vmax.xlane.f32.xlu2 %v741_v41  ;;  %v775_v1 = vmul.f32 1.442695, %v756_v54  ;;  %v750_v25 = vsel %vm704_vm5, %v4044_v23, -inf }
 0x365   :  { %3110 = vpow2.f32 %v773_v58 }
 0x366   :  { %v576_v50 = vpop.f32.mrf.mxu3  ;;  %v626_v63 = vpop.f32.mrf.mxu2  ;;  %3112 = vpow2.f32 %v775_v1 }
 0x367   :  { %v4007_v62 = vadd.f32 %v576_v50, %v3954_v7  ;;  %v4013_v4 = vadd.f32 %v626_v63, %v3954_v7 }
 0x368   :  { %v710_v45 = vpop.xlane.xlu2 %709  ;;  %v3994_v48 = vpop.eup %3108 }
 0x369   :  { %v676_v51 = vpop.f32.mrf.mxu0  ;;  %v754_v56 = vsub.f32 %v527_v20, %v710_v45  ;;  %v801_v59 = vsel %vm704_vm5, %v3994_v48, 0.0  ;;  %v720_v5 = vsel %vm704_vm5, %v4007_v62, -inf  ;;  %v732_v9 = vsel %vm704_vm5, %v4013_v4, -inf }
 0x36a   :  { %v4000_v55 = vadd.f32 %v676_v51, %v3954_v7  ;;  %727 = vmax.xlane.f32.xlu0 %v726_v52 }
 0x36b   :  { %v771_v2 = vmul.f32 1.442695, %v754_v56  ;;  %v4021_v11 = vpop.eup %3110 }
 0x36c   :  { %v744_v60 = vsel %vm704_vm5, %v4000_v55, -inf  ;;  %802 = vadd.xlane.f32.xlu2 %v801_v59  ;;  %v4023_v12 = vpop.eup %3112  ;;  %v807_v14 = vsel %vm704_vm5, %v4021_v11, 0.0 }
 0x36d   :  { %745 = vmax.xlane.f32.xlu1 %v744_v60  ;;  %3114 = vpow2.f32 %v771_v2  ;;  %v810_v15 = vsel %vm704_vm5, %v4023_v12, 0.0 }
 0x36e   :  { %v649_v6 = vpop.f32.mrf.mxu3 }
 0x36f   :  { %v4034_v17 = vadd.f32 %v649_v6, %v3956_v8 }
 0x371   :  { %v735_v20 = vsel %vm704_vm5, %v4034_v17, -inf }
 0x372   :  { %721 = vmax.xlane.f32.xlu0 %v720_v5 }
 0x373   :  { %v4025_v13 = vpop.eup %3114 }
 0x374   :  { %733 = vmax.xlane.f32.xlu2 %v732_v9  ;;  %v804_v16 = vsel %vm704_vm5, %v4025_v13, 0.0 }
 0x375   :  { %748 = vmax.xlane.f32.xlu1 %v747_v10 }
 0x376   :  { %v651_v18 = vpop.f32.mrf.mxu3 }
 0x377   :  { %v4037_v19 = vadd.f32 %v651_v18, %v3956_v8 }
 0x379   :  { %v738_v22 = vsel %vm704_vm5, %v4037_v19, -inf }
 0x37a   :  { %808 = vadd.xlane.f32.xlu0 %v807_v14 }
 0x37c   :  { %811 = vadd.xlane.f32.xlu2 %v810_v15 }
 0x37d   :  { %805 = vadd.xlane.f32.xlu1 %v804_v16 }
 0x382   :  { %736 = vmax.xlane.f32.xlu0 %v735_v20 }
 0x384   :  { %739 = vmax.xlane.f32.xlu2 %v738_v22 }
 0x38a   :  { %751 = vmax.xlane.f32.xlu0 %v750_v25 }
 0x3bf   :  { %v725_v26 = vpop.xlane.xlu1 %724 }
 0x3c0   :  { %v759_v27 = vsub.f32 %v3972_v24, %v725_v26 }
 0x3c2   :  { %v781_v28 = vmul.f32 1.442695, %v759_v27 }
 0x3c4   :  { %3116 = vpow2.f32 %v781_v28 }
 0x3ca   :  { %v4049_v29 = vpop.eup %3116 }
 0x3cb   :  { %v819_v32 = vsel %vm704_vm5, %v4049_v29, 0.0 }
 0x3cc   :  { %820 = vadd.xlane.f32.xlu2 %v819_v32 }
 0x3d5   :  { %v731_v33 = vpop.xlane.xlu0 %730  ;;  %v719_v36 = vpop.xlane.xlu1 %718 }
 0x3d6   :  { %v757_v37 = vsub.f32 %v3977_v30, %v719_v36  ;;  %v761_v41 = vsub.f32 %v3980_v31, %v731_v33 }
 0x3d7   :  { %v743_v39 = vpop.xlane.xlu2 %742 }
 0x3d8   :  { %v777_v38 = vmul.f32 1.442695, %v757_v37  ;;  %v765_v0 = vsub.f32 %v3987_v40, %v743_v39  ;;  %v785_v44 = vmul.f32 1.442695, %v761_v41 }
 0x3da   :  { %3118 = vpow2.f32 %v777_v38  ;;  %v793_v24 = vmul.f32 1.442695, %v765_v0 }
 0x3dc   :  { %3120 = vpow2.f32 %v793_v24 }
 0x3dd   :  { %v728_v45 = vpop.xlane.xlu0 %727  ;;  %3122 = vpow2.f32 %v785_v44 }
 0x3de   :  { %v760_v50 = vsub.f32 %v3992_v42, %v728_v45 }
 0x3df   :  { %v803_v54 = vpop.xlane.xlu2 %802 }
 0x3e0   :  { %v783_v51 = vmul.f32 1.442695, %v760_v50  ;;  %v746_v52 = vpop.xlane.xlu1 %745  ;;  %v4057_v56 = vpop.eup %3118 }
 0x3e1   :  { %v766_v30 = vsub.f32 %v4000_v55, %v746_v52  ;;  %v813_v31 = vsel %vm704_vm5, %v4057_v56, 0.0 }
 0x3e2   :  { %3124 = vpow2.f32 %v783_v51  ;;  %v4062_v40 = vpop.eup %3120  ;;  %814 = vadd.xlane.f32.xlu0 %v813_v31 }
 0x3e3   :  { %v795_v58 = vmul.f32 1.442695, %v766_v30  ;;  %v837_v59 = vsel %vm704_vm5, %v4062_v40, 0.0  ;;  %v4067_v61 = vpop.eup %3122 }
 0x3e4   :  { %838 = vadd.xlane.f32.xlu2 %v837_v59  ;;  %v825_v6 = vsel %vm704_vm5, %v4067_v61, 0.0 }
 0x3e5   :  { %3126 = vpow2.f32 %v795_v58  ;;  %v722_v42 = vpop.xlane.xlu0 %721 }
 0x3e6   :  { %v758_v60 = vsub.f32 %v4007_v62, %v722_v42  ;;  %3128 = vrcp.f32 %v803_v54 }
 0x3e7   :  { %v734_v2 = vpop.xlane.xlu2 %733 }
 0x3e8   :  { %v4069_v63 = vpop.eup %3124  ;;  %v779_v55 = vmul.f32 1.442695, %v758_v60  ;;  %v4071_v1 = vpop.xlane.xlu1 %748  ;;  %v762_v62 = vsub.f32 %v4013_v4, %v734_v2 }
 0x3e9   :  { %v822_v5 = vsel %vm704_vm5, %v4069_v63, 0.0 }
 0x3ea   :  { %823 = vadd.xlane.f32.xlu1 %v822_v5  ;;  %3130 = vpow2.f32 %v779_v55  ;;  %826 = vadd.xlane.f32.xlu0 %v825_v6  ;;  %v787_v15 = vmul.f32 1.442695, %v762_v62 }
 0x3eb   :  { %v4077_v9 = vpop.eup %3126 }
 0x3ec   :  { %v840_v10 = vsel %vm704_vm5, %v4077_v9, 0.0  ;;  %v3129_v16 = vpop.eup %3128 }
 0x3ed   :  { %841 = vadd.xlane.f32.xlu2 %v840_v10  ;;  %v809_v14 = vpop.xlane.xlu0 %808  ;;  %v865_v22 = vmul.f32 %v3129_v16, %v3994_v48 }
 0x3ee   :  { %3132 = vrcp.f32 %v809_v14 }
 0x3ef   :  { %v812_v20 = vpop.xlane.xlu2 %811  ;;  %v881_v36 = vpack.c.bf16 %v865_v22, %v865_v22 }
 0x3f0   :  { %v806_v18 = vpop.xlane.xlu1 %805  ;;  %v4082_v21 = vpop.eup %3130 }
 0x3f1   :  { %3134 = vrcp.f32 %v806_v18  ;;  %v816_v4 = vsel %vm704_vm5, %v4082_v21, 0.0  ;;  %v899_v44 = vunpack.c.l.b16 %v881_v36 }
 0x3f2   :  { %3136 = vrcp.f32 %v812_v20 }
 0x3f3   :  { %3138 = vpow2.f32 %v787_v15 }
 0x3f4   :  { %v3133_v25 = vpop.eup %3132 }
 0x3f5   :  { %817 = vadd.xlane.f32.xlu2 %v816_v4  ;;  %v737_v26 = vpop.xlane.xlu0 %736  ;;  %v867_v27 = vmul.f32 %v3133_v25, %v4021_v11 }
 0x3f6   :  { %v763_v28 = vsub.f32 %v4034_v17, %v737_v26 }
 0x3f7   :  { %v3135_v32 = vpop.eup %3134  ;;  %v883_v41 = vpack.c.bf16 %v867_v27, %v867_v27  ;;  %v740_v59 = vpop.xlane.xlu2 %739 }
 0x3f8   :  { %v3137_v33 = vpop.eup %3136  ;;  %v866_v37 = vmul.f32 %v3135_v32, %v4025_v13  ;;  %v789_v38 = vmul.f32 1.442695, %v763_v28  ;;  %v764_v42 = vsub.f32 %v4037_v19, %v740_v59 }
 0x3f9   :  { %v4090_v39 = vpop.eup %3138  ;;  %v868_v48 = vmul.f32 %v3137_v33, %v4023_v12  ;;  %v924_v17 = vunpack.c.l.b16 %v883_v41 }
 0x3fa   :  { %v882_v0 = vpack.c.bf16 %v866_v37, %v866_v37  ;;  %3140 = vpow2.f32 %v789_v38  ;;  %v828_v11 = vsel %vm704_vm5, %v4090_v39, 0.0  ;;  %v791_v60 = vmul.f32 1.442695, %v764_v42 }
 0x3fb   :  { %v884_v24 = vpack.c.bf16 %v868_v48, %v868_v48 }
 0x3fc   :  { %v900_v45 = vunpack.c.l.b16 %v882_v0 }
 0x3fd   :  { %v925_v50 = vunpack.c.l.b16 %v884_v24  ;;  %829 = vadd.xlane.f32.xlu2 %v828_v11  ;;  %v752_v51 = vpop.xlane.xlu0 %751 }
 0x3fe   :  { %v901_v52 = vpack.c.b16 %v900_v45, %v899_v44  ;;  %v768_v13 = vsub.f32 %v4044_v23, %v752_v51 }
 0x3ff   :  { %v926_v54 = vpack.c.b16 %v925_v50, %v924_v17 }
 0x400   :  { %v4096_v30 = vpop.eup %3140  ;;  %v799_v31 = vmul.f32 1.442695, %v768_v13  ;;  %2901 = vmatmul.msk.bf16.vlgmr.msra.gmra.mxu2 %vm704_vm5, %v901_v52 }
 0x401   :  { %2902 = vmatmul.msk.bf16.vlgmr.msra.gmra.mxu3 %vm704_vm5, %v926_v54  ;;  %v831_v12 = vsel %vm704_vm5, %v4096_v30, 0.0 }
 0x402   :  { %3142 = vpow2.f32 %v799_v31  ;;  %832 = vadd.xlane.f32.xlu0 %v831_v12 }
 0x403   :  { %1052 = vrot.lane.b32.xlu1 %v3914_v34, %s3625_s30  ;;  %3144 = vpow2.f32 %v791_v60  ;;  %v767_v34 = vsub.f32 %v4010_v3, %v4071_v1 }
 0x405   :  { %v797_v5 = vmul.f32 1.442695, %v767_v34 }
 0x407   :  { %3146 = vpow2.f32 %v797_v5 }
 0x408   :  { %v4104_v58 = vpop.eup %3142 }
 0x409   :  { %v846_v23 = vsel %vm704_vm5, %v4104_v58, 0.0  ;;  %v4113_v55 = vpop.eup %3144 }
 0x40a   :  { %847 = vadd.xlane.f32.xlu0 %v846_v23  ;;  %v834_v2 = vsel %vm704_vm5, %v4113_v55, 0.0 }
 0x415   :  { %977 = vrot.lane.b32.xlu2 %v3916_v35, %s3625_s30  ;;  %v4119_v35 = vpop.eup %3146 }
 0x416   :  { %v843_v19 = vsel %vm704_vm5, %v4119_v35, 0.0 }
 0x41e   :  { %1027 = vrot.lane.b32.xlu0 %v3923_v43, %s3625_s30 }
 0x42d   :  { %835 = vadd.xlane.f32.xlu1 %v834_v2 }
 0x43e   :  { %844 = vadd.xlane.f32.xlu2 %v843_v19 }
 0x43f   :  { %v821_v43 = vpop.xlane.xlu2 %820 }
 0x446   :  { %1077 = vrot.lane.b32.xlu1 %v3928_v49, %s3625_s30 }
 0x455   :  { %v815_v62 = vpop.xlane.xlu0 %814 }
 0x456   :  { %3148 = vrcp.f32 %v815_v62 }
 0x457   :  { %v839_v6 = vpop.xlane.xlu2 %838 }
 0x45c   :  { %v3149_v15 = vpop.eup %3148 }
 0x45d   :  { %v824_v3 = vpop.xlane.xlu1 %823  ;;  %v827_v1 = vpop.xlane.xlu0 %826  ;;  %v869_v18 = vmul.f32 %v3149_v15, %v4057_v56 }
 0x45e   :  { %3150 = vrcp.f32 %v824_v3 }
 0x45f   :  { %3152 = vrcp.f32 %v821_v43  ;;  %v885_v25 = vpack.c.bf16 %v869_v18, %v869_v18 }
 0x460   :  { %v842_v10 = vpop.xlane.xlu2 %841 }
 0x461   :  { %v949_v37 = vunpack.c.l.b16 %v885_v25 }
 0x464   :  { %v3151_v16 = vpop.eup %3150 }
 0x465   :  { %v3153_v20 = vpop.eup %3152  ;;  %v872_v22 = vmul.f32 %v3151_v16, %v4069_v63 }
 0x466   :  { %v871_v4 = vmul.f32 %v3153_v20, %v4049_v29 }
 0x467   :  { %v888_v32 = vpack.c.bf16 %v872_v22, %v872_v22 }
 0x468   :  { %v818_v14 = vpop.xlane.xlu2 %817  ;;  %v887_v36 = vpack.c.bf16 %v871_v4, %v871_v4 }
 0x469   :  { %3154 = vrcp.f32 %v818_v14  ;;  %v975_v48 = vunpack.c.l.b16 %v888_v32 }
 0x46a   :  { %3156 = vrcp.f32 %v827_v1  ;;  %v974_v24 = vunpack.c.l.b16 %v887_v36 }
 0x46b   :  { %3158 = vrcp.f32 %v842_v10 }
 0x46c   :  { %v976_v17 = vpack.c.b16 %v975_v48, %v974_v24 }
 0x46f   :  { %v3155_v49 = vpop.eup %3154 }
 0x470   :  { %v870_v26 = vmul.f32 %v3155_v49, %v4082_v21  ;;  %v830_v27 = vpop.xlane.xlu2 %829  ;;  %v3157_v28 = vpop.eup %3156 }
 0x471   :  { %3160 = vrcp.f32 %v830_v27  ;;  %v873_v56 = vmul.f32 %v3157_v28, %v4067_v61  ;;  %v3159_v63 = vpop.eup %3158 }
 0x472   :  { %v886_v33 = vpack.c.bf16 %v870_v26, %v870_v26  ;;  %3162 = vrcp.f32 %v839_v6  ;;  %v878_v50 = vmul.f32 %v3159_v63, %v4077_v9 }
 0x473   :  { %v889_v44 = vpack.c.bf16 %v873_v56, %v873_v56 }
 0x474   :  { %v950_v38 = vunpack.c.l.b16 %v886_v33  ;;  %v894_v54 = vpack.c.bf16 %v878_v50, %v878_v50 }
 0x475   :  { %v1053_v41 = vpop.permute.xlu1 %1052  ;;  %v999_v52 = vunpack.c.l.b16 %v889_v44  ;;  %v833_v12 = vpop.xlane.xlu0 %832 }
 0x476   :  { %v951_v0 = vpack.c.b16 %v950_v38, %v949_v37  ;;  %1065 = vmatpush.bf16.msrb.mxu0 %v1053_v41  ;;  %3164 = vrcp.f32 %v833_v12 }
 0x477   :  { %v3161_v29 = vpop.eup %3160 }
 0x478   :  { %v874_v21 = vmul.f32 %v3161_v29, %v4090_v39  ;;  %2903 = vmatmul.msk.bf16.vlgmr.msra.gmra.mxu0 %vm704_vm5, %v951_v0  ;;  %v978_v45 = vpop.permute.xlu2 %977  ;;  %v3163_v11 = vpop.eup %3162  ;;  %v1050_v39 = vunpack.c.l.b16 %v894_v54 }
 0x479   :  { %990 = vmatpush.bf16.msra.mxu1 %v978_v45  ;;  %v877_v51 = vmul.f32 %v3163_v11, %v4062_v40 }
 0x47a   :  { %v890_v61 = vpack.c.bf16 %v874_v21, %v874_v21 }
 0x47b   :  { %v893_v23 = vpack.c.bf16 %v877_v51, %v877_v51 }
 0x47c   :  { %v1000_v13 = vunpack.c.l.b16 %v890_v61  ;;  %2904 = vmatmul.msk.bf16.vlgmr.msra.gmra.mxu1 %vm704_vm5, %v976_v17  ;;  %v3165_v34 = vpop.eup %3164 }
 0x47d   :  { %v1049_v59 = vunpack.c.l.b16 %v893_v23  ;;  %v848_v60 = vpop.xlane.xlu0 %847  ;;  %v875_v2 = vmul.f32 %v3165_v34, %v4096_v30 }
 0x47e   :  { %v1001_v31 = vpack.c.b16 %v1000_v13, %v999_v52 }
 0x47f   :  { %v1051_v42 = vpack.c.b16 %v1050_v39, %v1049_v59  ;;  %v891_v19 = vpack.c.bf16 %v875_v2, %v875_v2 }
 0x480   :  { %2905 = vmatmul.msk.bf16.vlgmr.msrb.gmra.mxu2 %vm704_vm5, %v1001_v31 }
 0x481   :  { %v1024_v62 = vunpack.c.l.b16 %v891_v19 }
 0x483   :  { %v917_v25 = vpop.f32.mrf.mxu2 }
 0x484   :  { %v942_v12 = vpop.f32.mrf.mxu3 }
 0x488   :  { %2907 = vmatmul.msk.bf16.vlgmr.msrb.gmra.mxu0 %vm704_vm5, %v1051_v42 }
 0x48b   :  { %v919_v28 = vpop.f32.mrf.mxu2 }
 0x48c   :  { %v944_v23 = vpop.f32.mrf.mxu3 }
 0x490   :  { %v1028_v9 = vpop.permute.xlu0 %1027 }
 0x491   :  { %1040 = vmatpush.bf16.msrb.mxu3 %v1028_v9 }
 0x4a0   :  { %v836_v40 = vpop.xlane.xlu1 %835 }
 0x4a1   :  { %3166 = vrcp.f32 %v836_v40 }
 0x4a2   :  { %3168 = vrcp.f32 %v848_v60 }
 0x4a7   :  { %v3167_v5 = vpop.eup %3166 }
 0x4a8   :  { %v876_v43 = vmul.f32 %v3167_v5, %v4113_v55  ;;  %v3169_v14 = vpop.eup %3168 }
 0x4a9   :  { %v880_v15 = vmul.f32 %v3169_v14, %v4104_v58  ;;  %v1098_v14 = vpack.c.bf16 %v919_v28, %v919_v28 }
 0x4aa   :  { %v892_v6 = vpack.c.bf16 %v876_v43, %v876_v43 }
 0x4ab   :  { %v896_v20 = vpack.c.bf16 %v880_v15, %v880_v15  ;;  %v1097_v15 = vpack.c.bf16 %v917_v25, %v917_v25 }
 0x4ac   :  { %v1025_v10 = vunpack.c.l.b16 %v892_v6 }
 0x4ad   :  { %v1075_v55 = vunpack.c.l.b16 %v896_v20  ;;  %v1117_v20 = vunpack.c.l.b16 %v1097_v15 }
 0x4ae   :  { %v1026_v3 = vpack.c.b16 %v1025_v10, %v1024_v62 }
 0x4b0   :  { %2906 = vmatmul.msk.bf16.vlgmr.msrb.gmra.mxu3 %vm704_vm5, %v1026_v3  ;;  %v3034_v3 = vld [vmem:[%s4699_s7 + $0x8] sm:$0xff] }
 0x4b1   :  { %v845_v1 = vpop.xlane.xlu2 %844  ;;  %1210 = vmatpush.bf16.msra.mxu2 %v3034_v3 }
 0x4b2   :  { %3170 = vrcp.f32 %v845_v1  ;;  %v3033_v1 = vld [vmem:[%s4699_s7] sm:$0xff] }
 0x4b5   :  { %1211 = vmatpush.bf16.msra.mxu2 %v3033_v1  ;;  %v3036_v1 = vld [vmem:[%s4705_s13 + $0x8] sm:$0xff] }
 0x4b6   :  { %1365 = vmatpush.bf16.msra.mxu3 %v3036_v1 }
 0x4b8   :  { %v3171_v16 = vpop.eup %3170  ;;  %v1078_v18 = vpop.permute.xlu1 %1077 }
 0x4b9   :  { %v879_v30 = vmul.f32 %v3171_v16, %v4119_v35  ;;  %1090 = vmatpush.bf16.msrb.mxu1 %v1078_v18  ;;  %v1118_v18 = vunpack.c.l.b16 %v1098_v14 }
 0x4bb   :  { %v895_v22 = vpack.c.bf16 %v879_v30, %v879_v30  ;;  %v1121_v30 = vpack.c.b16 %v1118_v18, %v1117_v20 }
 0x4bd   :  { %v1074_v49 = vunpack.c.l.b16 %v895_v22 }
 0x4bf   :  { %v1076_v4 = vpack.c.b16 %v1075_v55, %v1074_v49 }
 0x4c1   :  { %2908 = vmatmul.msk.bf16.vlgmr.msrb.gmra.mxu1 %vm704_vm5, %v1076_v4 }
 0x4f5   :  { %v967_v26 = vpop.f32.mrf.mxu0 }
 0x4f6   :  { %v1101_v32 = vpack.c.bf16 %v967_v26, %v967_v26 }
 0x4f8   :  { %v1127_v58 = vunpack.c.l.b16 %v1101_v32  ;;  %v1099_v32 = vpack.c.bf16 %v942_v12, %v942_v12 }
 0x4f9   :  { %v992_v27 = vpop.f32.mrf.mxu1 }
 0x4fa   :  { %v1103_v37 = vpack.c.bf16 %v992_v27, %v992_v27  ;;  %v1100_v27 = vpack.c.bf16 %v944_v23, %v944_v23  ;;  %v1119_v28 = vunpack.c.l.b16 %v1099_v32 }
 0x4fc   :  { %v1129_v48 = vunpack.c.l.b16 %v1103_v37 }
 0x4fd   :  { %v969_v33 = vpop.f32.mrf.mxu0 }
 0x4fe   :  { %v1102_v36 = vpack.c.bf16 %v969_v33, %v969_v33  ;;  %v1120_v33 = vunpack.c.l.b16 %v1100_v27 }
 0x500   :  { %v1128_v56 = vunpack.c.l.b16 %v1102_v36  ;;  %v1122_v36 = vpack.c.b16 %v1120_v33, %v1119_v28 }
 0x501   :  { %v994_v38 = vpop.f32.mrf.mxu1 }
 0x502   :  { %v1131_v41 = vpack.c.b16 %v1128_v56, %v1127_v58  ;;  %v1104_v35 = vpack.c.bf16 %v994_v38, %v994_v38 }
 0x503   :  { %v1017_v63 = vpop.f32.mrf.mxu2 }
 0x504   :  { %v1130_v0 = vunpack.c.l.b16 %v1104_v35  ;;  %1133 = vrot.lane.b32.xlu1 %v1131_v41, %s3624_s8  ;;  %v1105_v44 = vpack.c.bf16 %v1017_v63, %v1017_v63  ;;  %v3083_v35 = vld [vmem:[#allocation8] ss:$0 sm:$0xff] }
 0x505   :  { %v1067_v29 = vpop.f32.mrf.mxu0 }
 0x506   :  { %v1132_v24 = vpack.c.b16 %v1130_v0, %v1129_v48  ;;  %v1109_v45 = vpack.c.bf16 %v1067_v29, %v1067_v29  ;;  %v1141_v50 = vunpack.c.l.b16 %v1105_v44 }
 0x508   :  { %1135 = vrot.lane.b32.xlu2 %v1132_v24, %s3624_s8  ;;  %v1155_v52 = vunpack.c.l.b16 %v1109_v45 }
 0x50b   :  { %v1019_v21 = vpop.f32.mrf.mxu2 }
 0x50c   :  { %v1106_v11 = vpack.c.bf16 %v1019_v21, %v1019_v21 }
 0x50d   :  { %v1069_v17 = vpop.f32.mrf.mxu0 }
 0x50e   :  { %v1142_v61 = vunpack.c.l.b16 %v1106_v11  ;;  %v1110_v51 = vpack.c.bf16 %v1069_v17, %v1069_v17 }
 0x510   :  { %v1156_v13 = vunpack.c.l.b16 %v1110_v51  ;;  %v1145_v54 = vpack.c.b16 %v1142_v61, %v1141_v50 }
 0x512   :  { %v1159_v31 = vpack.c.b16 %v1156_v13, %v1155_v52  ;;  %1147 = vrot.lane.b32.xlu1 %v1145_v54, %s3606_s4 }
 0x514   :  { %1161 = vrot.lane.b32.xlu0 %v1159_v31, %s3626_s1 }
 0x533   :  { %v1042_v39 = vpop.f32.mrf.mxu3 }
 0x534   :  { %v1107_v59 = vpack.c.bf16 %v1042_v39, %v1042_v39 }
 0x536   :  { %v1143_v9 = vunpack.c.l.b16 %v1107_v59 }
 0x53b   :  { %v1044_v42 = vpop.f32.mrf.mxu3 }
 0x53c   :  { %v1108_v60 = vpack.c.bf16 %v1044_v42, %v1044_v42 }
 0x53e   :  { %v1144_v40 = vunpack.c.l.b16 %v1108_v60  ;;  %v1092_v34 = vpop.f32.mrf.mxu1 }
 0x53f   :  { %v1111_v5 = vpack.c.bf16 %v1092_v34, %v1092_v34 }
 0x540   :  { %v1146_v2 = vpack.c.b16 %v1144_v40, %v1143_v9 }
 0x541   :  { %v1157_v6 = vunpack.c.l.b16 %v1111_v5 }
 0x542   :  { %1149 = vrot.lane.b32.xlu1 %v1146_v2, %s3606_s4 }
 0x546   :  { %v1094_v19 = vpop.f32.mrf.mxu1 }
 0x547   :  { %v1112_v43 = vpack.c.bf16 %v1094_v19, %v1094_v19 }
 0x549   :  { %v1158_v62 = vunpack.c.l.b16 %v1112_v43 }
 0x54b   :  { %v1160_v10 = vpack.c.b16 %v1158_v62, %v1157_v6 }
 0x54d   :  { %1163 = vrot.lane.b32.xlu0 %v1160_v10, %s3626_s1 }
 0x562   :  { %v1136_v25 = vpop.permute.xlu2 %1135 }
 0x563   :  { %v1170_v37 = vsel %vm329_vm3, %v1122_v36, %v1136_v25 }
 0x576   :  { %v1134_v16 = vpop.permute.xlu1 %1133 }
 0x577   :  { %v1167_v22 = vsel %vm329_vm3, %v1121_v30, %v1134_v16  ;;  %v3035_v16 = vld [vmem:[%s4705_s13] sm:$0xff] }
 0x578   :  { %1366 = vmatpush.bf16.msra.mxu3 %v3035_v16 }
 0x584   :  { %v1148_v55 = vpop.permute.xlu1 %1147 }
 0x585   :  { %v1172_v49 = vsel %vm704_vm5, %v1167_v22, %v1148_v55 }
 0x586   :  { %v1162_v4 = vpop.permute.xlu0 %1161 }
 0x587   :  { %v1177_v26 = vsel %vm1175_vm6, %v1172_v49, %v1162_v4 }
 0x588   :  { %2917 = vmatmul.msk.bf16.vlgmr.msra.gmra.mxu2 %vm339_vm7, %v1177_v26 }
 0x5b4   :  { %v1150_v58 = vpop.permute.xlu1 %1149 }
 0x5b5   :  { %v1174_v56 = vsel %vm704_vm5, %v1170_v37, %v1150_v58  ;;  %v3084_v37 = vld [vmem:[#allocation10] ss:$0 sm:$0xff] }
 0x5bf   :  { %v1164_v38 = vpop.permute.xlu0 %1163 }
 0x5c0   :  { %v1179_v41 = vsel %vm1175_vm6, %v1174_v56, %v1164_v38 }
 0x5c1   :  { %2918 = vmatmul.msk.bf16.gmra.mxu2 %vm339_vm7, %v1179_v41 }
 0x60b   :  { %v1213_v63 = vpop.f32.mrf.mxu2 }
 0x60c   :  { %v1214_v48 = vadd.f32 %v3083_v35, %v1213_v63 }
 0x60e   :  { %v1223_v0 = vadd.f32 %v1214_v48, %v3881_v46 }
 0x610   :  { %v1229_v29 = vsel %vm339_vm7, %v1223_v0, 0.0 }
 0x611   :  { %1230 = vadd.xlane.f32.xlu1 %v1229_v29 }
 0x613   :  { %v1215_v24 = vpop.f32.mrf.mxu2 }
 0x614   :  { %v1216_v44 = vadd.f32 %v3083_v35, %v1215_v24 }
 0x616   :  { %v1224_v21 = vadd.f32 %v1216_v44, %v3883_v47 }
 0x618   :  { %v1232_v45 = vsel %vm339_vm7, %v1224_v21, 0.0 }
 0x619   :  { %1233 = vadd.xlane.f32.xlu0 %v1232_v45 }
 0x644   :  { %v1218_v11 = vpop.f32.mrf.mxu2 }
 0x645   :  { %v1219_v17 = vadd.f32 %v3083_v35, %v1218_v11 }
 0x647   :  { %v1225_v50 = vadd.f32 %v1219_v17, %v3889_v53 }
 0x649   :  { %v1235_v61 = vsel %vm339_vm7, %v1225_v50, 0.0 }
 0x64a   :  { %1236 = vadd.xlane.f32.xlu2 %v1235_v61 }
 0x64c   :  { %v1220_v51 = vpop.f32.mrf.mxu2 }
 0x64d   :  { %v1221_v52 = vadd.f32 %v3083_v35, %v1220_v51  ;;  %v3085_v35 = vld [vmem:[#allocation11] ss:$0 sm:$0xff] }
 0x64f   :  { %v1226_v46 = vadd.f32 %v1221_v52, %v3883_v47 }
 0x651   :  { %v1238_v13 = vsel %vm339_vm7, %v1226_v46, 0.0 }
 0x652   :  { %1239 = vadd.xlane.f32.xlu1 %v1238_v13 }
 0x684   :  { %v1231_v54 = vpop.xlane.xlu1 %1230 }
 0x685   :  { %v1241_v31 = vmul.f32 %v1231_v54, %v3860_v57 }
 0x687   :  { %v1245_v12 = vsub.f32 %v1223_v0, %v1241_v31 }
 0x689   :  { %v1249_v23 = vmul.f32 %v1245_v12, %v1245_v12 }
 0x68b   :  { %v1253_v39 = vsel %vm339_vm7, %v1249_v23, 0.0 }
 0x68c   :  { %1254 = vadd.xlane.f32.xlu0 %v1253_v39  ;;  %v1234_v59 = vpop.xlane.xlu0 %1233 }
 0x68d   :  { %v1242_v53 = vmul.f32 %v1234_v59, %v3860_v57 }
 0x68f   :  { %v1246_v42 = vsub.f32 %v1224_v21, %v1242_v53 }
 0x691   :  { %v1250_v60 = vmul.f32 %v1246_v42, %v1246_v42 }
 0x693   :  { %v1256_v9 = vsel %vm339_vm7, %v1250_v60, 0.0 }
 0x694   :  { %1257 = vadd.xlane.f32.xlu1 %v1256_v9 }
 0x6bd   :  { %v1237_v47 = vpop.xlane.xlu2 %1236 }
 0x6be   :  { %v1243_v40 = vmul.f32 %v1237_v47, %v3860_v57 }
 0x6c0   :  { %v4176_v34 = vsub.f32 %v1225_v50, %v1243_v40 }
 0x6c2   :  { %v1251_v2 = vmul.f32 %v4176_v34, %v4176_v34 }
 0x6c4   :  { %v1259_v5 = vsel %vm339_vm7, %v1251_v2, 0.0 }
 0x6c5   :  { %v1240_v19 = vpop.xlane.xlu1 %1239  ;;  %1260 = vadd.xlane.f32.xlu0 %v1259_v5 }
 0x6c6   :  { %v1244_v43 = vmul.f32 %v1240_v19, %v3860_v57 }
 0x6c8   :  { %v4182_v6 = vsub.f32 %v1226_v46, %v1244_v43 }
 0x6ca   :  { %v1252_v62 = vmul.f32 %v4182_v6, %v4182_v6 }
 0x6cc   :  { %v1262_v10 = vsel %vm339_vm7, %v1252_v62, 0.0 }
 0x6cd   :  { %1263 = vadd.xlane.f32.xlu2 %v1262_v10  ;;  %v3040_v10 = vld [vmem:[%s4707_s15 + $0x18] sm:$0xff] }
 0x6ce   :  { %1431 = vmatpush.bf16.msra.mxu0 %v3040_v10 }
 0x6ff   :  { %v1255_v3 = vpop.xlane.xlu0 %1254 }
 0x700   :  { %v1265_v14 = vmul.f32 %v1255_v3, %v3860_v57  ;;  %v3037_v3 = vld [vmem:[%s4707_s15] sm:$0xff] }
 0x702   :  { %v1269_v15 = vadd.f32 1e-05, %v1265_v14  ;;  %v3086_v14 = vld [vmem:[#allocation16] ss:$0 sm:$0xff] }
 0x704   :  { %3172 = vrsqrt.f32 %v1269_v15  ;;  %vm1279_vm9 = vweird.f32 %v1269_v15 }
 0x707   :  { %v1258_v18 = vpop.xlane.xlu1 %1257 }
 0x708   :  { %v1266_v20 = vmul.f32 %v1258_v18, %v3860_v57 }
 0x70a   :  { %v3173_v30 = vpop.eup %3172  ;;  %v1270_v22 = vadd.f32 1e-05, %v1266_v20 }
 0x70b   :  { %v1274_v55 = vmul.f32 %v3173_v30, %v1269_v15  ;;  %vm1280_vm8 = vweird.f32 %v3173_v30 }
 0x70c   :  { %3174 = vrsqrt.f32 %v1270_v22  ;;  %vm1281_vm10 = vmor %vm1279_vm9, %vm1280_vm8  ;;  %vm1289_vm12 = vweird.f32 %v1270_v22  ;;  %vm1420_vm8 = vcmask 523264  }
 0x70d   :  { %v1275_v49 = vmul.f32 %v3173_v30, %v1274_v55 }
 0x70f   :  { %v1276_v4 = vmul.f32 0.5, %v1275_v49 }
 0x711   :  { %v1277_v26 = vsub.f32 1.5, %v1276_v4 }
 0x712   :  { %v3175_v27 = vpop.eup %3174 }
 0x713   :  { %v1278_v32 = vmul.f32 %v3173_v30, %v1277_v26  ;;  %v1284_v33 = vmul.f32 %v3175_v27, %v1270_v22  ;;  %vm1290_vm11 = vweird.f32 %v3175_v27 }
 0x714   :  { %vm1291_vm13 = vmor %vm1289_vm12, %vm1290_vm11 }
 0x715   :  { %v1285_v28 = vmul.f32 %v3175_v27, %v1284_v33  ;;  %v1282_v25 = vsel %vm1281_vm10, %v3173_v30, %v1278_v32 }
 0x716   :  { %v1313_v56 = vmul.f32 %v1282_v25, %v1245_v12 }
 0x717   :  { %v1286_v36 = vmul.f32 0.5, %v1285_v28  ;;  %v3087_v28 = vld [vmem:[#allocation17] ss:$0 sm:$0xff] }
 0x718   :  { %v1320_v63 = vmul.f32 %v3084_v37, %v1313_v56 }
 0x719   :  { %v1287_v58 = vsub.f32 1.5, %v1286_v36 }
 0x71a   :  { %v4195_v29 = vadd.f32 %v3085_v35, %v1320_v63 }
 0x71b   :  { %v1288_v38 = vmul.f32 %v3175_v27, %v1287_v58 }
 0x71d   :  { %v1292_v41 = vsel %vm1291_vm13, %v3175_v27, %v1288_v38 }
 0x71e   :  { %v1314_v48 = vmul.f32 %v1292_v41, %v1246_v42 }
 0x720   :  { %v1321_v0 = vmul.f32 %v3084_v37, %v1314_v48 }
 0x722   :  { %v4197_v24 = vadd.f32 %v3085_v35, %v1321_v0 }
 0x724   :  { %v1331_v44 = vpack.c.bf16 %v4197_v24, %v4195_v29 }
 0x726   :  { %2927 = vmatmul.msk.bf16.vlgmr.msra.gmra.mxu3 %vm339_vm7, %v1331_v44 }
 0x738   :  { %v1261_v21 = vpop.xlane.xlu0 %1260 }
 0x739   :  { %v1267_v45 = vmul.f32 %v1261_v21, %v3860_v57 }
 0x73b   :  { %v1271_v11 = vadd.f32 1e-05, %v1267_v45 }
 0x73d   :  { %3176 = vrsqrt.f32 %v1271_v11  ;;  %vm1299_vm15 = vweird.f32 %v1271_v11 }
 0x740   :  { %v1264_v17 = vpop.xlane.xlu2 %1263 }
 0x741   :  { %v1268_v50 = vmul.f32 %v1264_v17, %v3860_v57 }
 0x743   :  { %v3177_v61 = vpop.eup %3176  ;;  %v1272_v51 = vadd.f32 1e-05, %v1268_v50 }
 0x744   :  { %v1294_v52 = vmul.f32 %v3177_v61, %v1271_v11  ;;  %vm1300_vm14 = vweird.f32 %v3177_v61 }
 0x745   :  { %3178 = vrsqrt.f32 %v1272_v51  ;;  %vm1301_vm0 = vmor %vm1299_vm15, %vm1300_vm14  ;;  %vm1309_vm2 = vweird.f32 %v1272_v51 }
 0x746   :  { %v1295_v46 = vmul.f32 %v3177_v61, %v1294_v52 }
 0x748   :  { %v1296_v13 = vmul.f32 0.5, %v1295_v46 }
 0x74a   :  { %v1297_v54 = vsub.f32 1.5, %v1296_v13 }
 0x74b   :  { %v3179_v31 = vpop.eup %3178 }
 0x74c   :  { %v1298_v12 = vmul.f32 %v3177_v61, %v1297_v54  ;;  %v1304_v23 = vmul.f32 %v3179_v31, %v1272_v51  ;;  %vm1310_vm1 = vweird.f32 %v3179_v31 }
 0x74d   :  { %vm1311_vm4 = vmor %vm1309_vm2, %vm1310_vm1 }
 0x74e   :  { %v1305_v39 = vmul.f32 %v3179_v31, %v1304_v23  ;;  %v1302_v59 = vsel %vm1301_vm0, %v3177_v61, %v1298_v12 }
 0x74f   :  { %v1315_v60 = vmul.f32 %v1302_v59, %v4176_v34  ;;  %v3039_v34 = vld [vmem:[%s4707_s15 + $0x10] sm:$0xff] }
 0x750   :  { %v1306_v53 = vmul.f32 0.5, %v1305_v39  ;;  %1432 = vmatpush.bf16.msra.mxu0 %v3039_v34 }
 0x751   :  { %v1322_v2 = vmul.f32 %v3084_v37, %v1315_v60 }
 0x752   :  { %v1307_v42 = vsub.f32 1.5, %v1306_v53 }
 0x753   :  { %v1329_v19 = vadd.f32 %v3085_v35, %v1322_v2 }
 0x754   :  { %v1308_v9 = vmul.f32 %v3179_v31, %v1307_v42 }
 0x756   :  { %v1312_v47 = vsel %vm1311_vm4, %v3179_v31, %v1308_v9 }
 0x757   :  { %v1316_v40 = vmul.f32 %v1312_v47, %v4182_v6  ;;  %v3038_v6 = vld [vmem:[%s4707_s15 + $0x8] sm:$0xff] }
 0x758   :  { %1433 = vmatpush.bf16.msra.mxu0 %v3038_v6 }
 0x759   :  { %v1323_v5 = vmul.f32 %v3084_v37, %v1316_v40 }
 0x75b   :  { %v1330_v43 = vadd.f32 %v3085_v35, %v1323_v5  ;;  %v3042_v5 = vld [vmem:[%s4697_s5 + $0x18] sm:$0xff] }
 0x75c   :  { %1434 = vmatpush.bf16.msra.mxu0 %v3037_v3  ;;  %1590 = vmatpush.bf16.msra.mxu1 %v3042_v5 }
 0x75d   :  { %v1332_v62 = vpack.c.bf16 %v1330_v43, %v1329_v19 }
 0x75f   :  { %2928 = vmatmul.msk.bf16.gmra.mxu3 %vm339_vm7, %v1332_v62  ;;  %v3041_v62 = vld [vmem:[%s4697_s5 + $0x10] sm:$0xff] }
 0x760   :  { %1591 = vmatpush.bf16.msra.mxu1 %v3041_v62 }
 0x7a9   :  { %v1368_v1 = vpop.f32.mrf.mxu3 }
 0x7aa   :  { %v1369_v15 = vadd.f32 %v3086_v14, %v1368_v1 }
 0x7ac   :  { %v1378_v20 = vmax.f32 %v1369_v15, 0.0 }
 0x7b1   :  { %v1370_v16 = vpop.f32.mrf.mxu3 }
 0x7b2   :  { %v1371_v18 = vadd.f32 %v3086_v14, %v1370_v16 }
 0x7b4   :  { %v1379_v30 = vmax.f32 %v1371_v18, 0.0 }
 0x7b6   :  { %v1382_v22 = vpack.c.bf16 %v1379_v30, %v1378_v20 }
 0x7b8   :  { %2945 = vmatmul.msk.bf16.vlgmr.msra.gmra.mxu0 %vm1420_vm8, %v1382_v22 }
 0x7e2   :  { %v1373_v55 = vpop.f32.mrf.mxu3 }
 0x7e3   :  { %v1374_v49 = vadd.f32 %v3086_v14, %v1373_v55 }
 0x7e5   :  { %v1380_v27 = vmax.f32 %v1374_v49, 0.0 }
 0x7ea   :  { %v1375_v4 = vpop.f32.mrf.mxu3 }
 0x7eb   :  { %v1376_v26 = vadd.f32 %v3086_v14, %v1375_v4 }
 0x7ed   :  { %v1381_v32 = vmax.f32 %v1376_v26, 0.0  ;;  %v3088_v26 = vld [vmem:[#allocation13] ss:$0 sm:$0xff] }
 0x7ef   :  { %v1383_v33 = vpack.c.bf16 %v1381_v32, %v1380_v27 }
 0x7f1   :  { %2946 = vmatmul.msk.bf16.gmra.mxu0 %vm1420_vm8, %v1383_v33 }
 0x835   :  { %v1436_v25 = vpop.f32.mrf.mxu0 }
 0x836   :  { %v1437_v36 = vadd.f32 %v3087_v28, %v1436_v25 }
 0x838   :  { %v1446_v58 = vadd.f32 %v1437_v36, %v4195_v29 }
 0x83a   :  { %v1452_v37 = vsel %vm339_vm7, %v1446_v58, 0.0 }
 0x83b   :  { %1453 = vadd.xlane.f32.xlu1 %v1452_v37 }
 0x83d   :  { %v1438_v56 = vpop.f32.mrf.mxu0 }
 0x83e   :  { %v1439_v38 = vadd.f32 %v3087_v28, %v1438_v56 }
 0x840   :  { %v1447_v41 = vadd.f32 %v1439_v38, %v4197_v24 }
 0x842   :  { %v1455_v35 = vsel %vm339_vm7, %v1447_v41, 0.0 }
 0x843   :  { %1456 = vadd.xlane.f32.xlu0 %v1455_v35 }
 0x86e   :  { %v1441_v63 = vpop.f32.mrf.mxu0 }
 0x86f   :  { %v1442_v48 = vadd.f32 %v3087_v28, %v1441_v63 }
 0x871   :  { %v1448_v0 = vadd.f32 %v1442_v48, %v1329_v19 }
 0x873   :  { %v1458_v44 = vsel %vm339_vm7, %v1448_v0, 0.0 }
 0x874   :  { %1459 = vadd.xlane.f32.xlu2 %v1458_v44 }
 0x876   :  { %v1443_v21 = vpop.f32.mrf.mxu0 }
 0x877   :  { %v1444_v45 = vadd.f32 %v3087_v28, %v1443_v21  ;;  %v3089_v28 = vld [vmem:[#allocation14] ss:$0 sm:$0xff] }
 0x879   :  { %v1449_v11 = vadd.f32 %v1444_v45, %v1330_v43 }
 0x87b   :  { %v1461_v29 = vsel %vm339_vm7, %v1449_v11, 0.0 }
 0x87c   :  { %1462 = vadd.xlane.f32.xlu1 %v1461_v29 }
 0x8ae   :  { %v1454_v17 = vpop.xlane.xlu1 %1453 }
 0x8af   :  { %v1464_v50 = vmul.f32 %v1454_v17, %v3860_v57 }
 0x8b1   :  { %v1468_v61 = vsub.f32 %v1446_v58, %v1464_v50 }
 0x8b3   :  { %v1472_v24 = vmul.f32 %v1468_v61, %v1468_v61 }
 0x8b5   :  { %v1476_v51 = vsel %vm339_vm7, %v1472_v24, 0.0 }
 0x8b6   :  { %1477 = vadd.xlane.f32.xlu0 %v1476_v51  ;;  %v1457_v52 = vpop.xlane.xlu0 %1456 }
 0x8b7   :  { %v1465_v46 = vmul.f32 %v1457_v52, %v3860_v57 }
 0x8b9   :  { %v1469_v13 = vsub.f32 %v1447_v41, %v1465_v46 }
 0x8bb   :  { %v1473_v54 = vmul.f32 %v1469_v13, %v1469_v13 }
 0x8bd   :  { %v1479_v31 = vsel %vm339_vm7, %v1473_v54, 0.0 }
 0x8be   :  { %1480 = vadd.xlane.f32.xlu2 %v1479_v31 }
 0x8e7   :  { %v1460_v12 = vpop.xlane.xlu2 %1459 }
 0x8e8   :  { %v1466_v23 = vmul.f32 %v1460_v12, %v3860_v57 }
 0x8ea   :  { %v4232_v39 = vsub.f32 %v1448_v0, %v1466_v23 }
 0x8ec   :  { %v1474_v59 = vmul.f32 %v4232_v39, %v4232_v39 }
 0x8ee   :  { %v1482_v53 = vsel %vm339_vm7, %v1474_v59, 0.0 }
 0x8ef   :  { %v1463_v42 = vpop.xlane.xlu1 %1462  ;;  %1483 = vadd.xlane.f32.xlu1 %v1482_v53 }
 0x8f0   :  { %v1467_v60 = vmul.f32 %v1463_v42, %v3860_v57 }
 0x8f2   :  { %v4238_v9 = vsub.f32 %v1449_v11, %v1467_v60 }
 0x8f4   :  { %v1475_v47 = vmul.f32 %v4238_v9, %v4238_v9 }
 0x8f6   :  { %v1485_v40 = vsel %vm339_vm7, %v1475_v47, 0.0 }
 0x8f7   :  { %1486 = vadd.xlane.f32.xlu0 %v1485_v40  ;;  %v3090_v40 = vld [vmem:[#allocation7 + $0x1] ss:$0 sm:$0xff] }
 0x929   :  { %v1478_v2 = vpop.xlane.xlu0 %1477 }
 0x92a   :  { %v1488_v19 = vmul.f32 %v1478_v2, %v3860_v57 }
 0x92c   :  { %v1492_v43 = vadd.f32 1e-05, %v1488_v19 }
 0x92e   :  { %3180 = vrsqrt.f32 %v1492_v43  ;;  %vm1502_vm10 = vweird.f32 %v1492_v43 }
 0x931   :  { %v1481_v10 = vpop.xlane.xlu2 %1480 }
 0x932   :  { %v1489_v34 = vmul.f32 %v1481_v10, %v3860_v57 }
 0x934   :  { %v3181_v6 = vpop.eup %3180  ;;  %v1493_v3 = vadd.f32 1e-05, %v1489_v34 }
 0x935   :  { %v1497_v1 = vmul.f32 %v3181_v6, %v1492_v43  ;;  %vm1503_vm9 = vweird.f32 %v3181_v6 }
 0x936   :  { %3182 = vrsqrt.f32 %v1493_v3  ;;  %vm1504_vm11 = vmor %vm1502_vm10, %vm1503_vm9  ;;  %vm1512_vm13 = vweird.f32 %v1493_v3 }
 0x937   :  { %v1498_v14 = vmul.f32 %v3181_v6, %v1497_v1 }
 0x939   :  { %v1499_v15 = vmul.f32 0.5, %v1498_v14 }
 0x93b   :  { %v1500_v16 = vsub.f32 1.5, %v1499_v15 }
 0x93c   :  { %v3183_v18 = vpop.eup %3182 }
 0x93d   :  { %v1501_v20 = vmul.f32 %v3181_v6, %v1500_v16  ;;  %v1507_v30 = vmul.f32 %v3183_v18, %v1493_v3  ;;  %vm1513_vm12 = vweird.f32 %v3183_v18 }
 0x93e   :  { %vm1514_vm14 = vmor %vm1512_vm13, %vm1513_vm12 }
 0x93f   :  { %v1508_v22 = vmul.f32 %v3183_v18, %v1507_v30  ;;  %v1505_v55 = vsel %vm1504_vm11, %v3181_v6, %v1501_v20 }
 0x940   :  { %v1536_v27 = vmul.f32 %v1505_v55, %v1468_v61 }
 0x941   :  { %v1509_v49 = vmul.f32 0.5, %v1508_v22 }
 0x942   :  { %v1543_v25 = vmul.f32 %v3088_v26, %v1536_v27 }
 0x943   :  { %v1510_v4 = vsub.f32 1.5, %v1509_v49 }
 0x944   :  { %v4251_v37 = vadd.f32 %v3089_v28, %v1543_v25 }
 0x945   :  { %v1511_v32 = vmul.f32 %v3183_v18, %v1510_v4 }
 0x947   :  { %v1515_v33 = vsel %vm1514_vm14, %v3183_v18, %v1511_v32 }
 0x948   :  { %v1537_v36 = vmul.f32 %v1515_v33, %v1469_v13 }
 0x94a   :  { %v1544_v58 = vmul.f32 %v3088_v26, %v1537_v36 }
 0x94c   :  { %v4253_v56 = vadd.f32 %v3089_v28, %v1544_v58 }
 0x94e   :  { %v1554_v38 = vpack.c.bf16 %v4253_v56, %v4251_v37 }
 0x950   :  { %2959 = vmatmul.msk.bf16.vlgmr.msra.gmra.mxu1 %vm339_vm7, %v1554_v38 }
 0x962   :  { %v1484_v41 = vpop.xlane.xlu1 %1483 }
 0x963   :  { %v1490_v35 = vmul.f32 %v1484_v41, %v3860_v57 }
 0x965   :  { %v1494_v63 = vadd.f32 1e-05, %v1490_v35 }
 0x967   :  { %3184 = vrsqrt.f32 %v1494_v63  ;;  %vm1522_vm0 = vweird.f32 %v1494_v63 }
 0x96a   :  { %v1487_v48 = vpop.xlane.xlu0 %1486 }
 0x96b   :  { %v1491_v0 = vmul.f32 %v1487_v48, %v3860_v57 }
 0x96d   :  { %v3185_v44 = vpop.eup %3184  ;;  %v1495_v21 = vadd.f32 1e-05, %v1491_v0 }
 0x96e   :  { %v1517_v45 = vmul.f32 %v3185_v44, %v1494_v63  ;;  %vm1523_vm15 = vweird.f32 %v3185_v44 }
 0x96f   :  { %3186 = vrsqrt.f32 %v1495_v21  ;;  %vm1524_vm1 = vmor %vm1522_vm0, %vm1523_vm15  ;;  %vm1532_vm4 = vweird.f32 %v1495_v21 }
 0x970   :  { %v1518_v11 = vmul.f32 %v3185_v44, %v1517_v45 }
 0x972   :  { %v1519_v29 = vmul.f32 0.5, %v1518_v11 }
 0x974   :  { %v1520_v17 = vsub.f32 1.5, %v1519_v29 }
 0x975   :  { %v3187_v50 = vpop.eup %3186 }
 0x976   :  { %v1521_v61 = vmul.f32 %v3185_v44, %v1520_v17  ;;  %v1527_v24 = vmul.f32 %v3187_v50, %v1495_v21  ;;  %vm1533_vm2 = vweird.f32 %v3187_v50 }
 0x977   :  { %vm1534_vm9 = vmor %vm1532_vm4, %vm1533_vm2 }
 0x978   :  { %v1528_v51 = vmul.f32 %v3187_v50, %v1527_v24  ;;  %v1525_v52 = vsel %vm1524_vm1, %v3185_v44, %v1521_v61 }
 0x979   :  { %v1538_v54 = vmul.f32 %v1525_v52, %v4232_v39 }
 0x97a   :  { %v1529_v46 = vmul.f32 0.5, %v1528_v51 }
 0x97b   :  { %v1545_v59 = vmul.f32 %v3088_v26, %v1538_v54 }
 0x97c   :  { %v1530_v13 = vsub.f32 1.5, %v1529_v46 }
 0x97d   :  { %v4262_v42 = vadd.f32 %v3089_v28, %v1545_v59 }
 0x97e   :  { %v1531_v31 = vmul.f32 %v3187_v50, %v1530_v13 }
 0x980   :  { %v1535_v12 = vsel %vm1534_vm9, %v3187_v50, %v1531_v31 }
 0x981   :  { %v1539_v23 = vmul.f32 %v1535_v12, %v4238_v9 }
 0x983   :  { %v1546_v53 = vmul.f32 %v3088_v26, %v1539_v23 }
 0x985   :  { %v4264_v60 = vadd.f32 %v3089_v28, %v1546_v53 }
 0x987   :  { %v1555_v47 = vpack.c.bf16 %v4264_v60, %v4262_v42 }
 0x989   :  { %2960 = vmatmul.msk.bf16.gmra.mxu1 %vm339_vm7, %v1555_v47 }
 0x9cd   :  { %v1593_v2 = vpop.f32.mrf.mxu1 }
 0x9ce   :  { %v1594_v39 = vadd.f32 %v3090_v40, %v1593_v2 }
 0x9d0   :  { %v1603_v5 = vpack.c.bf16 %v1594_v39, %v1594_v39 }
 0x9d2   :  { %1619 = vrot.lane.b32.xlu0 %v1603_v5, %s3619_s16  ;;  %1611 = vrot.lane.b32.xlu2 %v1603_v5, %s3620_s29  ;;  %v1635_v15 = vunpack.c.l.b16 %v1603_v5 }
 0x9d5   :  { %v1595_v9 = vpop.f32.mrf.mxu1 }
 0x9d6   :  { %v1596_v19 = vadd.f32 %v3090_v40, %v1595_v9 }
 0x9d8   :  { %v1604_v43 = vpack.c.bf16 %v1596_v19, %v1596_v19 }
 0x9da   :  { %1613 = vrot.lane.b32.xlu1 %v1604_v43, %s3620_s29  ;;  %1621 = vrot.lane.b32.xlu2 %v1604_v43, %s3619_s16  ;;  %v1636_v14 = vunpack.c.l.b16 %v1604_v43 }
 0x9dc   :  { %v1637_v16 = vpack.c.b16 %v1636_v14, %v1635_v15 }
 0x9e2   :  { %1627 = vrot.lane.b32.xlu2 %v1603_v5, %s3621_s0 }
 0xa06   :  { %v1598_v62 = vpop.f32.mrf.mxu1 }
 0xa07   :  { %v1599_v10 = vadd.f32 %v3090_v40, %v1598_v62 }
 0xa09   :  { %v1605_v34 = vpack.c.bf16 %v1599_v10, %v1599_v10 }
 0xa0b   :  { %1615 = vrot.lane.b32.xlu0 %v1605_v34, %s3620_s29  ;;  %v1660_v20 = vunpack.c.l.b16 %v1605_v34 }
 0xa0e   :  { %v1600_v6 = vpop.f32.mrf.mxu1 }
 0xa0f   :  { %v1601_v3 = vadd.f32 %v3090_v40, %v1600_v6 }
 0xa11   :  { %v1606_v1 = vpack.c.bf16 %v1601_v3, %v1601_v3 }
 0xa13   :  { %1617 = vrot.lane.b32.xlu1 %v1606_v1, %s3620_s29  ;;  %1629 = vrot.lane.b32.xlu0 %v1604_v43, %s3621_s0  ;;  %v1661_v18 = vunpack.c.l.b16 %v1606_v1 }
 0xa14   :  { %1625 = vrot.lane.b32.xlu2 %v1606_v1, %s3619_s16 }
 0xa15   :  { %v1662_v30 = vpack.c.b16 %v1661_v18, %v1660_v20 }
 0xa1b   :  { %1623 = vrot.lane.b32.xlu1 %v1605_v34, %s3619_s16  ;;  %1638 = vrot.lane.b32.xlu0 %v1637_v16, %s3622_s14 }
 0xa1c   :  { %1633 = vrot.lane.b32.xlu2 %v1606_v1, %s3621_s0 }
 0xa23   :  { %1631 = vrot.lane.b32.xlu1 %v1605_v34, %s3621_s0 }
 0xa2b   :  { %1663 = vrot.lane.b32.xlu1 %v1662_v30, %s3622_s14 }
 0xa2c   :  { %v1612_v22 = vpop.permute.xlu2 %1611 }
 0xa2d   :  { %v1685_v33 = vunpack.c.l.b16 %v1612_v22 }
 0xa34   :  { %v1622_v55 = vpop.permute.xlu2 %1621 }
 0xa35   :  { %v1736_v4 = vunpack.c.l.b16 %v1622_v55 }
 0xa3c   :  { %v1628_v58 = vpop.permute.xlu2 %1627 }
 0xa3d   :  { %v1785_v35 = vunpack.c.l.b16 %v1628_v58 }
 0xa44   :  { %v1620_v49 = vpop.permute.xlu0 %1619 }
 0xa45   :  { %v1735_v26 = vunpack.c.l.b16 %v1620_v49 }
 0xa47   :  { %v1737_v27 = vpack.c.b16 %v1736_v4, %v1735_v26 }
 0xa49   :  { %1738 = vrot.lane.b32.xlu2 %v1737_v27, %s3622_s14 }
 0xa4c   :  { %v1614_v32 = vpop.permute.xlu1 %1613 }
 0xa4d   :  { %v1686_v28 = vunpack.c.l.b16 %v1614_v32 }
 0xa4f   :  { %v1687_v25 = vpack.c.b16 %v1686_v28, %v1685_v33 }
 0xa51   :  { %1688 = vrot.lane.b32.xlu0 %v1687_v25, %s3622_s14 }
 0xa6e   :  { %v1626_v45 = vpop.permute.xlu2 %1625 }
 0xa6f   :  { %v1761_v17 = vunpack.c.l.b16 %v1626_v45 }
 0xa76   :  { %v1634_v51 = vpop.permute.xlu2 %1633 }
 0xa77   :  { %v1811_v46 = vunpack.c.l.b16 %v1634_v51 }
 0xa7d   :  { %v1616_v36 = vpop.permute.xlu0 %1615 }
 0xa7e   :  { %v1710_v63 = vunpack.c.l.b16 %v1616_v36 }
 0xa85   :  { %v1618_v38 = vpop.permute.xlu1 %1617  ;;  %v1630_v41 = vpop.permute.xlu0 %1629 }
 0xa86   :  { %v1711_v48 = vunpack.c.l.b16 %v1618_v38  ;;  %v1786_v0 = vunpack.c.l.b16 %v1630_v41 }
 0xa88   :  { %v1712_v44 = vpack.c.b16 %v1711_v48, %v1710_v63  ;;  %v4285_v21 = vpack.c.b16 %v1786_v0, %v1785_v35 }
 0xa8a   :  { %1788 = vrot.lane.b32.xlu1 %v4285_v21, %s3622_s14  ;;  %1713 = vrot.lane.b32.xlu0 %v1712_v44, %s3622_s14 }
 0xa8d   :  { %v1624_v11 = vpop.permute.xlu1 %1623  ;;  %v1639_v29 = vpop.permute.xlu0 %1638 }
 0xa8e   :  { %v1760_v50 = vunpack.c.l.b16 %v1624_v11  ;;  %v1644_v61 = vsel %vm329_vm3, %v1639_v29, 0 }
 0xa8f   :  { %1653 = vmatpush.bf16.xpose.msrb.mxu2 %v1644_v61 }
 0xa90   :  { %v4291_v24 = vpack.c.b16 %v1761_v17, %v1760_v50 }
 0xa92   :  { %2132 = vrot.lane.b32.xlu1 %v1737_v27, %s3625_s30  ;;  %1763 = vrot.lane.b32.xlu2 %v4291_v24, %s3622_s14 }
 0xa95   :  { %v1632_v52 = vpop.permute.xlu1 %1631 }
 0xa96   :  { %v1810_v13 = vunpack.c.l.b16 %v1632_v52  ;;  %2961 = vmatmul.msk.bf16.vlgmr.msrb.gmra.mxu2 %vm329_vm3, %v1637_v16 }
 0xa98   :  { %v4297_v54 = vpack.c.b16 %v1811_v46, %v1810_v13 }
 0xa9a   :  { %2057 = vrot.lane.b32.xlu2 %v1662_v30, %s3625_s30  ;;  %1813 = vrot.lane.b32.xlu0 %v4297_v54, %s3622_s14 }
 0xa9d   :  { %v1664_v31 = vpop.permute.xlu1 %1663 }
 0xa9e   :  { %v1669_v12 = vsel %vm329_vm3, %v1664_v31, 0 }
 0xa9f   :  { %1678 = vmatpush.bf16.xpose.msrb.mxu3 %v1669_v12 }
 0xaa2   :  { %2032 = vrot.lane.b32.xlu0 %v1637_v16, %s3625_s30 }
 0xaa3   :  { %v1739_v23 = vpop.permute.xlu2 %1738 }
 0xaa4   :  { %v1744_v59 = vsel %vm329_vm3, %v1739_v23, 0 }
 0xaa5   :  { %1753 = vmatpush.bf16.xpose.msra.mxu2 %v1744_v59 }
 0xaa6   :  { %2962 = vmatmul.msk.bf16.vlgmr.msrb.gmra.mxu3 %vm329_vm3, %v1662_v30 }
 0xaaa   :  { %2082 = vrot.lane.b32.xlu0 %v1687_v25, %s3625_s30 }
 0xaac   :  { %2965 = vmatmul.msk.bf16.vlgmr.msra.gmra.mxu2 %vm329_vm3, %v1737_v27 }
 0xab2   :  { %2107 = vrot.lane.b32.xlu0 %v1712_v44, %s3625_s30 }
 0xac3   :  { %v1689_v53 = vpop.permute.xlu0 %1688 }
 0xac4   :  { %v1694_v47 = vsel %vm329_vm3, %v1689_v53, 0 }
 0xac5   :  { %1703 = vmatpush.bf16.xpose.msrb.mxu0 %v1694_v47 }
 0xacc   :  { %2963 = vmatmul.msk.bf16.vlgmr.msrb.gmra.mxu0 %vm329_vm3, %v1687_v25 }
 0xaec   :  { %v1764_v40 = vpop.permute.xlu2 %1763 }
 0xaed   :  { %v1769_v2 = vsel %vm329_vm3, %v1764_v40, 0 }
 0xaee   :  { %1778 = vmatpush.bf16.xpose.msra.mxu3 %v1769_v2 }
 0xaf4   :  { %v2058_v39 = vpop.permute.xlu2 %2057 }
 0xaf5   :  { %2966 = vmatmul.msk.bf16.vlgmr.msra.gmra.mxu3 %vm329_vm3, %v4291_v24 }
 0xaf6   :  { %2070 = vmatpush.bf16.msrb.mxu3 %v2058_v39 }
 0xafc   :  { %v1789_v5 = vpop.permute.xlu1 %1788  ;;  %v1714_v9 = vpop.permute.xlu0 %1713 }
 0xafd   :  { %v1794_v19 = vsel %vm329_vm3, %v1789_v5, 0  ;;  %v1719_v43 = vsel %vm329_vm3, %v1714_v9, 0 }
 0xafe   :  { %1728 = vmatpush.bf16.xpose.msrb.mxu1 %v1719_v43  ;;  %1803 = vmatpush.bf16.xpose.msra.mxu0 %v1794_v19 }
 0xb04   :  { %v2133_v6 = vpop.permute.xlu1 %2132 }
 0xb05   :  { %2964 = vmatmul.msk.bf16.vlgmr.msrb.gmra.mxu1 %vm329_vm3, %v1712_v44  ;;  %2967 = vmatmul.msk.bf16.vlgmr.msra.gmra.mxu0 %vm329_vm3, %v4285_v21 }
 0xb0c   :  { %v1814_v62 = vpop.permute.xlu0 %1813 }
 0xb0d   :  { %v1819_v10 = vsel %vm329_vm3, %v1814_v62, 0 }
 0xb0e   :  { %1828 = vmatpush.bf16.xpose.msra.mxu1 %v1819_v10 }
 0xb14   :  { %v2033_v34 = vpop.permute.xlu0 %2032 }
 0xb15   :  { %2968 = vmatmul.msk.bf16.vlgmr.msra.gmra.mxu1 %vm329_vm3, %v4297_v54  ;;  %2045 = vmatpush.bf16.msrb.mxu2 %v2033_v34 }
 0xb19   :  { %2145 = vmatpush.bf16.msra.mxu2 %v2133_v6  ;;  %v1655_v3 = vpop.f32.mrf.mxu2 }
 0xb1a   :  { %v1656_v1 = vadd.f32 %v1655_v3, %v3954_v7 }
 0xb1c   :  { %v2083_v14 = vpop.permute.xlu0 %2082  ;;  %v1835_v15 = vsel %vm704_vm5, %v1656_v1, -inf }
 0xb1d   :  { %1836 = vmax.xlane.f32.xlu1 %v1835_v15  ;;  %2095 = vmatpush.bf16.msrb.mxu0 %v2083_v14 }
 0xb21   :  { %v1657_v16 = vpop.f32.mrf.mxu2 }
 0xb22   :  { %v1658_v18 = vadd.f32 %v1657_v16, %v3954_v7 }
 0xb24   :  { %v2108_v20 = vpop.permute.xlu0 %2107  ;;  %v1838_v30 = vsel %vm704_vm5, %v1658_v18, -inf }
 0xb25   :  { %1839 = vmax.xlane.f32.xlu2 %v1838_v30  ;;  %2120 = vmatpush.bf16.msrb.mxu1 %v2108_v20 }
 0xb29   :  { %v1680_v22 = vpop.f32.mrf.mxu3 }
 0xb2a   :  { %v1681_v55 = vadd.f32 %v1680_v22, %v3956_v8 }
 0xb2c   :  { %v1841_v49 = vsel %vm704_vm5, %v1681_v55, -inf }
 0xb2d   :  { %1842 = vmax.xlane.f32.xlu2 %v1841_v49 }
 0xb2f   :  { %v1755_v4 = vpop.f32.mrf.mxu2 }
 0xb30   :  { %v4329_v26 = vadd.f32 %v1755_v4, %v3954_v7 }
 0xb31   :  { %v1682_v27 = vpop.f32.mrf.mxu3 }
 0xb32   :  { %v4332_v32 = vadd.f32 %v1682_v27, %v3956_v8  ;;  %v1859_v33 = vsel %vm704_vm5, %v4329_v26, -inf }
 0xb33   :  { %1860 = vmax.xlane.f32.xlu1 %v1859_v33 }
 0xb34   :  { %v1844_v28 = vsel %vm704_vm5, %v4332_v32, -inf }
 0xb35   :  { %1845 = vmax.xlane.f32.xlu0 %v1844_v28 }
 0xb37   :  { %v1757_v25 = vpop.f32.mrf.mxu2 }
 0xb38   :  { %v4339_v36 = vadd.f32 %v1757_v25, %v3954_v7 }
 0xb3a   :  { %v1862_v58 = vsel %vm704_vm5, %v4339_v36, -inf }
 0xb3b   :  { %1863 = vmax.xlane.f32.xlu2 %v1862_v58 }
 0xb49   :  { %v1705_v38 = vpop.f32.mrf.mxu0 }
 0xb4a   :  { %v4344_v41 = vadd.f32 %v1705_v38, %v3954_v7 }
 0xb4c   :  { %v1847_v35 = vsel %vm704_vm5, %v4344_v41, -inf }
 0xb4d   :  { %1848 = vmax.xlane.f32.xlu0 %v1847_v35 }
 0xb51   :  { %v1707_v63 = vpop.f32.mrf.mxu0 }
 0xb52   :  { %v4349_v48 = vadd.f32 %v1707_v63, %v3954_v7 }
 0xb54   :  { %v1850_v0 = vsel %vm704_vm5, %v4349_v48, -inf }
 0xb55   :  { %1851 = vmax.xlane.f32.xlu1 %v1850_v0 }
 0xb78   :  { %v1780_v44 = vpop.f32.mrf.mxu3 }
 0xb79   :  { %v4354_v45 = vadd.f32 %v1780_v44, %v3956_v8 }
 0xb7b   :  { %v1865_v11 = vsel %vm704_vm5, %v4354_v45, -inf }
 0xb7c   :  { %1866 = vmax.xlane.f32.xlu1 %v1865_v11 }
 0xb80   :  { %v1782_v19 = vpop.f32.mrf.mxu3 }
 0xb81   :  { %v4383_v43 = vadd.f32 %v1782_v19, %v3956_v8 }
 0xb82   :  { %v1730_v29 = vpop.f32.mrf.mxu1  ;;  %v1805_v17 = vpop.f32.mrf.mxu0 }
 0xb83   :  { %v4359_v50 = vadd.f32 %v1730_v29, %v3956_v8  ;;  %v4362_v61 = vadd.f32 %v1805_v17, %v3954_v7 }
 0xb85   :  { %v1871_v51 = vsel %vm704_vm5, %v4362_v61, -inf  ;;  %v1853_v52 = vsel %vm704_vm5, %v4359_v50, -inf }
 0xb86   :  { %1872 = vmax.xlane.f32.xlu2 %v1871_v51  ;;  %1854 = vmax.xlane.f32.xlu0 %v1853_v52 }
 0xb8a   :  { %v1732_v46 = vpop.f32.mrf.mxu1  ;;  %v1807_v13 = vpop.f32.mrf.mxu0 }
 0xb8b   :  { %v4369_v31 = vadd.f32 %v1732_v46, %v3956_v8  ;;  %v4372_v12 = vadd.f32 %v1807_v13, %v3954_v7 }
 0xb8d   :  { %v1856_v23 = vsel %vm704_vm5, %v4369_v31, -inf  ;;  %v1874_v59 = vsel %vm704_vm5, %v4372_v12, -inf }
 0xb8e   :  { %1857 = vmax.xlane.f32.xlu1 %v1856_v23  ;;  %1875 = vmax.xlane.f32.xlu0 %v1874_v59 }
 0xb90   :  { %v1837_v53 = vpop.xlane.xlu1 %1836 }
 0xb91   :  { %v1883_v47 = vsub.f32 %v1656_v1, %v1837_v53  ;;  %v1868_v1 = vsel %vm704_vm5, %v4383_v43, -inf }
 0xb92   :  { %v1830_v6 = vpop.f32.mrf.mxu1 }
 0xb93   :  { %v1899_v40 = vmul.f32 1.442695, %v1883_v47  ;;  %v4392_v15 = vadd.f32 %v1830_v6, %v3956_v8 }
 0xb95   :  { %3188 = vpow2.f32 %v1899_v40 }
 0xb98   :  { %v1840_v2 = vpop.xlane.xlu2 %1839 }
 0xb99   :  { %v1884_v39 = vsub.f32 %v1658_v18, %v1840_v2 }
 0xb9a   :  { %v1832_v49 = vpop.f32.mrf.mxu1 }
 0xb9b   :  { %v4378_v5 = vpop.eup %3188  ;;  %v1901_v9 = vmul.f32 1.442695, %v1884_v39  ;;  %v4402_v4 = vadd.f32 %v1832_v49, %v3956_v8 }
 0xb9c   :  { %v1931_v7 = vsel %vm704_vm5, %v4378_v5, 0.0 }
 0xb9d   :  { %3190 = vpow2.f32 %v1901_v9  ;;  %1932 = vadd.xlane.f32.xlu2 %v1931_v7 }
 0xba0   :  { %v1843_v62 = vpop.xlane.xlu2 %1842 }
 0xba1   :  { %v1885_v10 = vsub.f32 %v1681_v55, %v1843_v62  ;;  %v1877_v55 = vsel %vm704_vm5, %v4392_v15, -inf }
 0xba3   :  { %v4385_v34 = vpop.eup %3190  ;;  %v1903_v3 = vmul.f32 1.442695, %v1885_v10 }
 0xba4   :  { %v1934_v14 = vsel %vm704_vm5, %v4385_v34, 0.0 }
 0xba5   :  { %3192 = vpow2.f32 %v1903_v3  ;;  %1869 = vmax.xlane.f32.xlu2 %v1868_v1  ;;  %1935 = vadd.xlane.f32.xlu0 %v1934_v14 }
 0xba6   :  { %v1861_v28 = vpop.xlane.xlu1 %1860 }
 0xba7   :  { %v1891_v38 = vsub.f32 %v4329_v26, %v1861_v28 }
 0xba8   :  { %v1846_v16 = vpop.xlane.xlu0 %1845 }
 0xba9   :  { %v1886_v18 = vsub.f32 %v4332_v32, %v1846_v16  ;;  %v1880_v32 = vsel %vm704_vm5, %v4402_v4, -inf  ;;  %v1915_v8 = vmul.f32 1.442695, %v1891_v38 }
 0xbab   :  { %v4395_v20 = vpop.eup %3192  ;;  %v1905_v30 = vmul.f32 1.442695, %v1886_v18 }
 0xbac   :  { %v1937_v22 = vsel %vm704_vm5, %v4395_v20, 0.0 }
 0xbad   :  { %3194 = vpow2.f32 %v1905_v30  ;;  %1938 = vadd.xlane.f32.xlu1 %v1937_v22  ;;  %1878 = vmax.xlane.f32.xlu0 %v1877_v55 }
 0xbae   :  { %v1864_v63 = vpop.xlane.xlu2 %1863 }
 0xbaf   :  { %v1892_v29 = vsub.f32 %v4339_v36, %v1864_v63 }
 0xbb3   :  { %v4404_v27 = vpop.eup %3194 }
 0xbb4   :  { %v1940_v33 = vsel %vm704_vm5, %v4404_v27, 0.0 }
 0xbb5   :  { %1881 = vmax.xlane.f32.xlu1 %v1880_v32  ;;  %1941 = vadd.xlane.f32.xlu2 %v1940_v33 }
 0xbc0   :  { %v1849_v25 = vpop.xlane.xlu0 %1848 }
 0xbc1   :  { %v1887_v58 = vsub.f32 %v4344_v41, %v1849_v25  ;;  %v1917_v41 = vmul.f32 1.442695, %v1892_v29 }
 0xbc3   :  { %v1907_v35 = vmul.f32 1.442695, %v1887_v58 }
 0xbc5   :  { %3196 = vpow2.f32 %v1907_v35 }
 0xbc6   :  { %3198 = vpow2.f32 %v1915_v8 }
 0xbc8   :  { %v1852_v0 = vpop.xlane.xlu1 %1851 }
 0xbc9   :  { %v1888_v44 = vsub.f32 %v4349_v48, %v1852_v0 }
 0xbcb   :  { %v4413_v11 = vpop.eup %3196  ;;  %v1909_v17 = vmul.f32 1.442695, %v1888_v44 }
 0xbcc   :  { %v1943_v51 = vsel %vm704_vm5, %v4413_v11, 0.0  ;;  %v4418_v26 = vpop.eup %3198 }
 0xbcd   :  { %3200 = vpow2.f32 %v1909_v17  ;;  %1944 = vadd.xlane.f32.xlu1 %v1943_v51  ;;  %v1955_v46 = vsel %vm704_vm5, %v4418_v26, 0.0 }
 0xbce   :  { %3202 = vpow2.f32 %v1917_v41 }
 0xbd3   :  { %v4420_v52 = vpop.eup %3200 }
 0xbd4   :  { %v1946_v48 = vsel %vm704_vm5, %v4420_v52, 0.0  ;;  %v4426_v36 = vpop.eup %3202 }
 0xbd5   :  { %1947 = vadd.xlane.f32.xlu2 %v1946_v48  ;;  %1956 = vadd.xlane.f32.xlu1 %v1955_v46  ;;  %v1958_v13 = vsel %vm704_vm5, %v4426_v36, 0.0 }
 0xbdd   :  { %1959 = vadd.xlane.f32.xlu2 %v1958_v13 }
 0xbef   :  { %v1867_v23 = vpop.xlane.xlu1 %1866 }
 0xbf0   :  { %v1893_v59 = vsub.f32 %v4354_v45, %v1867_v23 }
 0xbf2   :  { %v1919_v53 = vmul.f32 1.442695, %v1893_v59 }
 0xbf4   :  { %3204 = vpow2.f32 %v1919_v53 }
 0xbf9   :  { %v1873_v47 = vpop.xlane.xlu2 %1872  ;;  %v1855_v40 = vpop.xlane.xlu0 %1854 }
 0xbfa   :  { %v4431_v2 = vpop.eup %3204  ;;  %v1895_v39 = vsub.f32 %v4362_v61, %v1873_v47  ;;  %v1889_v9 = vsub.f32 %v4359_v50, %v1855_v40 }
 0xbfb   :  { %v1961_v7 = vsel %vm704_vm5, %v4431_v2, 0.0 }
 0xbfc   :  { %v1923_v19 = vmul.f32 1.442695, %v1895_v39  ;;  %v1911_v62 = vmul.f32 1.442695, %v1889_v9  ;;  %1962 = vadd.xlane.f32.xlu2 %v1961_v7 }
 0xbfe   :  { %3206 = vpow2.f32 %v1923_v19 }
 0xbff   :  { %3208 = vpow2.f32 %v1911_v62 }
 0xc01   :  { %v1858_v10 = vpop.xlane.xlu1 %1857  ;;  %v1876_v45 = vpop.xlane.xlu0 %1875 }
 0xc02   :  { %v1890_v6 = vsub.f32 %v4369_v31, %v1858_v10  ;;  %v1896_v3 = vsub.f32 %v4372_v12, %v1876_v45 }
 0xc04   :  { %v4439_v1 = vpop.eup %3206  ;;  %v1913_v14 = vmul.f32 1.442695, %v1890_v6  ;;  %v1925_v61 = vmul.f32 1.442695, %v1896_v3 }
 0xc05   :  { %v4441_v16 = vpop.eup %3208  ;;  %v1967_v50 = vsel %vm704_vm5, %v4439_v1, 0.0 }
 0xc06   :  { %3210 = vpow2.f32 %v1913_v14  ;;  %1968 = vadd.xlane.f32.xlu0 %v1967_v50  ;;  %v1949_v18 = vsel %vm704_vm5, %v4441_v16, 0.0 }
 0xc07   :  { %3212 = vpow2.f32 %v1925_v61  ;;  %1950 = vadd.xlane.f32.xlu1 %v1949_v18 }
 0xc0c   :  { %v4447_v30 = vpop.eup %3210 }
 0xc0d   :  { %v4449_v31 = vpop.eup %3212  ;;  %v1952_v12 = vsel %vm704_vm5, %v4447_v30, 0.0 }
 0xc0e   :  { %1953 = vadd.xlane.f32.xlu2 %v1952_v12  ;;  %v1970_v22 = vsel %vm704_vm5, %v4449_v31, 0.0 }
 0xc0f   :  { %1971 = vadd.xlane.f32.xlu1 %v1970_v22 }
 0xc10   :  { %v1933_v55 = vpop.xlane.xlu2 %1932 }
 0xc11   :  { %3214 = vrcp.f32 %v1933_v55 }
 0xc17   :  { %v3215_v33 = vpop.eup %3214 }
 0xc18   :  { %v1870_v49 = vpop.xlane.xlu2 %1869  ;;  %v1936_v32 = vpop.xlane.xlu0 %1935  ;;  %v1995_v58 = vmul.f32 %v3215_v33, %v4378_v5 }
 0xc19   :  { %v1894_v28 = vsub.f32 %v4383_v43, %v1870_v49  ;;  %3216 = vrcp.f32 %v1936_v32 }
 0xc1a   :  { %2182 = vrot.lane.b32.xlu0 %v4285_v21, %s3625_s30  ;;  %v2011_v35 = vpack.c.bf16 %v1995_v58, %v1995_v58 }
 0xc1b   :  { %v1921_v25 = vmul.f32 1.442695, %v1894_v28 }
 0xc1c   :  { %v2029_v51 = vunpack.c.l.b16 %v2011_v35 }
 0xc1d   :  { %3218 = vpow2.f32 %v1921_v25 }
 0xc1f   :  { %v3217_v38 = vpop.eup %3216 }
 0xc20   :  { %v1996_v8 = vmul.f32 %v3217_v38, %v4385_v34  ;;  %v1939_v63 = vpop.xlane.xlu1 %1938  ;;  %v1879_v0 = vpop.xlane.xlu0 %1878 }
 0xc21   :  { %v1897_v44 = vsub.f32 %v4392_v15, %v1879_v0  ;;  %3220 = vrcp.f32 %v1939_v63 }
 0xc22   :  { %v2012_v29 = vpack.c.bf16 %v1996_v8, %v1996_v8 }
 0xc23   :  { %v4461_v17 = vpop.eup %3218  ;;  %v1927_v43 = vmul.f32 1.442695, %v1897_v44 }
 0xc24   :  { %v2030_v41 = vunpack.c.l.b16 %v2012_v29  ;;  %v1964_v21 = vsel %vm704_vm5, %v4461_v17, 0.0 }
 0xc25   :  { %3222 = vpow2.f32 %v1927_v43  ;;  %1965 = vadd.xlane.f32.xlu1 %v1964_v21 }
 0xc26   :  { %v2031_v5 = vpack.c.b16 %v2030_v41, %v2029_v51 }
 0xc27   :  { %v3221_v34 = vpop.eup %3220 }
 0xc28   :  { %v1942_v48 = vpop.xlane.xlu2 %1941  ;;  %2969 = vmatmul.msk.bf16.vlgmr.msrb.gmra.mxu2 %vm704_vm5, %v2031_v5  ;;  %v1997_v15 = vmul.f32 %v3221_v34, %v4395_v20  ;;  %v1882_v59 = vpop.xlane.xlu1 %1881 }
 0xc29   :  { %3224 = vrcp.f32 %v1942_v48  ;;  %v1898_v40 = vsub.f32 %v4402_v4, %v1882_v59 }
 0xc2a   :  { %v2013_v53 = vpack.c.bf16 %v1997_v15, %v1997_v15 }
 0xc2b   :  { %v4466_v46 = vpop.eup %3222  ;;  %v1929_v19 = vmul.f32 1.442695, %v1898_v40 }
 0xc2c   :  { %v1973_v13 = vsel %vm704_vm5, %v4466_v46, 0.0  ;;  %v2054_v9 = vunpack.c.l.b16 %v2013_v53 }
 0xc2d   :  { %1974 = vadd.xlane.f32.xlu2 %v1973_v13  ;;  %3226 = vpow2.f32 %v1929_v19 }
 0xc2f   :  { %v3225_v23 = vpop.eup %3224 }
 0xc30   :  { %v1998_v47 = vmul.f32 %v3225_v23, %v4404_v27 }
 0xc32   :  { %v2014_v39 = vpack.c.bf16 %v1998_v47, %v1998_v47 }
 0xc33   :  { %v4476_v20 = vpop.eup %3226 }
 0xc34   :  { %v2055_v7 = vunpack.c.l.b16 %v2014_v39  ;;  %v1976_v27 = vsel %vm704_vm5, %v4476_v20, 0.0 }
 0xc36   :  { %v2056_v62 = vpack.c.b16 %v2055_v7, %v2054_v9 }
 0xc38   :  { %2970 = vmatmul.msk.bf16.vlgmr.msrb.gmra.mxu3 %vm704_vm5, %v2056_v62 }
 0xc3e   :  { %2207 = vrot.lane.b32.xlu1 %v4297_v54, %s3625_s30 }
 0xc40   :  { %v1945_v10 = vpop.xlane.xlu1 %1944 }
 0xc41   :  { %3228 = vrcp.f32 %v1945_v10 }
 0xc44   :  { %1977 = vadd.xlane.f32.xlu0 %v1976_v27 }
 0xc45   :  { %2157 = vrot.lane.b32.xlu2 %v4291_v24, %s3625_s30 }
 0xc47   :  { %v3229_v6 = vpop.eup %3228 }
 0xc48   :  { %v1948_v4 = vpop.xlane.xlu2 %1947  ;;  %v1957_v45 = vpop.xlane.xlu1 %1956  ;;  %v1999_v3 = vmul.f32 %v3229_v6, %v4413_v11 }
 0xc49   :  { %3230 = vrcp.f32 %v1948_v4 }
 0xc4a   :  { %3232 = vrcp.f32 %v1957_v45  ;;  %v2015_v54 = vpack.c.bf16 %v1999_v3, %v1999_v3 }
 0xc4c   :  { %v2079_v22 = vunpack.c.l.b16 %v2015_v54 }
 0xc4f   :  { %v3231_v14 = vpop.eup %3230 }
 0xc50   :  { %v2000_v61 = vmul.f32 %v3231_v14, %v4420_v52  ;;  %v1960_v50 = vpop.xlane.xlu2 %1959  ;;  %v3233_v18 = vpop.eup %3232 }
 0xc51   :  { %3234 = vrcp.f32 %v1960_v50  ;;  %v2003_v49 = vmul.f32 %v3233_v18, %v4418_v26 }
 0xc52   :  { %v2016_v12 = vpack.c.bf16 %v2000_v61, %v2000_v61 }
 0xc53   :  { %v2019_v33 = vpack.c.bf16 %v2003_v49, %v2003_v49 }
 0xc54   :  { %v2080_v55 = vunpack.c.l.b16 %v2016_v12 }
 0xc55   :  { %v2129_v25 = vunpack.c.l.b16 %v2019_v33 }
 0xc56   :  { %v2081_v24 = vpack.c.b16 %v2080_v55, %v2079_v22 }
 0xc57   :  { %v3235_v32 = vpop.eup %3234 }
 0xc58   :  { %v2004_v28 = vmul.f32 %v3235_v32, %v4426_v36  ;;  %2971 = vmatmul.msk.bf16.vlgmr.msrb.gmra.mxu0 %vm704_vm5, %v2081_v24 }
 0xc5a   :  { %v2020_v11 = vpack.c.bf16 %v2004_v28, %v2004_v28 }
 0xc5c   :  { %v2130_v58 = vunpack.c.l.b16 %v2020_v11 }
 0xc5e   :  { %v2131_v38 = vpack.c.b16 %v2130_v58, %v2129_v25 }
 0xc60   :  { %2973 = vmatmul.msk.bf16.vlgmr.msra.gmra.mxu2 %vm704_vm5, %v2131_v38 }
 0xc6f   :  { %v1963_v52 = vpop.xlane.xlu2 %1962 }
 0xc79   :  { %v1969_v8 = vpop.xlane.xlu0 %1968 }
 0xc7a   :  { %v1951_v35 = vpop.xlane.xlu1 %1950 }
 0xc7b   :  { %3236 = vrcp.f32 %v1951_v35 }
 0xc7c   :  { %3238 = vrcp.f32 %v1969_v8 }
 0xc81   :  { %v1954_v63 = vpop.xlane.xlu2 %1953  ;;  %v3237_v26 = vpop.eup %3236 }
 0xc82   :  { %3240 = vrcp.f32 %v1954_v63  ;;  %v1972_v0 = vpop.xlane.xlu1 %1971  ;;  %v3239_v44 = vpop.eup %3238  ;;  %v2001_v36 = vmul.f32 %v3237_v26, %v4441_v16 }
 0xc83   :  { %3242 = vrcp.f32 %v1972_v0  ;;  %v2007_v29 = vmul.f32 %v3239_v44, %v4439_v1 }
 0xc84   :  { %v2017_v41 = vpack.c.bf16 %v2001_v36, %v2001_v36  ;;  %3244 = vrcp.f32 %v1963_v52 }
 0xc85   :  { %v2023_v5 = vpack.c.bf16 %v2007_v29, %v2007_v29 }
 0xc86   :  { %v2104_v23 = vunpack.c.l.b16 %v2017_v41 }
 0xc87   :  { %v2179_v53 = vunpack.c.l.b16 %v2023_v5 }
 0xc88   :  { %v3241_v43 = vpop.eup %3240 }
 0xc89   :  { %v3243_v51 = vpop.eup %3242  ;;  %v2002_v21 = vmul.f32 %v3241_v43, %v4447_v30 }
 0xc8a   :  { %v2008_v48 = vmul.f32 %v3243_v51, %v4449_v31  ;;  %v3245_v30 = vpop.eup %3244 }
 0xc8b   :  { %v2018_v34 = vpack.c.bf16 %v2002_v21, %v2002_v21  ;;  %v2005_v31 = vmul.f32 %v3245_v30, %v4431_v2 }
 0xc8c   :  { %v2024_v15 = vpack.c.bf16 %v2008_v48, %v2008_v48  ;;  %v2183_v13 = vpop.permute.xlu0 %2182 }
 0xc8d   :  { %v2105_v59 = vunpack.c.l.b16 %v2018_v34  ;;  %2195 = vmatpush.bf16.msra.mxu0 %v2183_v13  ;;  %v2021_v62 = vpack.c.bf16 %v2005_v31, %v2005_v31 }
 0xc8e   :  { %v2180_v47 = vunpack.c.l.b16 %v2024_v15 }
 0xc8f   :  { %v2106_v40 = vpack.c.b16 %v2105_v59, %v2104_v23  ;;  %v2154_v27 = vunpack.c.l.b16 %v2021_v62 }
 0xc90   :  { %v2181_v16 = vpack.c.b16 %v2180_v47, %v2179_v53 }
 0xc91   :  { %2972 = vmatmul.msk.bf16.vlgmr.msrb.gmra.mxu1 %vm704_vm5, %v2106_v40 }
 0xc92   :  { %2975 = vmatmul.msk.bf16.vlgmr.msra.gmra.mxu0 %vm704_vm5, %v2181_v16 }
 0xc98   :  { %v1966_v1 = vpop.xlane.xlu1 %1965 }
 0xc99   :  { %3246 = vrcp.f32 %v1966_v1 }
 0xc9f   :  { %v3247_v39 = vpop.eup %3246 }
 0xca0   :  { %v2006_v9 = vmul.f32 %v3247_v39, %v4461_v17  ;;  %v1975_v7 = vpop.xlane.xlu2 %1974 }
 0xca1   :  { %3248 = vrcp.f32 %v1975_v7 }
 0xca2   :  { %v2022_v19 = vpack.c.bf16 %v2006_v9, %v2006_v9 }
 0xca4   :  { %v2155_v10 = vunpack.c.l.b16 %v2022_v19 }
 0xca6   :  { %v2156_v45 = vpack.c.b16 %v2155_v10, %v2154_v27  ;;  %v3044_v27 = vld [vmem:[%s4699_s7 + $0x18] sm:$0xff] }
 0xca7   :  { %v3249_v18 = vpop.eup %3248  ;;  %2341 = vmatpush.bf16.msrb.mxu2 %v3044_v27 }
 0xca8   :  { %v2158_v4 = vpop.permute.xlu2 %2157  ;;  %v2009_v22 = vmul.f32 %v3249_v18, %v4466_v46 }
 0xca9   :  { %2170 = vmatpush.bf16.msra.mxu3 %v2158_v4  ;;  %v3043_v4 = vld [vmem:[%s4699_s7 + $0x10] sm:$0xff] }
 0xcaa   :  { %v2025_v49 = vpack.c.bf16 %v2009_v22, %v2009_v22 }
 0xcab   :  { %v2047_v6 = vpop.f32.mrf.mxu2  ;;  %2342 = vmatpush.bf16.msrb.mxu2 %v3043_v4 }
 0xcac   :  { %2974 = vmatmul.msk.bf16.vlgmr.msra.gmra.mxu3 %vm704_vm5, %v2156_v45  ;;  %v2227_v14 = vpack.c.bf16 %v2047_v6, %v2047_v6  ;;  %v2204_v33 = vunpack.c.l.b16 %v2025_v49 }
 0xcae   :  { %v4497_v2 = vunpack.c.l.b16 %v2227_v14 }
 0xcb0   :  { %v2208_v3 = vpop.permute.xlu1 %2207 }
 0xcb1   :  { %2220 = vmatpush.bf16.msra.mxu1 %v2208_v3 }
 0xcb3   :  { %v2049_v54 = vpop.f32.mrf.mxu2 }
 0xcb4   :  { %v2228_v61 = vpack.c.bf16 %v2049_v54, %v2049_v54 }
 0xcb6   :  { %v4499_v17 = vunpack.c.l.b16 %v2228_v61 }
 0xcb7   :  { %v1978_v50 = vpop.xlane.xlu0 %1977 }
 0xcb8   :  { %v2251_v12 = vpack.c.b16 %v4499_v17, %v4497_v2  ;;  %3250 = vrcp.f32 %v1978_v50 }
 0xcbb   :  { %v2072_v16 = vpop.f32.mrf.mxu3 }
 0xcbe   :  { %v3251_v55 = vpop.eup %3250 }
 0xcbf   :  { %v2010_v24 = vmul.f32 %v3251_v55, %v4476_v20 }
 0xcc1   :  { %v2026_v32 = vpack.c.bf16 %v2010_v24, %v2010_v24 }
 0xcc3   :  { %v2205_v28 = vunpack.c.l.b16 %v2026_v32  ;;  %v2074_v1 = vpop.f32.mrf.mxu3 }
 0xcc4   :  { %v2230_v32 = vpack.c.bf16 %v2074_v1, %v2074_v1 }
 0xcc5   :  { %v2206_v11 = vpack.c.b16 %v2205_v28, %v2204_v33  ;;  %v2229_v33 = vpack.c.bf16 %v2072_v16, %v2072_v16 }
 0xcc6   :  { %v2250_v28 = vunpack.c.l.b16 %v2230_v32 }
 0xcc7   :  { %2976 = vmatmul.msk.bf16.vlgmr.msra.gmra.mxu1 %vm704_vm5, %v2206_v11  ;;  %v2249_v11 = vunpack.c.l.b16 %v2229_v33 }
 0xcd5   :  { %v2097_v25 = vpop.f32.mrf.mxu0 }
 0xcd6   :  { %v2231_v58 = vpack.c.bf16 %v2097_v25, %v2097_v25 }
 0xcd8   :  { %v2257_v35 = vunpack.c.l.b16 %v2231_v58  ;;  %v2252_v58 = vpack.c.b16 %v2250_v28, %v2249_v11 }
 0xcdd   :  { %v2099_v38 = vpop.f32.mrf.mxu0 }
 0xcde   :  { %v2232_v52 = vpack.c.bf16 %v2099_v38, %v2099_v38 }
 0xce0   :  { %v2258_v8 = vunpack.c.l.b16 %v2232_v52 }
 0xce2   :  { %v2261_v63 = vpack.c.b16 %v2258_v8, %v2257_v35 }
 0xce3   :  { %v2147_v26 = vpop.f32.mrf.mxu2 }
 0xce4   :  { %2263 = vrot.lane.b32.xlu2 %v2261_v63, %s3624_s8  ;;  %v2235_v46 = vpack.c.bf16 %v2147_v26, %v2147_v26 }
 0xce6   :  { %v2271_v20 = vunpack.c.l.b16 %v2235_v46 }
 0xceb   :  { %v2149_v0 = vpop.f32.mrf.mxu2 }
 0xcec   :  { %v2236_v44 = vpack.c.bf16 %v2149_v0, %v2149_v0 }
 0xcee   :  { %v2272_v36 = vunpack.c.l.b16 %v2236_v44 }
 0xcf0   :  { %v2275_v29 = vpack.c.b16 %v2272_v36, %v2271_v20 }
 0xcf2   :  { %2277 = vrot.lane.b32.xlu1 %v2275_v29, %s3606_s4 }
 0xd0e   :  { %v2122_v43 = vpop.f32.mrf.mxu1 }
 0xd0f   :  { %v2197_v51 = vpop.f32.mrf.mxu0  ;;  %v2233_v41 = vpack.c.bf16 %v2122_v43, %v2122_v43 }
 0xd10   :  { %v2239_v21 = vpack.c.bf16 %v2197_v51, %v2197_v51 }
 0xd11   :  { %v2259_v13 = vunpack.c.l.b16 %v2233_v41 }
 0xd12   :  { %v2285_v59 = vunpack.c.l.b16 %v2239_v21 }
 0xd16   :  { %v2124_v5 = vpop.f32.mrf.mxu1 }
 0xd17   :  { %v2234_v48 = vpack.c.bf16 %v2124_v5, %v2124_v5  ;;  %v2199_v34 = vpop.f32.mrf.mxu0 }
 0xd18   :  { %v2240_v15 = vpack.c.bf16 %v2199_v34, %v2199_v34 }
 0xd19   :  { %v2260_v23 = vunpack.c.l.b16 %v2234_v48 }
 0xd1a   :  { %v2286_v53 = vunpack.c.l.b16 %v2240_v15 }
 0xd1b   :  { %v2262_v47 = vpack.c.b16 %v2260_v23, %v2259_v13 }
 0xd1c   :  { %v2289_v40 = vpack.c.b16 %v2286_v53, %v2285_v59 }
 0xd1d   :  { %2265 = vrot.lane.b32.xlu1 %v2262_v47, %s3624_s8 }
 0xd1e   :  { %2291 = vrot.lane.b32.xlu2 %v2289_v40, %s3626_s1 }
 0xd2f   :  { %v2172_v30 = vpop.f32.mrf.mxu3 }
 0xd30   :  { %v2237_v39 = vpack.c.bf16 %v2172_v30, %v2172_v30 }
 0xd32   :  { %v2273_v7 = vunpack.c.l.b16 %v2237_v39 }
 0xd37   :  { %v2174_v31 = vpop.f32.mrf.mxu3 }
 0xd38   :  { %v2238_v9 = vpack.c.bf16 %v2174_v31, %v2174_v31 }
 0xd3a   :  { %v2274_v19 = vunpack.c.l.b16 %v2238_v9 }
 0xd3c   :  { %v2276_v62 = vpack.c.b16 %v2274_v19, %v2273_v7 }
 0xd3e   :  { %2279 = vrot.lane.b32.xlu0 %v2276_v62, %s3606_s4  ;;  %v2264_v50 = vpop.permute.xlu2 %2263 }
 0xd3f   :  { %v2297_v22 = vsel %vm329_vm3, %v2251_v12, %v2264_v50  ;;  %v3091_v12 = vld [vmem:[#allocation8 + $0x1] ss:$0 sm:$0xff] }
 0xd44   :  { %v2222_v10 = vpop.f32.mrf.mxu1 }
 0xd45   :  { %v2241_v45 = vpack.c.bf16 %v2222_v10, %v2222_v10  ;;  %v3046_v10 = vld [vmem:[%s4705_s13 + $0x18] sm:$0xff] }
 0xd46   :  { %2500 = vmatpush.bf16.msrb.mxu3 %v3046_v10  ;;  %v3094_v10 = vld [vmem:[#allocation16 + $0x1] ss:$0 sm:$0xff] }
 0xd47   :  { %v2287_v14 = vunpack.c.l.b16 %v2241_v45 }
 0xd4c   :  { %v2224_v6 = vpop.f32.mrf.mxu1 }
 0xd4d   :  { %v2242_v3 = vpack.c.bf16 %v2224_v6, %v2224_v6  ;;  %v3045_v6 = vld [vmem:[%s4705_s13 + $0x10] sm:$0xff] }
 0xd4e   :  { %2501 = vmatpush.bf16.msrb.mxu3 %v3045_v6 }
 0xd4f   :  { %v2288_v54 = vunpack.c.l.b16 %v2242_v3 }
 0xd51   :  { %v2290_v61 = vpack.c.b16 %v2288_v54, %v2287_v14 }
 0xd53   :  { %2293 = vrot.lane.b32.xlu2 %v2290_v61, %s3626_s1 }
 0xd64   :  { %v2278_v18 = vpop.permute.xlu1 %2277 }
 0xd65   :  { %v2302_v55 = vsel %vm704_vm5, %v2297_v22, %v2278_v18 }
 0xd78   :  { %v2292_v49 = vpop.permute.xlu2 %2291 }
 0xd79   :  { %v2306_v24 = vsel %vm1175_vm6, %v2302_v55, %v2292_v49 }
 0xd7a   :  { %2989 = vmatmul.msk.bf16.vlgmr.msrb.gmra.mxu2 %vm339_vm7, %v2306_v24 }
 0xd8f   :  { %v2266_v25 = vpop.permute.xlu1 %2265 }
 0xd90   :  { %v2300_v38 = vsel %vm329_vm3, %v2252_v58, %v2266_v25  ;;  %v3092_v58 = vld [vmem:[#allocation10 + $0x1] ss:$0 sm:$0xff] }
 0xdad   :  { %v2294_v35 = vpop.permute.xlu2 %2293 }
 0xdb0   :  { %v2280_v52 = vpop.permute.xlu0 %2279 }
 0xdb1   :  { %v2304_v2 = vsel %vm704_vm5, %v2300_v38, %v2280_v52 }
 0xdb2   :  { %v2308_v17 = vsel %vm1175_vm6, %v2304_v2, %v2294_v35  ;;  %v3093_v2 = vld [vmem:[#allocation11 + $0x1] ss:$0 sm:$0xff] }
 0xdb3   :  { %2990 = vmatmul.msk.bf16.gmra.mxu2 %vm339_vm7, %v2308_v17 }
 0xdfd   :  { %v2344_v8 = vpop.f32.mrf.mxu2 }
 0xdfe   :  { %v2345_v63 = vadd.f32 %v3091_v12, %v2344_v8 }
 0xe00   :  { %v2354_v26 = vadd.f32 %v2345_v63, %v4251_v37 }
 0xe02   :  { %v2362_v46 = vsel %vm339_vm7, %v2354_v26, 0.0 }
 0xe03   :  { %2363 = vadd.xlane.f32.xlu1 %v2362_v46 }
 0xe05   :  { %v2346_v0 = vpop.f32.mrf.mxu2 }
 0xe06   :  { %v2347_v44 = vadd.f32 %v3091_v12, %v2346_v0 }
 0xe08   :  { %v2355_v20 = vadd.f32 %v2347_v44, %v4253_v56 }
 0xe0a   :  { %v2365_v36 = vsel %vm339_vm7, %v2355_v20, 0.0 }
 0xe0b   :  { %2366 = vadd.xlane.f32.xlu2 %v2365_v36 }
 0xe36   :  { %v2349_v29 = vpop.f32.mrf.mxu2 }
 0xe37   :  { %v2350_v43 = vadd.f32 %v3091_v12, %v2349_v29 }
 0xe39   :  { %v2356_v51 = vadd.f32 %v2350_v43, %v4262_v42 }
 0xe3b   :  { %v2368_v41 = vsel %vm339_vm7, %v2356_v51, 0.0 }
 0xe3c   :  { %2369 = vadd.xlane.f32.xlu0 %v2368_v41 }
 0xe3e   :  { %v2351_v21 = vpop.f32.mrf.mxu2 }
 0xe3f   :  { %v2352_v5 = vadd.f32 %v3091_v12, %v2351_v21 }
 0xe41   :  { %v2357_v37 = vadd.f32 %v2352_v5, %v4264_v60 }
 0xe43   :  { %v2371_v48 = vsel %vm339_vm7, %v2357_v37, 0.0 }
 0xe44   :  { %2372 = vadd.xlane.f32.xlu1 %v2371_v48 }
 0xe76   :  { %v2364_v34 = vpop.xlane.xlu1 %2363 }
 0xe77   :  { %v2374_v56 = vmul.f32 %v2364_v34, %v3860_v57 }
 0xe79   :  { %v2378_v15 = vsub.f32 %v2354_v26, %v2374_v56 }
 0xe7b   :  { %v2382_v13 = vmul.f32 %v2378_v15, %v2378_v15 }
 0xe7d   :  { %v2386_v23 = vsel %vm339_vm7, %v2382_v13, 0.0 }
 0xe7e   :  { %2387 = vadd.xlane.f32.xlu2 %v2386_v23  ;;  %v2367_v59 = vpop.xlane.xlu2 %2366 }
 0xe7f   :  { %v2375_v42 = vmul.f32 %v2367_v59, %v3860_v57 }
 0xe81   :  { %v2379_v53 = vsub.f32 %v2355_v20, %v2375_v42 }
 0xe83   :  { %v2383_v47 = vmul.f32 %v2379_v53, %v2379_v53 }
 0xe85   :  { %v2389_v40 = vsel %vm339_vm7, %v2383_v47, 0.0 }
 0xe86   :  { %2390 = vadd.xlane.f32.xlu1 %v2389_v40 }
 0xeaf   :  { %v2370_v60 = vpop.xlane.xlu0 %2369 }
 0xeb0   :  { %v2376_v16 = vmul.f32 %v2370_v60, %v3860_v57 }
 0xeb2   :  { %v4542_v1 = vsub.f32 %v2356_v51, %v2376_v16 }
 0xeb4   :  { %v2384_v30 = vmul.f32 %v4542_v1, %v4542_v1 }
 0xeb6   :  { %v2392_v39 = vsel %vm339_vm7, %v2384_v30, 0.0 }
 0xeb7   :  { %v2373_v31 = vpop.xlane.xlu1 %2372  ;;  %2393 = vadd.xlane.f32.xlu2 %v2392_v39 }
 0xeb8   :  { %v2377_v9 = vmul.f32 %v2373_v31, %v3860_v57 }
 0xeba   :  { %v4548_v7 = vsub.f32 %v2357_v37, %v2377_v9  ;;  %v3050_v9 = vld [vmem:[%s4707_s15 + $0x38] sm:$0xff] }
 0xebb   :  { %2567 = vmatpush.bf16.msrb.mxu0 %v3050_v9 }
 0xebc   :  { %v2385_v19 = vmul.f32 %v4548_v7, %v4548_v7 }
 0xebe   :  { %v2395_v62 = vsel %vm339_vm7, %v2385_v19, 0.0  ;;  %v3047_v19 = vld [vmem:[%s4707_s15 + $0x20] sm:$0xff] }
 0xebf   :  { %2396 = vadd.xlane.f32.xlu0 %v2395_v62 }
 0xef1   :  { %v2388_v27 = vpop.xlane.xlu2 %2387 }
 0xef2   :  { %v2398_v4 = vmul.f32 %v2388_v27, %v3860_v57 }
 0xef4   :  { %v2402_v45 = vadd.f32 1e-05, %v2398_v4 }
 0xef6   :  { %3252 = vrsqrt.f32 %v2402_v45  ;;  %vm2412_vm5 = vweird.f32 %v2402_v45 }
 0xef9   :  { %v2391_v3 = vpop.xlane.xlu1 %2390 }
 0xefa   :  { %v2399_v14 = vmul.f32 %v2391_v3, %v3860_v57 }
 0xefc   :  { %v3253_v54 = vpop.eup %3252  ;;  %v2403_v61 = vadd.f32 1e-05, %v2399_v14 }
 0xefd   :  { %v2407_v50 = vmul.f32 %v3253_v54, %v2402_v45  ;;  %vm2413_vm3 = vweird.f32 %v3253_v54 }
 0xefe   :  { %3254 = vrsqrt.f32 %v2403_v61  ;;  %vm2414_vm6 = vmor %vm2412_vm5, %vm2413_vm3  ;;  %vm2422_vm11 = vweird.f32 %v2403_v61 }
 0xeff   :  { %v2408_v18 = vmul.f32 %v3253_v54, %v2407_v50 }
 0xf01   :  { %v2409_v22 = vmul.f32 0.5, %v2408_v18 }
 0xf03   :  { %v2410_v55 = vsub.f32 1.5, %v2409_v22 }
 0xf04   :  { %v3255_v49 = vpop.eup %3254 }
 0xf05   :  { %v2411_v24 = vmul.f32 %v3253_v54, %v2410_v55  ;;  %v2417_v32 = vmul.f32 %v3255_v49, %v2403_v61  ;;  %vm2423_vm10 = vweird.f32 %v3255_v49 }
 0xf06   :  { %vm2424_vm12 = vmor %vm2422_vm11, %vm2423_vm10 }
 0xf07   :  { %v2418_v33 = vmul.f32 %v3255_v49, %v2417_v32  ;;  %v2415_v28 = vsel %vm2414_vm6, %v3253_v54, %v2411_v24  ;;  %v3095_v24 = vld [vmem:[#allocation17 + $0x1] ss:$0 sm:$0xff] }
 0xf08   :  { %v2446_v38 = vmul.f32 %v2415_v28, %v2378_v15 }
 0xf09   :  { %v2419_v11 = vmul.f32 0.5, %v2418_v33 }
 0xf0a   :  { %v2453_v17 = vmul.f32 %v3092_v58, %v2446_v38 }
 0xf0b   :  { %v2420_v25 = vsub.f32 1.5, %v2419_v11 }
 0xf0c   :  { %v4561_v63 = vadd.f32 %v3093_v2, %v2453_v17 }
 0xf0d   :  { %v2421_v52 = vmul.f32 %v3255_v49, %v2420_v25 }
 0xf0f   :  { %v2425_v35 = vsel %vm2424_vm12, %v3255_v49, %v2421_v52 }
 0xf10   :  { %v2447_v12 = vmul.f32 %v2425_v35, %v2379_v53 }
 0xf12   :  { %v2454_v8 = vmul.f32 %v3092_v58, %v2447_v12 }
 0xf14   :  { %v4563_v26 = vadd.f32 %v3093_v2, %v2454_v8 }
 0xf16   :  { %v2464_v46 = vpack.c.bf16 %v4563_v26, %v4561_v63 }
 0xf18   :  { %3003 = vmatmul.msk.bf16.vlgmr.msrb.gmra.mxu3 %vm339_vm7, %v2464_v46 }
 0xf2a   :  { %v2394_v0 = vpop.xlane.xlu2 %2393 }
 0xf2b   :  { %v2400_v44 = vmul.f32 %v2394_v0, %v3860_v57 }
 0xf2d   :  { %v2404_v20 = vadd.f32 1e-05, %v2400_v44 }
 0xf2f   :  { %3256 = vrsqrt.f32 %v2404_v20  ;;  %vm2432_vm14 = vweird.f32 %v2404_v20 }
 0xf32   :  { %v2397_v36 = vpop.xlane.xlu0 %2396 }
 0xf33   :  { %v2401_v29 = vmul.f32 %v2397_v36, %v3860_v57 }
 0xf35   :  { %v3257_v43 = vpop.eup %3256  ;;  %v2405_v51 = vadd.f32 1e-05, %v2401_v29 }
 0xf36   :  { %v2427_v41 = vmul.f32 %v3257_v43, %v2404_v20  ;;  %vm2433_vm13 = vweird.f32 %v3257_v43 }
 0xf37   :  { %3258 = vrsqrt.f32 %v2405_v51  ;;  %vm2434_vm15 = vmor %vm2432_vm14, %vm2433_vm13  ;;  %vm2442_vm1 = vweird.f32 %v2405_v51 }
 0xf38   :  { %v2428_v21 = vmul.f32 %v3257_v43, %v2427_v41 }
 0xf3a   :  { %v2429_v5 = vmul.f32 0.5, %v2428_v21 }
 0xf3c   :  { %v2430_v37 = vsub.f32 1.5, %v2429_v5 }
 0xf3d   :  { %v3259_v48 = vpop.eup %3258 }
 0xf3e   :  { %v2431_v34 = vmul.f32 %v3257_v43, %v2430_v37  ;;  %v2437_v56 = vmul.f32 %v3259_v48, %v2405_v51  ;;  %vm2443_vm0 = vweird.f32 %v3259_v48 }
 0xf3f   :  { %vm2444_vm2 = vmor %vm2442_vm1, %vm2443_vm0 }
 0xf40   :  { %v2438_v15 = vmul.f32 %v3259_v48, %v2437_v56  ;;  %v2435_v13 = vsel %vm2434_vm15, %v3257_v43, %v2431_v34 }
 0xf41   :  { %v2448_v42 = vmul.f32 %v2435_v13, %v4542_v1  ;;  %v3049_v1 = vld [vmem:[%s4707_s15 + $0x30] sm:$0xff] }
 0xf42   :  { %v2439_v23 = vmul.f32 0.5, %v2438_v15  ;;  %2568 = vmatpush.bf16.msrb.mxu0 %v3049_v1 }
 0xf43   :  { %v2455_v60 = vmul.f32 %v3092_v58, %v2448_v42 }
 0xf44   :  { %v2440_v59 = vsub.f32 1.5, %v2439_v23 }
 0xf45   :  { %v2462_v30 = vadd.f32 %v3093_v2, %v2455_v60 }
 0xf46   :  { %v2441_v53 = vmul.f32 %v3259_v48, %v2440_v59 }
 0xf48   :  { %v2445_v47 = vsel %vm2444_vm2, %v3259_v48, %v2441_v53 }
 0xf49   :  { %v2449_v40 = vmul.f32 %v2445_v47, %v4548_v7  ;;  %v3048_v7 = vld [vmem:[%s4707_s15 + $0x28] sm:$0xff]  ;;  %s3627_s15 = smov [#allocation22]  }
 0xf4a   :  { %2569 = vmatpush.bf16.msrb.mxu0 %v3048_v7  ;;  %v3096_v7 = vld [vmem:[#allocation13 + $0x1] ss:$0 sm:$0xff]  ;;  %s2862_s9 = sshll.u32 %s3627_s15, 4  ;;  %s2863_s9 = int_to_ptr.vmem [resolvable:$true] %s2862_s9 }
 0xf4b   :  { %v2456_v16 = vmul.f32 %v3092_v58, %v2449_v40 }
 0xf4d   :  { %v2463_v39 = vadd.f32 %v3093_v2, %v2456_v16 }
 0xf4e   :  { %2570 = vmatpush.bf16.msrb.mxu0 %v3047_v19 }
 0xf4f   :  { %v2465_v31 = vpack.c.bf16 %v2463_v39, %v2462_v30 }
 0xf51   :  { %3004 = vmatmul.msk.bf16.gmra.mxu3 %vm339_vm7, %v2465_v31 }
 0xf9b   :  { %v2503_v62 = vpop.f32.mrf.mxu3 }
 0xf9c   :  { %v2504_v27 = vadd.f32 %v3094_v10, %v2503_v62 }
 0xf9e   :  { %v2513_v6 = vmax.f32 %v2504_v27, 0.0 }
 0xfa3   :  { %v2505_v4 = vpop.f32.mrf.mxu3 }
 0xfa4   :  { %v2506_v45 = vadd.f32 %v3094_v10, %v2505_v4 }
 0xfa6   :  { %v2514_v3 = vmax.f32 %v2506_v45, 0.0 }
 0xfa8   :  { %v2517_v14 = vpack.c.bf16 %v2514_v3, %v2513_v6 }
 0xfaa   :  { %3029 = vmatmul.msk.bf16.vlgmr.msrb.gmra.mxu0 %vm1420_vm8, %v2517_v14 }
 0xfd4   :  { %v2508_v54 = vpop.f32.mrf.mxu3 }
 0xfd5   :  { %v2509_v61 = vadd.f32 %v3094_v10, %v2508_v54 }
 0xfd7   :  { %v2515_v22 = vmax.f32 %v2509_v61, 0.0 }
 0xfdc   :  { %v2510_v50 = vpop.f32.mrf.mxu3 }
 0xfdd   :  { %v2511_v18 = vadd.f32 %v3094_v10, %v2510_v50  ;;  %v3097_v10 = vld [vmem:[#allocation14 + $0x1] ss:$0 sm:$0xff] }
 0xfdf   :  { %v2516_v55 = vmax.f32 %v2511_v18, 0.0 }
 0xfe1   :  { %v2518_v49 = vpack.c.bf16 %v2516_v55, %v2515_v22 }
 0xfe3   :  { %3030 = vmatmul.msk.bf16.gmra.mxu0 %vm1420_vm8, %v2518_v49 }
0x1027   :  { %v2572_v32 = vpop.f32.mrf.mxu0 }
0x1028   :  { %v2573_v33 = vadd.f32 %v3095_v24, %v2572_v32 }
0x102a   :  { %v2582_v28 = vadd.f32 %v2573_v33, %v4561_v63 }
0x102c   :  { %v2590_v11 = vsel %vm339_vm7, %v2582_v28, 0.0 }
0x102d   :  { %2591 = vadd.xlane.f32.xlu2 %v2590_v11 }
0x102f   :  { %v2574_v25 = vpop.f32.mrf.mxu0 }
0x1030   :  { %v2575_v35 = vadd.f32 %v3095_v24, %v2574_v25 }
0x1032   :  { %v2583_v12 = vadd.f32 %v2575_v35, %v4563_v26 }
0x1034   :  { %v2593_v63 = vsel %vm339_vm7, %v2583_v12, 0.0 }
0x1060   :  { %v2577_v58 = vpop.f32.mrf.mxu0 }
0x1061   :  { %v2578_v38 = vadd.f32 %v3095_v24, %v2577_v58 }
0x1063   :  { %v2584_v52 = vadd.f32 %v2578_v38, %v2462_v30 }
0x1065   :  { %v2596_v2 = vsel %vm339_vm7, %v2584_v52, 0.0 }
0x1066   :  { %2597 = vadd.xlane.f32.xlu1 %v2596_v2 }
0x1068   :  { %v2579_v17 = vpop.f32.mrf.mxu0 }
0x1069   :  { %v2580_v8 = vadd.f32 %v3095_v24, %v2579_v17 }
0x106b   :  { %v2585_v46 = vadd.f32 %v2580_v8, %v2463_v39 }
0x106d   :  { %v2599_v0 = vsel %vm339_vm7, %v2585_v46, 0.0 }
0x106e   :  { %2600 = vadd.xlane.f32.xlu0 %v2599_v0  ;;  %2594 = vadd.xlane.f32.xlu1 %v2593_v63 }
0x10a0   :  { %v2592_v44 = vpop.xlane.xlu2 %2591 }
0x10a1   :  { %v2602_v20 = vmul.f32 %v2592_v44, %v3860_v57 }
0x10a3   :  { %v2606_v36 = vsub.f32 %v2582_v28, %v2602_v20 }
0x10a5   :  { %v2610_v29 = vmul.f32 %v2606_v36, %v2606_v36 }
0x10a7   :  { %v2614_v43 = vsel %vm339_vm7, %v2610_v29, 0.0 }
0x10a8   :  { %2615 = vadd.xlane.f32.xlu0 %v2614_v43 }
0x10d9   :  { %v2598_v51 = vpop.xlane.xlu1 %2597 }
0x10da   :  { %v2604_v41 = vmul.f32 %v2598_v51, %v3860_v57 }
0x10dc   :  { %v4596_v26 = vsub.f32 %v2584_v52, %v2604_v41 }
0x10de   :  { %v2612_v21 = vmul.f32 %v4596_v26, %v4596_v26 }
0x10e0   :  { %v2620_v5 = vsel %vm339_vm7, %v2612_v21, 0.0 }
0x10e1   :  { %v2601_v37 = vpop.xlane.xlu0 %2600  ;;  %2621 = vadd.xlane.f32.xlu2 %v2620_v5  ;;  %v2595_v48 = vpop.xlane.xlu1 %2594 }
0x10e2   :  { %v2605_v34 = vmul.f32 %v2601_v37, %v3860_v57  ;;  %v2603_v56 = vmul.f32 %v2595_v48, %v3860_v57 }
0x10e4   :  { %v4603_v15 = vsub.f32 %v2585_v46, %v2605_v34  ;;  %v4605_v13 = vsub.f32 %v2583_v12, %v2603_v56 }
0x10e6   :  { %v2613_v23 = vmul.f32 %v4603_v15, %v4603_v15  ;;  %v2611_v59 = vmul.f32 %v4605_v13, %v4605_v13 }
0x10e8   :  { %v2623_v42 = vsel %vm339_vm7, %v2613_v23, 0.0  ;;  %v2617_v53 = vsel %vm339_vm7, %v2611_v59, 0.0 }
0x10e9   :  { %2624 = vadd.xlane.f32.xlu1 %v2623_v42  ;;  %2618 = vadd.xlane.f32.xlu2 %v2617_v53 }
0x111b   :  { %v2616_v47 = vpop.xlane.xlu0 %2615 }
0x111c   :  { %v2626_v40 = vmul.f32 %v2616_v47, %v3860_v57 }
0x111e   :  { %v2630_v60 = vadd.f32 1e-05, %v2626_v40 }
0x1120   :  { %3260 = vrsqrt.f32 %v2630_v60  ;;  %vm2640_vm4 = vweird.f32 %v2630_v60 }
0x1126   :  { %v3261_v16 = vpop.eup %3260 }
0x1127   :  { %v2635_v30 = vmul.f32 %v3261_v16, %v2630_v60  ;;  %vm2641_vm8 = vweird.f32 %v3261_v16 }
0x1128   :  { %vm2642_vm9 = vmor %vm2640_vm4, %vm2641_vm8 }
0x1129   :  { %v2636_v39 = vmul.f32 %v3261_v16, %v2635_v30 }
0x112b   :  { %v2637_v31 = vmul.f32 0.5, %v2636_v39 }
0x112d   :  { %v2638_v9 = vsub.f32 1.5, %v2637_v31 }
0x112f   :  { %v2639_v1 = vmul.f32 %v3261_v16, %v2638_v9 }
0x1131   :  { %v2643_v19 = vsel %vm2642_vm9, %v3261_v16, %v2639_v1  ;;  %vm2838_vm9 = vcmask 1040384  }
0x1132   :  { %v2674_v62 = vmul.f32 %v2643_v19, %v2606_v36 }
0x1134   :  { %v2681_v27 = vmul.f32 %v3096_v7, %v2674_v62 }
0x1136   :  { %v2688_v4 = vadd.f32 %v3097_v10, %v2681_v27 }
0x1138   :  { %v2694_v45 = vsel %vm339_vm7, %v2688_v4, 0.0 }
0x1139   :  { %2695 = vadd.xlane.f32.xlu1 %v2694_v45 }
0x1154   :  { %v2622_v6 = vpop.xlane.xlu2 %2621 }
0x1155   :  { %v2628_v3 = vmul.f32 %v2622_v6, %v3860_v57 }
0x1157   :  { %v2632_v14 = vadd.f32 1e-05, %v2628_v3 }
0x1159   :  { %3262 = vrsqrt.f32 %v2632_v14  ;;  %vm2660_vm5 = vweird.f32 %v2632_v14 }
0x115c   :  { %v2619_v54 = vpop.xlane.xlu2 %2618  ;;  %v2625_v61 = vpop.xlane.xlu1 %2624 }
0x115d   :  { %v2627_v50 = vmul.f32 %v2619_v54, %v3860_v57  ;;  %v2629_v18 = vmul.f32 %v2625_v61, %v3860_v57 }
0x115f   :  { %v3263_v22 = vpop.eup %3262  ;;  %v2631_v55 = vadd.f32 1e-05, %v2627_v50  ;;  %v2633_v49 = vadd.f32 1e-05, %v2629_v18 }
0x1160   :  { %v2655_v24 = vmul.f32 %v3263_v22, %v2632_v14  ;;  %vm2661_vm3 = vweird.f32 %v3263_v22 }
0x1161   :  { %3264 = vrsqrt.f32 %v2631_v55  ;;  %vm2662_vm6 = vmor %vm2660_vm5, %vm2661_vm3  ;;  %vm2650_vm12 = vweird.f32 %v2631_v55  ;;  %vm2670_vm14 = vweird.f32 %v2633_v49  ;;  %vm2848_vm3 = vcmask 254976  }
0x1162   :  { %v2656_v32 = vmul.f32 %v3263_v22, %v2655_v24  ;;  %3266 = vrsqrt.f32 %v2633_v49 }
0x1164   :  { %v2657_v33 = vmul.f32 0.5, %v2656_v32 }
0x1166   :  { %v2658_v28 = vsub.f32 1.5, %v2657_v33 }
0x1167   :  { %v3265_v11 = vpop.eup %3264 }
0x1168   :  { %v3267_v25 = vpop.eup %3266  ;;  %v2659_v58 = vmul.f32 %v3263_v22, %v2658_v28  ;;  %v2645_v38 = vmul.f32 %v3265_v11, %v2631_v55  ;;  %vm2651_vm10 = vweird.f32 %v3265_v11 }
0x1169   :  { %v2665_v52 = vmul.f32 %v3267_v25, %v2633_v49  ;;  %vm2671_vm11 = vweird.f32 %v3267_v25  ;;  %vm2652_vm13 = vmor %vm2650_vm12, %vm2651_vm10 }
0x116a   :  { %v2646_v35 = vmul.f32 %v3265_v11, %v2645_v38  ;;  %v2663_v2 = vsel %vm2662_vm6, %v3263_v22, %v2659_v58  ;;  %vm2672_vm15 = vmor %vm2670_vm14, %vm2671_vm11 }
0x116b   :  { %v2666_v17 = vmul.f32 %v3267_v25, %v2665_v52  ;;  %v2676_v12 = vmul.f32 %v2663_v2, %v4596_v26  ;;  %v4644_v2 = vld [vmem:[#allocation19] ss:$0 sm:$0xff] }
0x116c   :  { %v2647_v8 = vmul.f32 0.5, %v2646_v35 }
0x116d   :  { %v2667_v46 = vmul.f32 0.5, %v2666_v17  ;;  %v2683_v0 = vmul.f32 %v3096_v7, %v2676_v12 }
0x116e   :  { %v2648_v63 = vsub.f32 1.5, %v2647_v8 }
0x116f   :  { %v2668_v44 = vsub.f32 1.5, %v2667_v46  ;;  %v2690_v20 = vadd.f32 %v3097_v10, %v2683_v0  ;;  %v4646_v46 = vld [vmem:[#allocation20] ss:$0 sm:$0xff] }
0x1170   :  { %v2649_v36 = vmul.f32 %v3265_v11, %v2648_v63 }
0x1171   :  { %v2669_v29 = vmul.f32 %v3267_v25, %v2668_v44  ;;  %v2700_v43 = vsel %vm339_vm7, %v2690_v20, 0.0 }
0x1172   :  { %2701 = vadd.xlane.f32.xlu0 %v2700_v43  ;;  %v2653_v51 = vsel %vm2652_vm13, %v3265_v11, %v2649_v36 }
0x1173   :  { %v2675_v41 = vmul.f32 %v2653_v51, %v4605_v13  ;;  %v2673_v26 = vsel %vm2672_vm15, %v3267_v25, %v2669_v29 }
0x1174   :  { %v2677_v21 = vmul.f32 %v2673_v26, %v4603_v15 }
0x1175   :  { %v2682_v5 = vmul.f32 %v3096_v7, %v2675_v41 }
0x1176   :  { %v2684_v37 = vmul.f32 %v3096_v7, %v2677_v21 }
0x1177   :  { %v2689_v48 = vadd.f32 %v3097_v10, %v2682_v5 }
0x1178   :  { %v2691_v34 = vadd.f32 %v3097_v10, %v2684_v37 }
0x1179   :  { %v2697_v56 = vsel %vm339_vm7, %v2689_v48, 0.0 }
0x117a   :  { %2698 = vadd.xlane.f32.xlu0 %v2697_v56  ;;  %v2703_v23 = vsel %vm339_vm7, %v2691_v34, 0.0 }
0x117b   :  { %2704 = vadd.xlane.f32.xlu2 %v2703_v23 }
0x11ac   :  { %v2696_v59 = vpop.xlane.xlu1 %2695 }
0x11ad   :  { %v2706_v42 = vmul.f32 %v2696_v59, %v3860_v57 }
0x11af   :  { %v2710_v53 = vsub.f32 %v2688_v4, %v2706_v42 }
0x11b1   :  { %v2714_v47 = vmul.f32 %v2710_v53, %v2710_v53 }
0x11b3   :  { %v2718_v13 = vsel %vm339_vm7, %v2714_v47, 0.0 }
0x11b4   :  { %2719 = vadd.xlane.f32.xlu2 %v2718_v13 }
0x11e5   :  { %v2702_v40 = vpop.xlane.xlu0 %2701 }
0x11e6   :  { %v2708_v15 = vmul.f32 %v2702_v40, %v3860_v57 }
0x11e8   :  { %v2712_v60 = vsub.f32 %v2690_v20, %v2708_v15 }
0x11ea   :  { %v2716_v16 = vmul.f32 %v2712_v60, %v2712_v60 }
0x11ec   :  { %v2724_v30 = vsel %vm339_vm7, %v2716_v16, 0.0 }
0x11ed   :  { %2725 = vadd.xlane.f32.xlu1 %v2724_v30  ;;  %v2699_v39 = vpop.xlane.xlu0 %2698 }
0x11ee   :  { %v2707_v31 = vmul.f32 %v2699_v39, %v3860_v57  ;;  %v2705_v9 = vpop.xlane.xlu2 %2704 }
0x11ef   :  { %v2709_v1 = vmul.f32 %v2705_v9, %v3860_v57 }
0x11f0   :  { %v4630_v7 = vsub.f32 %v2689_v48, %v2707_v31 }
0x11f1   :  { %v4632_v19 = vsub.f32 %v2691_v34, %v2709_v1 }
0x11f2   :  { %v2715_v62 = vmul.f32 %v4630_v7, %v4630_v7 }
0x11f3   :  { %v2717_v10 = vmul.f32 %v4632_v19, %v4632_v19 }
0x11f4   :  { %v2721_v27 = vsel %vm339_vm7, %v2715_v62, 0.0 }
0x11f5   :  { %2722 = vadd.xlane.f32.xlu1 %v2721_v27  ;;  %v2727_v4 = vsel %vm339_vm7, %v2717_v10, 0.0 }
0x11f6   :  { %2728 = vadd.xlane.f32.xlu0 %v2727_v4 }
0x1227   :  { %v2720_v45 = vpop.xlane.xlu2 %2719 }
0x1228   :  { %v2730_v6 = vmul.f32 %v2720_v45, %v3860_v57 }
0x122a   :  { %v2734_v3 = vadd.f32 1e-05, %v2730_v6 }
0x122c   :  { %3268 = vrsqrt.f32 %v2734_v3  ;;  %vm2744_vm1 = vweird.f32 %v2734_v3 }
0x1232   :  { %v3269_v14 = vpop.eup %3268 }
0x1233   :  { %v2739_v54 = vmul.f32 %v3269_v14, %v2734_v3  ;;  %vm2745_vm0 = vweird.f32 %v3269_v14 }
0x1234   :  { %vm2746_vm7 = vmor %vm2744_vm1, %vm2745_vm0 }
0x1235   :  { %v2740_v61 = vmul.f32 %v3269_v14, %v2739_v54 }
0x1237   :  { %v2741_v50 = vmul.f32 0.5, %v2740_v61 }
0x1239   :  { %v2742_v55 = vsub.f32 1.5, %v2741_v50 }
0x123b   :  { %v2743_v24 = vmul.f32 %v3269_v14, %v2742_v55 }
0x123d   :  { %v2747_v11 = vsel %vm2746_vm7, %v3269_v14, %v2743_v24 }
0x123e   :  { %v2778_v17 = vmul.f32 %v2747_v11, %v2710_v53 }
0x1240   :  { %v2785_v0 = vmul.f32 %v4644_v2, %v2778_v17 }
0x1242   :  { %v4650_v29 = vadd.f32 %v4646_v46, %v2785_v0 }
0x1244   :  { %v2797_v37 = vrot.slane %v4650_v29, 1  ;;  %v2798_v48 = vrot.slane %v4650_v29, 2  ;;  %v2799_v23 = vrot.slane %v4650_v29, 3  ;;  %v2800_v59 = vrot.slane %v4650_v29, 4 }
0x1245   :  { %v2801_v42 = vrot.slane %v4650_v29, 5  ;;  %v2802_v24 = vrot.slane %v4650_v29, 6 }
0x1260   :  { %v2726_v18 = vpop.xlane.xlu1 %2725 }
0x1261   :  { %v2732_v22 = vmul.f32 %v2726_v18, %v3860_v57 }
0x1263   :  { %v2736_v49 = vadd.f32 1e-05, %v2732_v22 }
0x1265   :  { %3270 = vrsqrt.f32 %v2736_v49  ;;  %vm2764_vm8 = vweird.f32 %v2736_v49 }
0x1268   :  { %v2723_v32 = vpop.xlane.xlu1 %2722 }
0x1269   :  { %v2729_v33 = vpop.xlane.xlu0 %2728  ;;  %v2731_v28 = vmul.f32 %v2723_v32, %v3860_v57 }
0x126a   :  { %v2733_v25 = vmul.f32 %v2729_v33, %v3860_v57 }
0x126b   :  { %v3271_v58 = vpop.eup %3270  ;;  %v2735_v38 = vadd.f32 1e-05, %v2731_v28  ;;  %v2803_v28 = vrot.slane %v4650_v29, 7 }
0x126c   :  { %v2759_v52 = vmul.f32 %v3271_v58, %v2736_v49  ;;  %v2737_v35 = vadd.f32 1e-05, %v2733_v25  ;;  %vm2765_vm2 = vweird.f32 %v3271_v58 }
0x126d   :  { %3272 = vrsqrt.f32 %v2735_v38  ;;  %vm2766_vm4 = vmor %vm2764_vm8, %vm2765_vm2  ;;  %vm2754_vm5 = vweird.f32 %v2735_v38 }
0x126e   :  { %v2760_v12 = vmul.f32 %v3271_v58, %v2759_v52  ;;  %3274 = vrsqrt.f32 %v2737_v35  ;;  %vm2774_vm11 = vweird.f32 %v2737_v35 }
0x1270   :  { %v2761_v8 = vmul.f32 0.5, %v2760_v12 }
0x1272   :  { %v2762_v63 = vsub.f32 1.5, %v2761_v8 }
0x1273   :  { %v3273_v44 = vpop.eup %3272 }
0x1274   :  { %v3275_v20 = vpop.eup %3274  ;;  %v2763_v57 = vmul.f32 %v3271_v58, %v2762_v63  ;;  %v2749_v36 = vmul.f32 %v3273_v44, %v2735_v38  ;;  %vm2755_vm10 = vweird.f32 %v3273_v44 }
0x1275   :  { %v2769_v43 = vmul.f32 %v3275_v20, %v2737_v35  ;;  %vm2775_vm6 = vweird.f32 %v3275_v20  ;;  %vm2756_vm12 = vmor %vm2754_vm5, %vm2755_vm10 }
0x1276   :  { %v2767_v51 = vsel %vm2766_vm4, %v3271_v58, %v2763_v57  ;;  %v2750_v41 = vmul.f32 %v3273_v44, %v2749_v36  ;;  %vm2776_vm13 = vmor %vm2774_vm11, %vm2775_vm6 }
0x1277   :  { %v2780_v26 = vmul.f32 %v2767_v51, %v2712_v60  ;;  %v2770_v21 = vmul.f32 %v3275_v20, %v2769_v43 }
0x1278   :  { %v2751_v5 = vmul.f32 0.5, %v2750_v41 }
0x1279   :  { %v2787_v34 = vmul.f32 %v4644_v2, %v2780_v26  ;;  %v2771_v56 = vmul.f32 0.5, %v2770_v21 }
0x127a   :  { %v2752_v53 = vsub.f32 1.5, %v2751_v5 }
0x127b   :  { %v2794_v47 = vadd.f32 %v4646_v46, %v2787_v34  ;;  %v2772_v13 = vsub.f32 1.5, %v2771_v56 }
0x127c   :  { %v2753_v40 = vmul.f32 %v3273_v44, %v2752_v53 }
0x127d   :  { %v2813_v15 = vrot.slane %v2794_v47, 1  ;;  %v2814_v60 = vrot.slane %v2794_v47, 2  ;;  %v2815_v16 = vrot.slane %v2794_v47, 3  ;;  %v2816_v30 = vrot.slane %v2794_v47, 4 }
0x127e   :  { %v2817_v39 = vrot.slane %v2794_v47, 5  ;;  %v2818_v31 = vrot.slane %v2794_v47, 6  ;;  %v2819_v9 = vrot.slane %v2794_v47, 7  ;;  %v2820_v1 = vperm.slane %v2794_v47, 0 }
0x127f   :  { %v2821_v62 = vperm.slane %v2813_v15, 0  ;;  %v2822_v10 = vperm.slane %v2814_v60, 0  ;;  %v2823_v27 = vperm.slane %v2815_v16, 0  ;;  %v2824_v4 = vperm.slane %v2816_v30, 0 }
0x1280   :  { %v2825_v45 = vperm.slane %v2817_v39, 0  ;;  %v2826_v6 = vperm.slane %v2818_v31, 0  ;;  %v2773_v3 = vmul.f32 %v3275_v20, %v2772_v13  ;;  %v2757_v14 = vsel %vm2756_vm12, %v3273_v44, %v2753_v40 }
0x1281   :  { %v2839_v54 = vsel %vm2838_vm9, %v4650_v29, %v2820_v1  ;;  %v2840_v61 = vsel %vm2838_vm9, %v2797_v37, %v2821_v62  ;;  %v2841_v50 = vsel %vm2838_vm9, %v2798_v48, %v2822_v10  ;;  %v2827_v18 = vperm.slane %v2819_v9, 0 }
0x1282   :  { %v2777_v22 = vsel %vm2776_vm13, %v3275_v20, %v2773_v3  ;;  %v2779_v55 = vmul.f32 %v2757_v14, %v4630_v7  ;;  %v2842_v49 = vsel %vm2838_vm9, %v2799_v23, %v2823_v27  ;;  %2849 = vst.msk [vmem:[#allocation22] sm:$0x3] %vm2848_vm3, %v2839_v54  ;;  %v2843_v33 = vsel %vm2838_vm9, %v2800_v59, %v2824_v4 }
0x1283   :  { %v2781_v32 = vmul.f32 %v2777_v22, %v4632_v19  ;;  %2850 = vst.msk [vmem:[#allocation22 + $0x2] sm:$0x3] %vm2848_vm3, %v2840_v61  ;;  %v2844_v11 = vsel %vm2838_vm9, %v2801_v42, %v2825_v45  ;;  %v2845_v58 = vsel %vm2838_vm9, %v2802_v24, %v2826_v6  ;;  %v2846_v19 = vsel %vm2838_vm9, %v2803_v28, %v2827_v18 }
0x1284   :  { %2851 = vst.msk [vmem:[#allocation22 + $0x4] sm:$0x3] %vm2848_vm3, %v2841_v50  ;;  %v2786_v25 = vmul.f32 %v4644_v2, %v2779_v55 }
0x1285   :  { %v2788_v7 = vmul.f32 %v4644_v2, %v2781_v32  ;;  %2852 = vst.msk [vmem:[#allocation22 + $0x6] sm:$0x3] %vm2848_vm3, %v2842_v49 }
0x1286   :  { %2853 = vst.msk [vmem:[#allocation22 + $0x8] sm:$0x3] %vm2848_vm3, %v2843_v33  ;;  %v2793_v35 = vadd.f32 %v4646_v46, %v2786_v25 }
0x1287   :  { %v2795_v38 = vadd.f32 %v4646_v46, %v2788_v7  ;;  %2854 = vst.msk [vmem:[#allocation22 + $0xa] sm:$0x3] %vm2848_vm3, %v2844_v11 }
0x1288   :  { %2855 = vst.msk [vmem:[#allocation22 + $0xc] sm:$0x3] %vm2848_vm3, %v2845_v58 }
0x1289   :  { %v2828_v52 = vperm.slane %v2795_v38, 0  ;;  %2856 = vst.msk [vmem:[#allocation22 + $0xe] sm:$0x3] %vm2848_vm3, %v2846_v19 }
0x128b   :  { %v2847_v2 = vsel %vm2838_vm9, %v2793_v35, %v2828_v52 }
0x128c   :  { %2857 = vst.msk [vmem:[#allocation22 + $0x10] sm:$0x3] %vm2848_vm3, %v2847_v2 }
0x128d   :  { %2870 = dma.vmem_to_hbm [thread:$0]  %s2863_s9, 288, %s2865_s3, [#allocation4], %s3628_s28, %s3628_s28, %s3629_s26  }
0x128e   :  { %3602 = dma.done.wait [#allocation4], 288  }
0x128f   :  { %3603 = vsyncadd [#allocation4], 4294967008 }
0x1290   :  { %2875 = vsyncpa [#allocation3], 1 }
0x1291   :  { %2876 = vsyncpa [#allocation6], 1 }
0x1292   :  { %2877 = vsyncpa [#allocation9], 1 }
0x1293   :  { %2878 = vsyncpa [#allocation12], 1 }
0x1294   :  { %2879 = vsyncpa [#allocation15], 1 }
0x1295   :  { %2880 = vsyncpa [#allocation18], 1 }
0x1296   :  { %2881 = vsyncpa [#allocation21], 1 }
0x1297   :  { %2882 = vsyncpa [#allocation4], 1 }

</bundles_post_ra>
